<compile_context>
chip_gen: v5e
topology: v5e:2x2
jax: 0.10.0
libtpu: 0.0.40
codegen_flags: <defaults>
</compile_context>

<pallas_src>
import jax
import jax.numpy as jnp
from jax import lax
from jax.experimental import pallas as pl
from jax.experimental.pallas import tpu as pltpu

# small, deterministic problem sizes (hidden_size=32 instead of 128 for speed)
B, T, VOCAB, E, H = 2, 8, 32, 32, 32
BP = 8                      # batch padded to one sublane tile
HPAD = 64                   # per-direction hidden padded to 64 lanes
H2P = 2 * HPAD              # combined [fwd | bwd] state width = 128 lanes
G3 = 3 * H2P                # fused gate width [r | z | n] = 384 lanes
NUM_CLASSES = 2
LN_EPS = 1e-5


def _mm(a, b):
    """MXU matmul with f32 accumulation."""
    return jnp.dot(a, b, preferred_element_type=jnp.float32)


def _tree_reduce(fn, xs):
    """Pairwise (log-depth) reduction of a list of small tensors."""
    xs = list(xs)
    while len(xs) > 1:
        nxt = [fn(xs[i], xs[i + 1]) for i in range(0, len(xs) - 1, 2)]
        if len(xs) % 2:
            nxt.append(xs[-1])
        xs = nxt
    return xs[0]


def _run_bidir_layer(gi_ref, whh, bhhn, s_to_ref, s_rt_ref):
    """One fused bidirectional GRU layer, T fully unrolled steps.

    gi_ref  : (T*BP, G3) scratch holding precomputed input contributions
              (biases folded); row block i covers forward time i (lanes
              [0,HPAD)) and backward time T-1-i (lanes [HPAD,2*HPAD)).
    whh     : (H2P, G3) fused, block-diagonal, zero-padded hidden weights.
    bhhn    : (1, H2P) hidden bias of the n gate (stays inside r * (...)).
    Writes h(step i) to s_to_ref at i*BP and to s_rt_ref at (T-1-i)*BP.
    """
    h = jnp.zeros((BP, H2P), jnp.float32)
    for i in range(T):                      # fully unrolled; static indices
        lo = i * BP
        gh = _mm(h, whh)                    # ONE fused matmul per step
        gi = gi_ref[lo:lo + BP]
        r = jax.nn.sigmoid(gi[:, 0:H2P] + gh[:, 0:H2P])
        z = jax.nn.sigmoid(gi[:, H2P:2 * H2P] + gh[:, H2P:2 * H2P])
        n = jnp.tanh(gi[:, 2 * H2P:3 * H2P] + r * (gh[:, 2 * H2P:3 * H2P] + bhhn))
        h = (1.0 - z) * n + z * h
        s_to_ref[lo:lo + BP, :] = h                       # step order
        s_rt_ref[(T - 1 - i) * BP:(T - i) * BP, :] = h    # reversed order


def gru_model_kernel(x0_ref, w0ih_ref, w1ih_ref, whh_ref, bih_ref, bhhn_ref,
                     watt1_ref, batt1_ref, watt2_ref, lngb_ref, wfc_ref,
                     fcb_ref, logits_ref, gi_ref, s_to_ref, s_rt_ref):
    """Full forward: 2-layer bi-GRU -> attention pool -> LayerNorm -> Linear.

    x0_ref   : (T*BP, 2E)  row block t = [embedding(t) | embedding(T-1-t)]
    w0ih_ref : (2E, G3)    layer-0 fused/padded input weights (+bias in bih)
    w1ih_ref : (2*H2P, G3) layer-1 fused input weights over [s_to | s_rt]
    whh_ref  : (2, H2P, G3) fused hidden-hidden weights per layer
    bih_ref  : (2, G3)     fused ih (+hh for r,z) biases per layer
    bhhn_ref : (2, H2P)    hidden n-gate bias per layer
    """
    # ---- layer 0: single hoisted fused input matmul, streamed to scratch ---
    gi_ref[...] = _mm(x0_ref[...], w0ih_ref[...]) + bih_ref[0:1, :]
    _run_bidir_layer(gi_ref, whh_ref[0], bhhn_ref[0:1, :], s_to_ref, s_rt_ref)

    # ---- layer 1: single fused input matmul over both orderings ------------
    # (GRU inter-layer dropout p=0.3 is identity at inference)
    cat0 = jnp.concatenate([s_to_ref[...], s_rt_ref[...]], axis=-1)
    gi_ref[...] = _mm(cat0, w1ih_ref[...]) + bih_ref[1:2, :]
    _run_bidir_layer(gi_ref, whh_ref[1], bhhn_ref[1:2, :], s_to_ref, s_rt_ref)

    # ---- attention: Linear(2H->H) -> tanh -> Linear(H->1) -> softmax(time) -
    cat1 = jnp.concatenate([s_to_ref[...], s_rt_ref[...]], axis=-1)
    e = jnp.tanh(_mm(cat1, watt1_ref[...]) + batt1_ref[...])      # (T*BP, H2P)
    sc = _mm(e, watt2_ref[...])                                   # (T*BP, 1)
    # (Linear(H,1) bias is constant along the softmax axis -> omitted)
    sc_t = [sc[t * BP:(t + 1) * BP] for t in range(T)]            # T x (BP, 1)
    m = _tree_reduce(jnp.maximum, sc_t)
    p_t = [jnp.exp(s - m) for s in sc_t]
    denom = _tree_reduce(jnp.add, p_t)
    inv = 1.0 / denom                                 # exact (review note)
    w_t = [p * inv for p in p_t]

    # ---- attention-weighted context over time (tree-reduced) ---------------
    # fwd lanes come from step-order states, bwd lanes from reversed states
    ctx_a = _tree_reduce(
        jnp.add, [w_t[t] * s_to_ref[t * BP:(t + 1) * BP] for t in range(T)])
    ctx_b = _tree_reduce(
        jnp.add, [w_t[t] * s_rt_ref[t * BP:(t + 1) * BP] for t in range(T)])
    fwd_lane = lax.broadcasted_iota(jnp.int32, (BP, H2P), 1) < HPAD
    context = jnp.where(fwd_lane, ctx_a, ctx_b)       # padded lanes stay 0

    # ---- Dropout(0.5) identity; LayerNorm over the 2H real features --------
    # padded lanes are exactly zero, so E[x] and E[x^2] over the 2H real
    # features can be computed from full-lane sums divided by 2H.
    inv_feat = 1.0 / (2 * H)
    mean = jnp.sum(context, axis=-1, keepdims=True) * inv_feat
    meansq = jnp.sum(context * context, axis=-1, keepdims=True) * inv_feat
    var = meansq - mean * mean
    normed = (context - mean) * lax.rsqrt(var + LN_EPS)
    lngb = lngb_ref[...]
    normed = normed * lngb[0:1, :] + lngb[1:2, :]     # padded gamma/beta = 0
    logits_ref[...] = _mm(normed, wfc_ref[...]) + fcb_ref[...]


# --------------------------------------------------------------------------
# parameter construction + one-time packing + jitted wrapper (plain JAX glue)
# --------------------------------------------------------------------------
def init_params(key):
    keys = iter(jax.random.split(key, 64))

    def u(shape, fan_in):
        s = 1.0 / jnp.sqrt(jnp.float32(fan_in))
        return jax.random.uniform(next(keys), shape, jnp.float32, -s, s)

    params = {}
    emb = jax.random.normal(next(keys), (VOCAB, E), jnp.float32) * 0.1
    params["embedding"] = emb.at[0].set(0.0)   # padding_idx=0 -> zero row

    # GRU: PyTorch convention, weight_ih (3H, Din), weight_hh (3H, H),
    # gate order [r, z, n], biases (1, 3H).
    for layer, din in ((0, E), (1, 2 * H)):
        for tag in ("f", "b"):
            p = f"l{layer}{tag}"
            params[f"w_ih_{p}"] = u((3 * H, din), H)
            params[f"w_hh_{p}"] = u((3 * H, H), H)
            params[f"b_ih_{p}"] = u((1, 3 * H), H)
            params[f"b_hh_{p}"] = u((1, 3 * H), H)

    # attention MLP
    params["att_w1"] = u((H, 2 * H), 2 * H)
    params["att_b1"] = u((1, H), 2 * H)
    params["att_w2"] = u((1, H), H)
    params["att_b2"] = u((1, 1), H)      # unused: softmax is shift-invariant

    # LayerNorm(2H)
    params["ln_g"] = jnp.ones((1, 2 * H), jnp.float32)
    params["ln_b"] = jnp.zeros((1, 2 * H), jnp.float32)

    # final classifier
    params["fc_w"] = u((NUM_CLASSES, 2 * H), 2 * H)
    params["fc_b"] = u((1, NUM_CLASSES), 2 * H)
    return params


def _gate_t(w):
    """(3H, Din) PyTorch weight -> list of 3 per-gate (Din, H) transposed."""
    return [w[k * H:(k + 1) * H, :].T for k in range(3)]


def _bias_gates(b):
    """(1, 3H) -> list of 3 per-gate (H,) biases."""
    return [b[0, k * H:(k + 1) * H] for k in range(3)]


def pack_kernel_params(p):
    """One-time weight packing: fused gates along N, zero-padded lane-dense
    [fwd | bwd] layout (HPAD per direction).  Padded rows/cols are zero so the
    padded state lanes stay identically zero through the recurrence."""
    f32 = jnp.float32

    # ---- layer-0 input-to-hidden, fused over gates ---------------------------
    w0f, w0b = _gate_t(p["w_ih_l0f"]), _gate_t(p["w_ih_l0b"])      # (E, H)
    w0 = jnp.zeros((2 * E, G3), f32)
    for k in range(3):
        c = k * H2P
        w0 = w0.at[0:E, c:c + H].set(w0f[k])
        w0 = w0.at[E:2 * E, c + HPAD:c + HPAD + H].set(w0b[k])

    # ---- hidden-to-hidden, fused, per layer ----------------------------------
    def pack_hh(whf, whb):
        hf, hb = _gate_t(whf), _gate_t(whb)                        # (H, H)
        m = jnp.zeros((H2P, G3), f32)
        for k in range(3):
            c = k * H2P
            m = m.at[0:H, c:c + H].set(hf[k])
            m = m.at[HPAD:HPAD + H, c + HPAD:c + HPAD + H].set(hb[k])
        return m

    whh = jnp.stack([pack_hh(p["w_hh_l0f"], p["w_hh_l0b"]),
                     pack_hh(p["w_hh_l1f"], p["w_hh_l1b"])])       # (2,H2P,G3)

    # ---- layer-1 input-to-hidden over cat([s_to | s_rt]) lanes ---------------
    # s_to(t) = [f0(t) | b0(T-1-t)], s_rt(t) = [f0(T-1-t) | b0(t)]
    w1f, w1b = _gate_t(p["w_ih_l1f"]), _gate_t(p["w_ih_l1b"])      # (2H, H)
    w1 = jnp.zeros((2 * H2P, G3), f32)
    for k in range(3):
        c = k * H2P
        # forward dir (out lanes [c, c+H)) reads out0(t):
        #   f0(t)   <- cat lanes [0, H);  b0(t) <- cat lanes [H2P+HPAD, +H)
        w1 = w1.at[0:H, c:c + H].set(w1f[k][0:H, :])
        w1 = w1.at[H2P + HPAD:H2P + HPAD + H, c:c + H].set(w1f[k][H:2 * H, :])
        # backward dir (out lanes [c+HPAD, +H)) reads out0(T-1-i):
        #   f0(T-1-i) <- cat lanes [H2P, +H);  b0(T-1-i) <- cat lanes [HPAD, +H)
        w1 = w1.at[H2P:H2P + H, c + HPAD:c + HPAD + H].set(w1b[k][0:H, :])
        w1 = w1.at[HPAD:HPAD + H, c + HPAD:c + HPAD + H].set(w1b[k][H:2 * H, :])

    # ---- biases: fused [r(ih+hh) | z(ih+hh) | n(ih)] + separate n_hh ---------
    def pack_bias(bihf, bhhf, bihb, bhhb):
        bif, bhf = _bias_gates(bihf), _bias_gates(bhhf)
        bib, bhb = _bias_gates(bihb), _bias_gates(bhhb)
        row = jnp.zeros((G3,), f32)
        for k in range(2):                       # r, z: fold hh bias in
            c = k * H2P
            row = row.at[c:c + H].set(bif[k] + bhf[k])
            row = row.at[c + HPAD:c + HPAD + H].set(bib[k] + bhb[k])
        c = 2 * H2P                              # n: ih part only
        row = row.at[c:c + H].set(bif[2])
        row = row.at[c + HPAD:c + HPAD + H].set(bib[2])
        hn = jnp.zeros((H2P,), f32)
        hn = hn.at[0:H].set(bhf[2]).at[HPAD:HPAD + H].set(bhb[2])
        return row, hn

    b0, hn0 = pack_bias(p["b_ih_l0f"], p["b_hh_l0f"],
                        p["b_ih_l0b"], p["b_hh_l0b"])
    b1, hn1 = pack_bias(p["b_ih_l1f"], p["b_hh_l1f"],
                        p["b_ih_l1b"], p["b_hh_l1b"])
    bih = jnp.stack([b0, b1])                    # (2, G3)
    bhhn = jnp.stack([hn0, hn1])                 # (2, H2P)

    # ---- attention (inputs read from the same cat([s_to | s_rt]) layout) -----
    wa1t = p["att_w1"].T                         # (2H, H): rows [0,H)=fwd feats
    wa1 = jnp.zeros((2 * H2P, H2P), f32)
    wa1 = wa1.at[0:H, 0:H].set(wa1t[0:H])                          # f1(t)
    wa1 = wa1.at[H2P + HPAD:H2P + HPAD + H, 0:H].set(wa1t[H:2 * H])  # b1(t)
    ba1 = jnp.zeros((1, H2P), f32).at[0, 0:H].set(p["att_b1"][0])
    wa2 = jnp.zeros((H2P, 1), f32).at[0:H, :].set(p["att_w2"].T)

    # ---- LayerNorm gamma/beta (padded lanes -> 0) -----------------------------
    lngb = jnp.zeros((2, H2P), f32)
    lngb = lngb.at[0, 0:H].set(p["ln_g"][0, 0:H])
    lngb = lngb.at[0, HPAD:HPAD + H].set(p["ln_g"][0, H:2 * H])
    lngb = lngb.at[1, 0:H].set(p["ln_b"][0, 0:H])
    lngb = lngb.at[1, HPAD:HPAD + H].set(p["ln_b"][0, H:2 * H])

    # ---- classifier ------------------------------------------------------------
    fcwt = p["fc_w"].T                           # (2H, C)
    wfc = jnp.zeros((H2P, NUM_CLASSES), f32)
    wfc = wfc.at[0:H, :].set(fcwt[0:H]).at[HPAD:HPAD + H, :].set(fcwt[H:2 * H])

    return dict(w0_ih=w0, w1_ih=w1, whh=whh, bih=bih, bhhn=bhhn,
                w_att1=wa1, b_att1=ba1, w_att2=wa2, ln_gb=lngb,
                w_fc=wfc, fc_b=p["fc_b"])


@jax.jit
def gru_model_forward(ids, embedding, packed):
    """Jitted forward: embedding gather + x0 assembly + one pallas_call."""
    bb, tt = ids.shape
    # pad batch to one sublane tile; pad token 0 hits the zero padding row
    ids_p = jnp.pad(ids, ((0, BP - bb), (0, 0)))
    # TODO(synk): embedding gather kept in the jitted wrapper (in-kernel
    # scalar-prefetch gather is only a modest win at this size).
    emb = embedding[ids_p].astype(jnp.float32)                 # (BP, T, E)
    emb_tm = jnp.transpose(emb, (1, 0, 2))                     # (T, BP, E)
    x0 = jnp.concatenate([emb_tm, emb_tm[::-1]], axis=-1).reshape(tt * BP, 2 * E)

    vmem = pl.BlockSpec(memory_space=pltpu.MemorySpace.VMEM)
    inputs = (x0, packed["w0_ih"], packed["w1_ih"], packed["whh"],
              packed["bih"], packed["bhhn"], packed["w_att1"],
              packed["b_att1"], packed["w_att2"], packed["ln_gb"],
              packed["w_fc"], packed["fc_b"])

    logits_p = pl.pallas_call(
        gru_model_kernel,
        out_shape=jax.ShapeDtypeStruct((BP, NUM_CLASSES), jnp.float32),
        in_specs=[vmem] * len(inputs),
        out_specs=vmem,
        scratch_shapes=[
            pltpu.VMEM((T * BP, G3), jnp.float32),    # fused gate inputs gi
            pltpu.VMEM((T * BP, H2P), jnp.float32),   # states in step order
            pltpu.VMEM((T * BP, H2P), jnp.float32),   # states in reversed order
        ],
    )(*inputs)
    return logits_p[:bb]


if __name__ == "__main__":
    key = jax.random.PRNGKey(0)
    k_ids, k_params = jax.random.split(key)
    ids = jax.random.randint(k_ids, (B, T), 0, VOCAB, dtype=jnp.int32)
    params = init_params(k_params)
    packed = pack_kernel_params(params)        # packing hoisted: done once

    logits = gru_model_forward(ids, params["embedding"], packed)
    jax.block_until_ready(logits)
    assert logits.shape == (B, NUM_CLASSES)
    assert bool(jnp.all(jnp.isfinite(logits)))
    print("KERNEL_OK")
</pallas_src>

<mosaic_0001>
module attributes {stable_mosaic.version = 11 : i64} {
  func.func @gru_model_kernel(%arg0: memref<64x64xf32, #tpu.memory_space<vmem>>, %arg1: memref<64x384xf32, #tpu.memory_space<vmem>>, %arg2: memref<256x384xf32, #tpu.memory_space<vmem>>, %arg3: memref<2x128x384xf32, #tpu.memory_space<vmem>>, %arg4: memref<2x384xf32, #tpu.memory_space<vmem>>, %arg5: memref<2x128xf32, #tpu.memory_space<vmem>>, %arg6: memref<256x128xf32, #tpu.memory_space<vmem>>, %arg7: memref<1x128xf32, #tpu.memory_space<vmem>>, %arg8: memref<128x1xf32, #tpu.memory_space<vmem>>, %arg9: memref<2x128xf32, #tpu.memory_space<vmem>>, %arg10: memref<128x2xf32, #tpu.memory_space<vmem>>, %arg11: memref<1x2xf32, #tpu.memory_space<vmem>>, %arg12: memref<8x2xf32, #tpu.memory_space<vmem>>, %arg13: memref<64x384xf32, #tpu.memory_space<vmem>>, %arg14: memref<64x128xf32, #tpu.memory_space<vmem>>, %arg15: memref<64x128xf32, #tpu.memory_space<vmem>>) attributes {dimension_semantics = [], scalar_prefetch = 0 : i64, scratch_operands = 3 : i64, tpu.core_type = #tpu.core_type<tc>} {
    %c0 = arith.constant 0 : index
    %c0_0 = arith.constant 0 : index
    %0 = vector.load %arg0[%c0, %c0_0] : memref<64x64xf32, #tpu.memory_space<vmem>>, vector<64x64xf32>
    %c0_1 = arith.constant 0 : index
    %c0_2 = arith.constant 0 : index
    %1 = vector.load %arg1[%c0_1, %c0_2] : memref<64x384xf32, #tpu.memory_space<vmem>>, vector<64x384xf32>
    %cst = arith.constant dense<0.000000e+00> : vector<64x384xf32>
    %2 = tpu.matmul %0, %1, %cst {dimension_numbers = #tpu.dot_dimension_numbers<[1], [0], [0], [1], [0, 0, 1, 1], [], []>} : vector<64x64xf32>, vector<64x384xf32>, vector<64x384xf32> -> vector<64x384xf32>
    %c0_3 = arith.constant 0 : index
    %c0_4 = arith.constant 0 : index
    %3 = vector.load %arg4[%c0_3, %c0_4] : memref<2x384xf32, #tpu.memory_space<vmem>>, vector<1x384xf32>
    %4 = vector.broadcast %3 : vector<1x384xf32> to vector<64x384xf32>
    %5 = arith.addf %2, %4 : vector<64x384xf32>
    %c0_5 = arith.constant 0 : index
    %c0_6 = arith.constant 0 : index
    %6 = vector.load %arg13[%c0_5, %c0_6] : memref<64x384xf32, #tpu.memory_space<vmem>>, vector<64x384xf32>
    tpu.vector_store %arg13[%c0_5, %c0_6], %5 {strides = array<i32>} : memref<64x384xf32, #tpu.memory_space<vmem>>, vector<64x384xf32>,
    %c0_7 = arith.constant 0 : index
    %c0_8 = arith.constant 0 : index
    %c0_9 = arith.constant 0 : index
    %7 = vector.load %arg3[%c0_7, %c0_8, %c0_9] : memref<2x128x384xf32, #tpu.memory_space<vmem>>, vector<1x128x384xf32>
    %8 = vector.shape_cast %7 : vector<1x128x384xf32> to vector<128x384xf32>
    %c0_10 = arith.constant 0 : index
    %c0_11 = arith.constant 0 : index
    %9 = vector.load %arg5[%c0_10, %c0_11] : memref<2x128xf32, #tpu.memory_space<vmem>>, vector<1x128xf32>
    %cst_12 = arith.constant 0.000000e+00 : f32
    %10 = vector.broadcast %cst_12 : f32 to vector<8x128xf32>
    %cst_13 = arith.constant dense<0.000000e+00> : vector<8x384xf32>
    %11 = tpu.matmul %10, %8, %cst_13 {dimension_numbers = #tpu.dot_dimension_numbers<[1], [0], [0], [1], [0, 0, 1, 1], [], []>} : vector<8x128xf32>, vector<128x384xf32>, vector<8x384xf32> -> vector<8x384xf32>
    %c0_14 = arith.constant 0 : index
    %c0_15 = arith.constant 0 : index
    %12 = vector.load %arg13[%c0_14, %c0_15] : memref<64x384xf32, #tpu.memory_space<vmem>>, vector<8x384xf32>
    %13 = vector.extract_strided_slice %12 {offsets = [0, 0], sizes = [8, 128], strides = [1, 1]} : vector<8x384xf32> to vector<8x128xf32>
    %14 = vector.extract_strided_slice %11 {offsets = [0, 0], sizes = [8, 128], strides = [1, 1]} : vector<8x384xf32> to vector<8x128xf32>
    %15 = arith.addf %13, %14 : vector<8x128xf32>
    %16 = arith.negf %15 : vector<8x128xf32>
    %17 = math.exp %16 : vector<8x128xf32>
    %cst_16 = arith.constant 1.000000e+00 : f32
    %18 = vector.broadcast %cst_16 : f32 to vector<8x128xf32>
    %19 = arith.addf %18, %17 : vector<8x128xf32>
    %20 = arith.divf %18, %19 : vector<8x128xf32>
    %21 = vector.extract_strided_slice %12 {offsets = [0, 128], sizes = [8, 128], strides = [1, 1]} : vector<8x384xf32> to vector<8x128xf32>
    %22 = vector.extract_strided_slice %11 {offsets = [0, 128], sizes = [8, 128], strides = [1, 1]} : vector<8x384xf32> to vector<8x128xf32>
    %23 = arith.addf %21, %22 : vector<8x128xf32>
    %24 = arith.negf %23 : vector<8x128xf32>
    %25 = math.exp %24 : vector<8x128xf32>
    %cst_17 = arith.constant 1.000000e+00 : f32
    %26 = vector.broadcast %cst_17 : f32 to vector<8x128xf32>
    %27 = arith.addf %26, %25 : vector<8x128xf32>
    %28 = arith.divf %26, %27 : vector<8x128xf32>
    %29 = vector.extract_strided_slice %12 {offsets = [0, 256], sizes = [8, 128], strides = [1, 1]} : vector<8x384xf32> to vector<8x128xf32>
    %30 = vector.extract_strided_slice %11 {offsets = [0, 256], sizes = [8, 128], strides = [1, 1]} : vector<8x384xf32> to vector<8x128xf32>
    %31 = vector.broadcast %9 : vector<1x128xf32> to vector<8x128xf32>
    %32 = arith.addf %30, %31 : vector<8x128xf32>
    %33 = arith.mulf %20, %32 : vector<8x128xf32>
    %34 = arith.addf %29, %33 : vector<8x128xf32>
    %35 = math.tanh %34 : vector<8x128xf32>
    %cst_18 = arith.constant 1.000000e+00 : f32
    %36 = vector.broadcast %cst_18 : f32 to vector<8x128xf32>
    %37 = arith.subf %36, %28 : vector<8x128xf32>
    %38 = arith.mulf %37, %35 : vector<8x128xf32>
    %39 = arith.mulf %28, %10 : vector<8x128xf32>
    %40 = arith.addf %38, %39 : vector<8x128xf32>
    %c0_19 = arith.constant 0 : index
    %c0_20 = arith.constant 0 : index
    %41 = vector.load %arg14[%c0_19, %c0_20] : memref<64x128xf32, #tpu.memory_space<vmem>>, vector<8x128xf32>
    tpu.vector_store %arg14[%c0_19, %c0_20], %40 {strides = array<i32>} : memref<64x128xf32, #tpu.memory_space<vmem>>, vector<8x128xf32>,
    %c56 = arith.constant 56 : index
    %c0_21 = arith.constant 0 : index
    %42 = vector.load %arg15[%c56, %c0_21] : memref<64x128xf32, #tpu.memory_space<vmem>>, vector<8x128xf32>
    tpu.vector_store %arg15[%c56, %c0_21], %40 {strides = array<i32>} : memref<64x128xf32, #tpu.memory_space<vmem>>, vector<8x128xf32>,
    %cst_22 = arith.constant dense<0.000000e+00> : vector<8x384xf32>
    %43 = tpu.matmul %40, %8, %cst_22 {dimension_numbers = #tpu.dot_dimension_numbers<[1], [0], [0], [1], [0, 0, 1, 1], [], []>} : vector<8x128xf32>, vector<128x384xf32>, vector<8x384xf32> -> vector<8x384xf32>
    %c8 = arith.constant 8 : index
    %c0_23 = arith.constant 0 : index
    %44 = vector.load %arg13[%c8, %c0_23] : memref<64x384xf32, #tpu.memory_space<vmem>>, vector<8x384xf32>
    %45 = vector.extract_strided_slice %44 {offsets = [0, 0], sizes = [8, 128], strides = [1, 1]} : vector<8x384xf32> to vector<8x128xf32>
    %46 = vector.extract_strided_slice %43 {offsets = [0, 0], sizes = [8, 128], strides = [1, 1]} : vector<8x384xf32> to vector<8x128xf32>
    %47 = arith.addf %45, %46 : vector<8x128xf32>
    %48 = arith.negf %47 : vector<8x128xf32>
    %49 = math.exp %48 : vector<8x128xf32>
    %cst_24 = arith.constant 1.000000e+00 : f32
    %50 = vector.broadcast %cst_24 : f32 to vector<8x128xf32>
    %51 = arith.addf %50, %49 : vector<8x128xf32>
    %52 = arith.divf %50, %51 : vector<8x128xf32>
    %53 = vector.extract_strided_slice %44 {offsets = [0, 128], sizes = [8, 128], strides = [1, 1]} : vector<8x384xf32> to vector<8x128xf32>
    %54 = vector.extract_strided_slice %43 {offsets = [0, 128], sizes = [8, 128], strides = [1, 1]} : vector<8x384xf32> to vector<8x128xf32>
    %55 = arith.addf %53, %54 : vector<8x128xf32>
    %56 = arith.negf %55 : vector<8x128xf32>
    %57 = math.exp %56 : vector<8x128xf32>
    %cst_25 = arith.constant 1.000000e+00 : f32
    %58 = vector.broadcast %cst_25 : f32 to vector<8x128xf32>
    %59 = arith.addf %58, %57 : vector<8x128xf32>
    %60 = arith.divf %58, %59 : vector<8x128xf32>
    %61 = vector.extract_strided_slice %44 {offsets = [0, 256], sizes = [8, 128], strides = [1, 1]} : vector<8x384xf32> to vector<8x128xf32>
    %62 = vector.extract_strided_slice %43 {offsets = [0, 256], sizes = [8, 128], strides = [1, 1]} : vector<8x384xf32> to vector<8x128xf32>
    %63 = vector.broadcast %9 : vector<1x128xf32> to vector<8x128xf32>
    %64 = arith.addf %62, %63 : vector<8x128xf32>
    %65 = arith.mulf %52, %64 : vector<8x128xf32>
    %66 = arith.addf %61, %65 : vector<8x128xf32>
    %67 = math.tanh %66 : vector<8x128xf32>
    %cst_26 = arith.constant 1.000000e+00 : f32
    %68 = vector.broadcast %cst_26 : f32 to vector<8x128xf32>
    %69 = arith.subf %68, %60 : vector<8x128xf32>
    %70 = arith.mulf %69, %67 : vector<8x128xf32>
    %71 = arith.mulf %60, %40 : vector<8x128xf32>
    %72 = arith.addf %70, %71 : vector<8x128xf32>
    %c8_27 = arith.constant 8 : index
    %c0_28 = arith.constant 0 : index
    %73 = vector.load %arg14[%c8_27, %c0_28] : memref<64x128xf32, #tpu.memory_space<vmem>>, vector<8x128xf32>
    tpu.vector_store %arg14[%c8_27, %c0_28], %72 {strides = array<i32>} : memref<64x128xf32, #tpu.memory_space<vmem>>, vector<8x128xf32>,
    %c48 = arith.constant 48 : index
    %c0_29 = arith.constant 0 : index
    %74 = vector.load %arg15[%c48, %c0_29] : memref<64x128xf32, #tpu.memory_space<vmem>>, vector<8x128xf32>
    tpu.vector_store %arg15[%c48, %c0_29], %72 {strides = array<i32>} : memref<64x128xf32, #tpu.memory_space<vmem>>, vector<8x128xf32>,
    %cst_30 = arith.constant dense<0.000000e+00> : vector<8x384xf32>
    %75 = tpu.matmul %72, %8, %cst_30 {dimension_numbers = #tpu.dot_dimension_numbers<[1], [0], [0], [1], [0, 0, 1, 1], [], []>} : vector<8x128xf32>, vector<128x384xf32>, vector<8x384xf32> -> vector<8x384xf32>
    %c16 = arith.constant 16 : index
    %c0_31 = arith.constant 0 : index
    %76 = vector.load %arg13[%c16, %c0_31] : memref<64x384xf32, #tpu.memory_space<vmem>>, vector<8x384xf32>
    %77 = vector.extract_strided_slice %76 {offsets = [0, 0], sizes = [8, 128], strides = [1, 1]} : vector<8x384xf32> to vector<8x128xf32>
    %78 = vector.extract_strided_slice %75 {offsets = [0, 0], sizes = [8, 128], strides = [1, 1]} : vector<8x384xf32> to vector<8x128xf32>
    %79 = arith.addf %77, %78 : vector<8x128xf32>
    %80 = arith.negf %79 : vector<8x128xf32>
    %81 = math.exp %80 : vector<8x128xf32>
    %cst_32 = arith.constant 1.000000e+00 : f32
    %82 = vector.broadcast %cst_32 : f32 to vector<8x128xf32>
    %83 = arith.addf %82, %81 : vector<8x128xf32>
    %84 = arith.divf %82, %83 : vector<8x128xf32>
    %85 = vector.extract_strided_slice %76 {offsets = [0, 128], sizes = [8, 128], strides = [1, 1]} : vector<8x384xf32> to vector<8x128xf32>
    %86 = vector.extract_strided_slice %75 {offsets = [0, 128], sizes = [8, 128], strides = [1, 1]} : vector<8x384xf32> to vector<8x128xf32>
    %87 = arith.addf %85, %86 : vector<8x128xf32>
    %88 = arith.negf %87 : vector<8x128xf32>
    %89 = math.exp %88 : vector<8x128xf32>
    %cst_33 = arith.constant 1.000000e+00 : f32
    %90 = vector.broadcast %cst_33 : f32 to vector<8x128xf32>
    %91 = arith.addf %90, %89 : vector<8x128xf32>
    %92 = arith.divf %90, %91 : vector<8x128xf32>
    %93 = vector.extract_strided_slice %76 {offsets = [0, 256], sizes = [8, 128], strides = [1, 1]} : vector<8x384xf32> to vector<8x128xf32>
    %94 = vector.extract_strided_slice %75 {offsets = [0, 256], sizes = [8, 128], strides = [1, 1]} : vector<8x384xf32> to vector<8x128xf32>
    %95 = vector.broadcast %9 : vector<1x128xf32> to vector<8x128xf32>
    %96 = arith.addf %94, %95 : vector<8x128xf32>
    %97 = arith.mulf %84, %96 : vector<8x128xf32>
    %98 = arith.addf %93, %97 : vector<8x128xf32>
    %99 = math.tanh %98 : vector<8x128xf32>
    %cst_34 = arith.constant 1.000000e+00 : f32
    %100 = vector.broadcast %cst_34 : f32 to vector<8x128xf32>
    %101 = arith.subf %100, %92 : vector<8x128xf32>
    %102 = arith.mulf %101, %99 : vector<8x128xf32>
    %103 = arith.mulf %92, %72 : vector<8x128xf32>
    %104 = arith.addf %102, %103 : vector<8x128xf32>
    %c16_35 = arith.constant 16 : index
    %c0_36 = arith.constant 0 : index
    %105 = vector.load %arg14[%c16_35, %c0_36] : memref<64x128xf32, #tpu.memory_space<vmem>>, vector<8x128xf32>
    tpu.vector_store %arg14[%c16_35, %c0_36], %104 {strides = array<i32>} : memref<64x128xf32, #tpu.memory_space<vmem>>, vector<8x128xf32>,
    %c40 = arith.constant 40 : index
    %c0_37 = arith.constant 0 : index
    %106 = vector.load %arg15[%c40, %c0_37] : memref<64x128xf32, #tpu.memory_space<vmem>>, vector<8x128xf32>
    tpu.vector_store %arg15[%c40, %c0_37], %104 {strides = array<i32>} : memref<64x128xf32, #tpu.memory_space<vmem>>, vector<8x128xf32>,
    %cst_38 = arith.constant dense<0.000000e+00> : vector<8x384xf32>
    %107 = tpu.matmul %104, %8, %cst_38 {dimension_numbers = #tpu.dot_dimension_numbers<[1], [0], [0], [1], [0, 0, 1, 1], [], []>} : vector<8x128xf32>, vector<128x384xf32>, vector<8x384xf32> -> vector<8x384xf32>
    %c24 = arith.constant 24 : index
    %c0_39 = arith.constant 0 : index
    %108 = vector.load %arg13[%c24, %c0_39] : memref<64x384xf32, #tpu.memory_space<vmem>>, vector<8x384xf32>
    %109 = vector.extract_strided_slice %108 {offsets = [0, 0], sizes = [8, 128], strides = [1, 1]} : vector<8x384xf32> to vector<8x128xf32>
    %110 = vector.extract_strided_slice %107 {offsets = [0, 0], sizes = [8, 128], strides = [1, 1]} : vector<8x384xf32> to vector<8x128xf32>
    %111 = arith.addf %109, %110 : vector<8x128xf32>
    %112 = arith.negf %111 : vector<8x128xf32>
    %113 = math.exp %112 : vector<8x128xf32>
    %cst_40 = arith.constant 1.000000e+00 : f32
    %114 = vector.broadcast %cst_40 : f32 to vector<8x128xf32>
    %115 = arith.addf %114, %113 : vector<8x128xf32>
    %116 = arith.divf %114, %115 : vector<8x128xf32>
    %117 = vector.extract_strided_slice %108 {offsets = [0, 128], sizes = [8, 128], strides = [1, 1]} : vector<8x384xf32> to vector<8x128xf32>
    %118 = vector.extract_strided_slice %107 {offsets = [0, 128], sizes = [8, 128], strides = [1, 1]} : vector<8x384xf32> to vector<8x128xf32>
    %119 = arith.addf %117, %118 : vector<8x128xf32>
    %120 = arith.negf %119 : vector<8x128xf32>
    %121 = math.exp %120 : vector<8x128xf32>
    %cst_41 = arith.constant 1.000000e+00 : f32
    %122 = vector.broadcast %cst_41 : f32 to vector<8x128xf32>
    %123 = arith.addf %122, %121 : vector<8x128xf32>
    %124 = arith.divf %122, %123 : vector<8x128xf32>
    %125 = vector.extract_strided_slice %108 {offsets = [0, 256], sizes = [8, 128], strides = [1, 1]} : vector<8x384xf32> to vector<8x128xf32>
    %126 = vector.extract_strided_slice %107 {offsets = [0, 256], sizes = [8, 128], strides = [1, 1]} : vector<8x384xf32> to vector<8x128xf32>
    %127 = vector.broadcast %9 : vector<1x128xf32> to vector<8x128xf32>
    %128 = arith.addf %126, %127 : vector<8x128xf32>
    %129 = arith.mulf %116, %128 : vector<8x128xf32>
    %130 = arith.addf %125, %129 : vector<8x128xf32>
    %131 = math.tanh %130 : vector<8x128xf32>
    %cst_42 = arith.constant 1.000000e+00 : f32
    %132 = vector.broadcast %cst_42 : f32 to vector<8x128xf32>
    %133 = arith.subf %132, %124 : vector<8x128xf32>
    %134 = arith.mulf %133, %131 : vector<8x128xf32>
    %135 = arith.mulf %124, %104 : vector<8x128xf32>
    %136 = arith.addf %134, %135 : vector<8x128xf32>
    %c24_43 = arith.constant 24 : index
    %c0_44 = arith.constant 0 : index
    %137 = vector.load %arg14[%c24_43, %c0_44] : memref<64x128xf32, #tpu.memory_space<vmem>>, vector<8x128xf32>
    tpu.vector_store %arg14[%c24_43, %c0_44], %136 {strides = array<i32>} : memref<64x128xf32, #tpu.memory_space<vmem>>, vector<8x128xf32>,
    %c32 = arith.constant 32 : index
    %c0_45 = arith.constant 0 : index
    %138 = vector.load %arg15[%c32, %c0_45] : memref<64x128xf32, #tpu.memory_space<vmem>>, vector<8x128xf32>
    tpu.vector_store %arg15[%c32, %c0_45], %136 {strides = array<i32>} : memref<64x128xf32, #tpu.memory_space<vmem>>, vector<8x128xf32>,
    %cst_46 = arith.constant dense<0.000000e+00> : vector<8x384xf32>
    %139 = tpu.matmul %136, %8, %cst_46 {dimension_numbers = #tpu.dot_dimension_numbers<[1], [0], [0], [1], [0, 0, 1, 1], [], []>} : vector<8x128xf32>, vector<128x384xf32>, vector<8x384xf32> -> vector<8x384xf32>
    %c32_47 = arith.constant 32 : index
    %c0_48 = arith.constant 0 : index
    %140 = vector.load %arg13[%c32_47, %c0_48] : memref<64x384xf32, #tpu.memory_space<vmem>>, vector<8x384xf32>
    %141 = vector.extract_strided_slice %140 {offsets = [0, 0], sizes = [8, 128], strides = [1, 1]} : vector<8x384xf32> to vector<8x128xf32>
    %142 = vector.extract_strided_slice %139 {offsets = [0, 0], sizes = [8, 128], strides = [1, 1]} : vector<8x384xf32> to vector<8x128xf32>
    %143 = arith.addf %141, %142 : vector<8x128xf32>
    %144 = arith.negf %143 : vector<8x128xf32>
    %145 = math.exp %144 : vector<8x128xf32>
    %cst_49 = arith.constant 1.000000e+00 : f32
    %146 = vector.broadcast %cst_49 : f32 to vector<8x128xf32>
    %147 = arith.addf %146, %145 : vector<8x128xf32>
    %148 = arith.divf %146, %147 : vector<8x128xf32>
    %149 = vector.extract_strided_slice %140 {offsets = [0, 128], sizes = [8, 128], strides = [1, 1]} : vector<8x384xf32> to vector<8x128xf32>
    %150 = vector.extract_strided_slice %139 {offsets = [0, 128], sizes = [8, 128], strides = [1, 1]} : vector<8x384xf32> to vector<8x128xf32>
    %151 = arith.addf %149, %150 : vector<8x128xf32>
    %152 = arith.negf %151 : vector<8x128xf32>
    %153 = math.exp %152 : vector<8x128xf32>
    %cst_50 = arith.constant 1.000000e+00 : f32
    %154 = vector.broadcast %cst_50 : f32 to vector<8x128xf32>
    %155 = arith.addf %154, %153 : vector<8x128xf32>
    %156 = arith.divf %154, %155 : vector<8x128xf32>
    %157 = vector.extract_strided_slice %140 {offsets = [0, 256], sizes = [8, 128], strides = [1, 1]} : vector<8x384xf32> to vector<8x128xf32>
    %158 = vector.extract_strided_slice %139 {offsets = [0, 256], sizes = [8, 128], strides = [1, 1]} : vector<8x384xf32> to vector<8x128xf32>
    %159 = vector.broadcast %9 : vector<1x128xf32> to vector<8x128xf32>
    %160 = arith.addf %158, %159 : vector<8x128xf32>
    %161 = arith.mulf %148, %160 : vector<8x128xf32>
    %162 = arith.addf %157, %161 : vector<8x128xf32>
    %163 = math.tanh %162 : vector<8x128xf32>
    %cst_51 = arith.constant 1.000000e+00 : f32
    %164 = vector.broadcast %cst_51 : f32 to vector<8x128xf32>
    %165 = arith.subf %164, %156 : vector<8x128xf32>
    %166 = arith.mulf %165, %163 : vector<8x128xf32>
    %167 = arith.mulf %156, %136 : vector<8x128xf32>
    %168 = arith.addf %166, %167 : vector<8x128xf32>
    %c32_52 = arith.constant 32 : index
    %c0_53 = arith.constant 0 : index
    %169 = vector.load %arg14[%c32_52, %c0_53] : memref<64x128xf32, #tpu.memory_space<vmem>>, vector<8x128xf32>
    tpu.vector_store %arg14[%c32_52, %c0_53], %168 {strides = array<i32>} : memref<64x128xf32, #tpu.memory_space<vmem>>, vector<8x128xf32>,
    %c24_54 = arith.constant 24 : index
    %c0_55 = arith.constant 0 : index
    %170 = vector.load %arg15[%c24_54, %c0_55] : memref<64x128xf32, #tpu.memory_space<vmem>>, vector<8x128xf32>
    tpu.vector_store %arg15[%c24_54, %c0_55], %168 {strides = array<i32>} : memref<64x128xf32, #tpu.memory_space<vmem>>, vector<8x128xf32>,
    %cst_56 = arith.constant dense<0.000000e+00> : vector<8x384xf32>
    %171 = tpu.matmul %168, %8, %cst_56 {dimension_numbers = #tpu.dot_dimension_numbers<[1], [0], [0], [1], [0, 0, 1, 1], [], []>} : vector<8x128xf32>, vector<128x384xf32>, vector<8x384xf32> -> vector<8x384xf32>
    %c40_57 = arith.constant 40 : index
    %c0_58 = arith.constant 0 : index
    %172 = vector.load %arg13[%c40_57, %c0_58] : memref<64x384xf32, #tpu.memory_space<vmem>>, vector<8x384xf32>
    %173 = vector.extract_strided_slice %172 {offsets = [0, 0], sizes = [8, 128], strides = [1, 1]} : vector<8x384xf32> to vector<8x128xf32>
    %174 = vector.extract_strided_slice %171 {offsets = [0, 0], sizes = [8, 128], strides = [1, 1]} : vector<8x384xf32> to vector<8x128xf32>
    %175 = arith.addf %173, %174 : vector<8x128xf32>
    %176 = arith.negf %175 : vector<8x128xf32>
    %177 = math.exp %176 : vector<8x128xf32>
    %cst_59 = arith.constant 1.000000e+00 : f32
    %178 = vector.broadcast %cst_59 : f32 to vector<8x128xf32>
    %179 = arith.addf %178, %177 : vector<8x128xf32>
    %180 = arith.divf %178, %179 : vector<8x128xf32>
    %181 = vector.extract_strided_slice %172 {offsets = [0, 128], sizes = [8, 128], strides = [1, 1]} : vector<8x384xf32> to vector<8x128xf32>
    %182 = vector.extract_strided_slice %171 {offsets = [0, 128], sizes = [8, 128], strides = [1, 1]} : vector<8x384xf32> to vector<8x128xf32>
    %183 = arith.addf %181, %182 : vector<8x128xf32>
    %184 = arith.negf %183 : vector<8x128xf32>
    %185 = math.exp %184 : vector<8x128xf32>
    %cst_60 = arith.constant 1.000000e+00 : f32
    %186 = vector.broadcast %cst_60 : f32 to vector<8x128xf32>
    %187 = arith.addf %186, %185 : vector<8x128xf32>
    %188 = arith.divf %186, %187 : vector<8x128xf32>
    %189 = vector.extract_strided_slice %172 {offsets = [0, 256], sizes = [8, 128], strides = [1, 1]} : vector<8x384xf32> to vector<8x128xf32>
    %190 = vector.extract_strided_slice %171 {offsets = [0, 256], sizes = [8, 128], strides = [1, 1]} : vector<8x384xf32> to vector<8x128xf32>
    %191 = vector.broadcast %9 : vector<1x128xf32> to vector<8x128xf32>
    %192 = arith.addf %190, %191 : vector<8x128xf32>
    %193 = arith.mulf %180, %192 : vector<8x128xf32>
    %194 = arith.addf %189, %193 : vector<8x128xf32>
    %195 = math.tanh %194 : vector<8x128xf32>
    %cst_61 = arith.constant 1.000000e+00 : f32
    %196 = vector.broadcast %cst_61 : f32 to vector<8x128xf32>
    %197 = arith.subf %196, %188 : vector<8x128xf32>
    %198 = arith.mulf %197, %195 : vector<8x128xf32>
    %199 = arith.mulf %188, %168 : vector<8x128xf32>
    %200 = arith.addf %198, %199 : vector<8x128xf32>
    %c40_62 = arith.constant 40 : index
    %c0_63 = arith.constant 0 : index
    %201 = vector.load %arg14[%c40_62, %c0_63] : memref<64x128xf32, #tpu.memory_space<vmem>>, vector<8x128xf32>
    tpu.vector_store %arg14[%c40_62, %c0_63], %200 {strides = array<i32>} : memref<64x128xf32, #tpu.memory_space<vmem>>, vector<8x128xf32>,
    %c16_64 = arith.constant 16 : index
    %c0_65 = arith.constant 0 : index
    %202 = vector.load %arg15[%c16_64, %c0_65] : memref<64x128xf32, #tpu.memory_space<vmem>>, vector<8x128xf32>
    tpu.vector_store %arg15[%c16_64, %c0_65], %200 {strides = array<i32>} : memref<64x128xf32, #tpu.memory_space<vmem>>, vector<8x128xf32>,
    %cst_66 = arith.constant dense<0.000000e+00> : vector<8x384xf32>
    %203 = tpu.matmul %200, %8, %cst_66 {dimension_numbers = #tpu.dot_dimension_numbers<[1], [0], [0], [1], [0, 0, 1, 1], [], []>} : vector<8x128xf32>, vector<128x384xf32>, vector<8x384xf32> -> vector<8x384xf32>
    %c48_67 = arith.constant 48 : index
    %c0_68 = arith.constant 0 : index
    %204 = vector.load %arg13[%c48_67, %c0_68] : memref<64x384xf32, #tpu.memory_space<vmem>>, vector<8x384xf32>
    %205 = vector.extract_strided_slice %204 {offsets = [0, 0], sizes = [8, 128], strides = [1, 1]} : vector<8x384xf32> to vector<8x128xf32>
    %206 = vector.extract_strided_slice %203 {offsets = [0, 0], sizes = [8, 128], strides = [1, 1]} : vector<8x384xf32> to vector<8x128xf32>
    %207 = arith.addf %205, %206 : vector<8x128xf32>
    %208 = arith.negf %207 : vector<8x128xf32>
    %209 = math.exp %208 : vector<8x128xf32>
    %cst_69 = arith.constant 1.000000e+00 : f32
    %210 = vector.broadcast %cst_69 : f32 to vector<8x128xf32>
    %211 = arith.addf %210, %209 : vector<8x128xf32>
    %212 = arith.divf %210, %211 : vector<8x128xf32>
    %213 = vector.extract_strided_slice %204 {offsets = [0, 128], sizes = [8, 128], strides = [1, 1]} : vector<8x384xf32> to vector<8x128xf32>
    %214 = vector.extract_strided_slice %203 {offsets = [0, 128], sizes = [8, 128], strides = [1, 1]} : vector<8x384xf32> to vector<8x128xf32>
    %215 = arith.addf %213, %214 : vector<8x128xf32>
    %216 = arith.negf %215 : vector<8x128xf32>
    %217 = math.exp %216 : vector<8x128xf32>
    %cst_70 = arith.constant 1.000000e+00 : f32
    %218 = vector.broadcast %cst_70 : f32 to vector<8x128xf32>
    %219 = arith.addf %218, %217 : vector<8x128xf32>
    %220 = arith.divf %218, %219 : vector<8x128xf32>
    %221 = vector.extract_strided_slice %204 {offsets = [0, 256], sizes = [8, 128], strides = [1, 1]} : vector<8x384xf32> to vector<8x128xf32>
    %222 = vector.extract_strided_slice %203 {offsets = [0, 256], sizes = [8, 128], strides = [1, 1]} : vector<8x384xf32> to vector<8x128xf32>
    %223 = vector.broadcast %9 : vector<1x128xf32> to vector<8x128xf32>
    %224 = arith.addf %222, %223 : vector<8x128xf32>
    %225 = arith.mulf %212, %224 : vector<8x128xf32>
    %226 = arith.addf %221, %225 : vector<8x128xf32>
    %227 = math.tanh %226 : vector<8x128xf32>
    %cst_71 = arith.constant 1.000000e+00 : f32
    %228 = vector.broadcast %cst_71 : f32 to vector<8x128xf32>
    %229 = arith.subf %228, %220 : vector<8x128xf32>
    %230 = arith.mulf %229, %227 : vector<8x128xf32>
    %231 = arith.mulf %220, %200 : vector<8x128xf32>
    %232 = arith.addf %230, %231 : vector<8x128xf32>
    %c48_72 = arith.constant 48 : index
    %c0_73 = arith.constant 0 : index
    %233 = vector.load %arg14[%c48_72, %c0_73] : memref<64x128xf32, #tpu.memory_space<vmem>>, vector<8x128xf32>
    tpu.vector_store %arg14[%c48_72, %c0_73], %232 {strides = array<i32>} : memref<64x128xf32, #tpu.memory_space<vmem>>, vector<8x128xf32>,
    %c8_74 = arith.constant 8 : index
    %c0_75 = arith.constant 0 : index
    %234 = vector.load %arg15[%c8_74, %c0_75] : memref<64x128xf32, #tpu.memory_space<vmem>>, vector<8x128xf32>
    tpu.vector_store %arg15[%c8_74, %c0_75], %232 {strides = array<i32>} : memref<64x128xf32, #tpu.memory_space<vmem>>, vector<8x128xf32>,
    %cst_76 = arith.constant dense<0.000000e+00> : vector<8x384xf32>
    %235 = tpu.matmul %232, %8, %cst_76 {dimension_numbers = #tpu.dot_dimension_numbers<[1], [0], [0], [1], [0, 0, 1, 1], [], []>} : vector<8x128xf32>, vector<128x384xf32>, vector<8x384xf32> -> vector<8x384xf32>
    %c56_77 = arith.constant 56 : index
    %c0_78 = arith.constant 0 : index
    %236 = vector.load %arg13[%c56_77, %c0_78] : memref<64x384xf32, #tpu.memory_space<vmem>>, vector<8x384xf32>
    %237 = vector.extract_strided_slice %236 {offsets = [0, 0], sizes = [8, 128], strides = [1, 1]} : vector<8x384xf32> to vector<8x128xf32>
    %238 = vector.extract_strided_slice %235 {offsets = [0, 0], sizes = [8, 128], strides = [1, 1]} : vector<8x384xf32> to vector<8x128xf32>
    %239 = arith.addf %237, %238 : vector<8x128xf32>
    %240 = arith.negf %239 : vector<8x128xf32>
    %241 = math.exp %240 : vector<8x128xf32>
    %cst_79 = arith.constant 1.000000e+00 : f32
    %242 = vector.broadcast %cst_79 : f32 to vector<8x128xf32>
    %243 = arith.addf %242, %241 : vector<8x128xf32>
    %244 = arith.divf %242, %243 : vector<8x128xf32>
    %245 = vector.extract_strided_slice %236 {offsets = [0, 128], sizes = [8, 128], strides = [1, 1]} : vector<8x384xf32> to vector<8x128xf32>
    %246 = vector.extract_strided_slice %235 {offsets = [0, 128], sizes = [8, 128], strides = [1, 1]} : vector<8x384xf32> to vector<8x128xf32>
    %247 = arith.addf %245, %246 : vector<8x128xf32>
    %248 = arith.negf %247 : vector<8x128xf32>
    %249 = math.exp %248 : vector<8x128xf32>
    %cst_80 = arith.constant 1.000000e+00 : f32
    %250 = vector.broadcast %cst_80 : f32 to vector<8x128xf32>
    %251 = arith.addf %250, %249 : vector<8x128xf32>
    %252 = arith.divf %250, %251 : vector<8x128xf32>
    %253 = vector.extract_strided_slice %236 {offsets = [0, 256], sizes = [8, 128], strides = [1, 1]} : vector<8x384xf32> to vector<8x128xf32>
    %254 = vector.extract_strided_slice %235 {offsets = [0, 256], sizes = [8, 128], strides = [1, 1]} : vector<8x384xf32> to vector<8x128xf32>
    %255 = vector.broadcast %9 : vector<1x128xf32> to vector<8x128xf32>
    %256 = arith.addf %254, %255 : vector<8x128xf32>
    %257 = arith.mulf %244, %256 : vector<8x128xf32>
    %258 = arith.addf %253, %257 : vector<8x128xf32>
    %259 = math.tanh %258 : vector<8x128xf32>
    %cst_81 = arith.constant 1.000000e+00 : f32
    %260 = vector.broadcast %cst_81 : f32 to vector<8x128xf32>
    %261 = arith.subf %260, %252 : vector<8x128xf32>
    %262 = arith.mulf %261, %259 : vector<8x128xf32>
    %263 = arith.mulf %252, %232 : vector<8x128xf32>
    %264 = arith.addf %262, %263 : vector<8x128xf32>
    %c56_82 = arith.constant 56 : index
    %c0_83 = arith.constant 0 : index
    %265 = vector.load %arg14[%c56_82, %c0_83] : memref<64x128xf32, #tpu.memory_space<vmem>>, vector<8x128xf32>
    tpu.vector_store %arg14[%c56_82, %c0_83], %264 {strides = array<i32>} : memref<64x128xf32, #tpu.memory_space<vmem>>, vector<8x128xf32>,
    %c0_84 = arith.constant 0 : index
    %c0_85 = arith.constant 0 : index
    %266 = vector.load %arg15[%c0_84, %c0_85] : memref<64x128xf32, #tpu.memory_space<vmem>>, vector<8x128xf32>
    tpu.vector_store %arg15[%c0_84, %c0_85], %264 {strides = array<i32>} : memref<64x128xf32, #tpu.memory_space<vmem>>, vector<8x128xf32>,
    %c0_86 = arith.constant 0 : index
    %c0_87 = arith.constant 0 : index
    %267 = vector.load %arg14[%c0_86, %c0_87] : memref<64x128xf32, #tpu.memory_space<vmem>>, vector<64x128xf32>
    %c0_88 = arith.constant 0 : index
    %c0_89 = arith.constant 0 : index
    %268 = vector.load %arg15[%c0_88, %c0_89] : memref<64x128xf32, #tpu.memory_space<vmem>>, vector<64x128xf32>
    %269 = tpu.concatenate %267, %268 in 1 : vector<64x128xf32>, vector<64x128xf32> -> vector<64x256xf32>
    %c0_90 = arith.constant 0 : index
    %c0_91 = arith.constant 0 : index
    %270 = vector.load %arg2[%c0_90, %c0_91] : memref<256x384xf32, #tpu.memory_space<vmem>>, vector<256x384xf32>
    %cst_92 = arith.constant dense<0.000000e+00> : vector<64x384xf32>
    %271 = tpu.matmul %269, %270, %cst_92 {dimension_numbers = #tpu.dot_dimension_numbers<[1], [0], [0], [1], [0, 0, 1, 1], [], []>} : vector<64x256xf32>, vector<256x384xf32>, vector<64x384xf32> -> vector<64x384xf32>
    %c1 = arith.constant 1 : index
    %c0_93 = arith.constant 0 : index
    %272 = vector.load %arg4[%c1, %c0_93] : memref<2x384xf32, #tpu.memory_space<vmem>>, vector<1x384xf32>
    %273 = vector.broadcast %272 : vector<1x384xf32> to vector<64x384xf32>
    %274 = arith.addf %271, %273 : vector<64x384xf32>
    %c0_94 = arith.constant 0 : index
    %c0_95 = arith.constant 0 : index
    %275 = vector.load %arg13[%c0_94, %c0_95] : memref<64x384xf32, #tpu.memory_space<vmem>>, vector<64x384xf32>
    tpu.vector_store %arg13[%c0_94, %c0_95], %274 {strides = array<i32>} : memref<64x384xf32, #tpu.memory_space<vmem>>, vector<64x384xf32>,
    %c1_96 = arith.constant 1 : index
    %c0_97 = arith.constant 0 : index
    %c0_98 = arith.constant 0 : index
    %276 = vector.load %arg3[%c1_96, %c0_97, %c0_98] : memref<2x128x384xf32, #tpu.memory_space<vmem>>, vector<1x128x384xf32>
    %277 = vector.shape_cast %276 : vector<1x128x384xf32> to vector<128x384xf32>
    %c1_99 = arith.constant 1 : index
    %c0_100 = arith.constant 0 : index
    %278 = vector.load %arg5[%c1_99, %c0_100] : memref<2x128xf32, #tpu.memory_space<vmem>>, vector<1x128xf32>
    %cst_101 = arith.constant 0.000000e+00 : f32
    %279 = vector.broadcast %cst_101 : f32 to vector<8x128xf32>
    %cst_102 = arith.constant dense<0.000000e+00> : vector<8x384xf32>
    %280 = tpu.matmul %279, %277, %cst_102 {dimension_numbers = #tpu.dot_dimension_numbers<[1], [0], [0], [1], [0, 0, 1, 1], [], []>} : vector<8x128xf32>, vector<128x384xf32>, vector<8x384xf32> -> vector<8x384xf32>
    %c0_103 = arith.constant 0 : index
    %c0_104 = arith.constant 0 : index
    %281 = vector.load %arg13[%c0_103, %c0_104] : memref<64x384xf32, #tpu.memory_space<vmem>>, vector<8x384xf32>
    %282 = vector.extract_strided_slice %281 {offsets = [0, 0], sizes = [8, 128], strides = [1, 1]} : vector<8x384xf32> to vector<8x128xf32>
    %283 = vector.extract_strided_slice %280 {offsets = [0, 0], sizes = [8, 128], strides = [1, 1]} : vector<8x384xf32> to vector<8x128xf32>
    %284 = arith.addf %282, %283 : vector<8x128xf32>
    %285 = arith.negf %284 : vector<8x128xf32>
    %286 = math.exp %285 : vector<8x128xf32>
    %cst_105 = arith.constant 1.000000e+00 : f32
    %287 = vector.broadcast %cst_105 : f32 to vector<8x128xf32>
    %288 = arith.addf %287, %286 : vector<8x128xf32>
    %289 = arith.divf %287, %288 : vector<8x128xf32>
    %290 = vector.extract_strided_slice %281 {offsets = [0, 128], sizes = [8, 128], strides = [1, 1]} : vector<8x384xf32> to vector<8x128xf32>
    %291 = vector.extract_strided_slice %280 {offsets = [0, 128], sizes = [8, 128], strides = [1, 1]} : vector<8x384xf32> to vector<8x128xf32>
    %292 = arith.addf %290, %291 : vector<8x128xf32>
    %293 = arith.negf %292 : vector<8x128xf32>
    %294 = math.exp %293 : vector<8x128xf32>
    %cst_106 = arith.constant 1.000000e+00 : f32
    %295 = vector.broadcast %cst_106 : f32 to vector<8x128xf32>
    %296 = arith.addf %295, %294 : vector<8x128xf32>
    %297 = arith.divf %295, %296 : vector<8x128xf32>
    %298 = vector.extract_strided_slice %281 {offsets = [0, 256], sizes = [8, 128], strides = [1, 1]} : vector<8x384xf32> to vector<8x128xf32>
    %299 = vector.extract_strided_slice %280 {offsets = [0, 256], sizes = [8, 128], strides = [1, 1]} : vector<8x384xf32> to vector<8x128xf32>
    %300 = vector.broadcast %278 : vector<1x128xf32> to vector<8x128xf32>
    %301 = arith.addf %299, %300 : vector<8x128xf32>
    %302 = arith.mulf %289, %301 : vector<8x128xf32>
    %303 = arith.addf %298, %302 : vector<8x128xf32>
    %304 = math.tanh %303 : vector<8x128xf32>
    %cst_107 = arith.constant 1.000000e+00 : f32
    %305 = vector.broadcast %cst_107 : f32 to vector<8x128xf32>
    %306 = arith.subf %305, %297 : vector<8x128xf32>
    %307 = arith.mulf %306, %304 : vector<8x128xf32>
    %308 = arith.mulf %297, %279 : vector<8x128xf32>
    %309 = arith.addf %307, %308 : vector<8x128xf32>
    %c0_108 = arith.constant 0 : index
    %c0_109 = arith.constant 0 : index
    %310 = vector.load %arg14[%c0_108, %c0_109] : memref<64x128xf32, #tpu.memory_space<vmem>>, vector<8x128xf32>
    tpu.vector_store %arg14[%c0_108, %c0_109], %309 {strides = array<i32>} : memref<64x128xf32, #tpu.memory_space<vmem>>, vector<8x128xf32>,
    %c56_110 = arith.constant 56 : index
    %c0_111 = arith.constant 0 : index
    %311 = vector.load %arg15[%c56_110, %c0_111] : memref<64x128xf32, #tpu.memory_space<vmem>>, vector<8x128xf32>
    tpu.vector_store %arg15[%c56_110, %c0_111], %309 {strides = array<i32>} : memref<64x128xf32, #tpu.memory_space<vmem>>, vector<8x128xf32>,
    %cst_112 = arith.constant dense<0.000000e+00> : vector<8x384xf32>
    %312 = tpu.matmul %309, %277, %cst_112 {dimension_numbers = #tpu.dot_dimension_numbers<[1], [0], [0], [1], [0, 0, 1, 1], [], []>} : vector<8x128xf32>, vector<128x384xf32>, vector<8x384xf32> -> vector<8x384xf32>
    %c8_113 = arith.constant 8 : index
    %c0_114 = arith.constant 0 : index
    %313 = vector.load %arg13[%c8_113, %c0_114] : memref<64x384xf32, #tpu.memory_space<vmem>>, vector<8x384xf32>
    %314 = vector.extract_strided_slice %313 {offsets = [0, 0], sizes = [8, 128], strides = [1, 1]} : vector<8x384xf32> to vector<8x128xf32>
    %315 = vector.extract_strided_slice %312 {offsets = [0, 0], sizes = [8, 128], strides = [1, 1]} : vector<8x384xf32> to vector<8x128xf32>
    %316 = arith.addf %314, %315 : vector<8x128xf32>
    %317 = arith.negf %316 : vector<8x128xf32>
    %318 = math.exp %317 : vector<8x128xf32>
    %cst_115 = arith.constant 1.000000e+00 : f32
    %319 = vector.broadcast %cst_115 : f32 to vector<8x128xf32>
    %320 = arith.addf %319, %318 : vector<8x128xf32>
    %321 = arith.divf %319, %320 : vector<8x128xf32>
    %322 = vector.extract_strided_slice %313 {offsets = [0, 128], sizes = [8, 128], strides = [1, 1]} : vector<8x384xf32> to vector<8x128xf32>
    %323 = vector.extract_strided_slice %312 {offsets = [0, 128], sizes = [8, 128], strides = [1, 1]} : vector<8x384xf32> to vector<8x128xf32>
    %324 = arith.addf %322, %323 : vector<8x128xf32>
    %325 = arith.negf %324 : vector<8x128xf32>
    %326 = math.exp %325 : vector<8x128xf32>
    %cst_116 = arith.constant 1.000000e+00 : f32
    %327 = vector.broadcast %cst_116 : f32 to vector<8x128xf32>
    %328 = arith.addf %327, %326 : vector<8x128xf32>
    %329 = arith.divf %327, %328 : vector<8x128xf32>
    %330 = vector.extract_strided_slice %313 {offsets = [0, 256], sizes = [8, 128], strides = [1, 1]} : vector<8x384xf32> to vector<8x128xf32>
    %331 = vector.extract_strided_slice %312 {offsets = [0, 256], sizes = [8, 128], strides = [1, 1]} : vector<8x384xf32> to vector<8x128xf32>
    %332 = vector.broadcast %278 : vector<1x128xf32> to vector<8x128xf32>
    %333 = arith.addf %331, %332 : vector<8x128xf32>
    %334 = arith.mulf %321, %333 : vector<8x128xf32>
    %335 = arith.addf %330, %334 : vector<8x128xf32>
    %336 = math.tanh %335 : vector<8x128xf32>
    %cst_117 = arith.constant 1.000000e+00 : f32
    %337 = vector.broadcast %cst_117 : f32 to vector<8x128xf32>
    %338 = arith.subf %337, %329 : vector<8x128xf32>
    %339 = arith.mulf %338, %336 : vector<8x128xf32>
    %340 = arith.mulf %329, %309 : vector<8x128xf32>
    %341 = arith.addf %339, %340 : vector<8x128xf32>
    %c8_118 = arith.constant 8 : index
    %c0_119 = arith.constant 0 : index
    %342 = vector.load %arg14[%c8_118, %c0_119] : memref<64x128xf32, #tpu.memory_space<vmem>>, vector<8x128xf32>
    tpu.vector_store %arg14[%c8_118, %c0_119], %341 {strides = array<i32>} : memref<64x128xf32, #tpu.memory_space<vmem>>, vector<8x128xf32>,
    %c48_120 = arith.constant 48 : index
    %c0_121 = arith.constant 0 : index
    %343 = vector.load %arg15[%c48_120, %c0_121] : memref<64x128xf32, #tpu.memory_space<vmem>>, vector<8x128xf32>
    tpu.vector_store %arg15[%c48_120, %c0_121], %341 {strides = array<i32>} : memref<64x128xf32, #tpu.memory_space<vmem>>, vector<8x128xf32>,
    %cst_122 = arith.constant dense<0.000000e+00> : vector<8x384xf32>
    %344 = tpu.matmul %341, %277, %cst_122 {dimension_numbers = #tpu.dot_dimension_numbers<[1], [0], [0], [1], [0, 0, 1, 1], [], []>} : vector<8x128xf32>, vector<128x384xf32>, vector<8x384xf32> -> vector<8x384xf32>
    %c16_123 = arith.constant 16 : index
    %c0_124 = arith.constant 0 : index
    %345 = vector.load %arg13[%c16_123, %c0_124] : memref<64x384xf32, #tpu.memory_space<vmem>>, vector<8x384xf32>
    %346 = vector.extract_strided_slice %345 {offsets = [0, 0], sizes = [8, 128], strides = [1, 1]} : vector<8x384xf32> to vector<8x128xf32>
    %347 = vector.extract_strided_slice %344 {offsets = [0, 0], sizes = [8, 128], strides = [1, 1]} : vector<8x384xf32> to vector<8x128xf32>
    %348 = arith.addf %346, %347 : vector<8x128xf32>
    %349 = arith.negf %348 : vector<8x128xf32>
    %350 = math.exp %349 : vector<8x128xf32>
    %cst_125 = arith.constant 1.000000e+00 : f32
    %351 = vector.broadcast %cst_125 : f32 to vector<8x128xf32>
    %352 = arith.addf %351, %350 : vector<8x128xf32>
    %353 = arith.divf %351, %352 : vector<8x128xf32>
    %354 = vector.extract_strided_slice %345 {offsets = [0, 128], sizes = [8, 128], strides = [1, 1]} : vector<8x384xf32> to vector<8x128xf32>
    %355 = vector.extract_strided_slice %344 {offsets = [0, 128], sizes = [8, 128], strides = [1, 1]} : vector<8x384xf32> to vector<8x128xf32>
    %356 = arith.addf %354, %355 : vector<8x128xf32>
    %357 = arith.negf %356 : vector<8x128xf32>
    %358 = math.exp %357 : vector<8x128xf32>
    %cst_126 = arith.constant 1.000000e+00 : f32
    %359 = vector.broadcast %cst_126 : f32 to vector<8x128xf32>
    %360 = arith.addf %359, %358 : vector<8x128xf32>
    %361 = arith.divf %359, %360 : vector<8x128xf32>
    %362 = vector.extract_strided_slice %345 {offsets = [0, 256], sizes = [8, 128], strides = [1, 1]} : vector<8x384xf32> to vector<8x128xf32>
    %363 = vector.extract_strided_slice %344 {offsets = [0, 256], sizes = [8, 128], strides = [1, 1]} : vector<8x384xf32> to vector<8x128xf32>
    %364 = vector.broadcast %278 : vector<1x128xf32> to vector<8x128xf32>
    %365 = arith.addf %363, %364 : vector<8x128xf32>
    %366 = arith.mulf %353, %365 : vector<8x128xf32>
    %367 = arith.addf %362, %366 : vector<8x128xf32>
    %368 = math.tanh %367 : vector<8x128xf32>
    %cst_127 = arith.constant 1.000000e+00 : f32
    %369 = vector.broadcast %cst_127 : f32 to vector<8x128xf32>
    %370 = arith.subf %369, %361 : vector<8x128xf32>
    %371 = arith.mulf %370, %368 : vector<8x128xf32>
    %372 = arith.mulf %361, %341 : vector<8x128xf32>
    %373 = arith.addf %371, %372 : vector<8x128xf32>
    %c16_128 = arith.constant 16 : index
    %c0_129 = arith.constant 0 : index
    %374 = vector.load %arg14[%c16_128, %c0_129] : memref<64x128xf32, #tpu.memory_space<vmem>>, vector<8x128xf32>
    tpu.vector_store %arg14[%c16_128, %c0_129], %373 {strides = array<i32>} : memref<64x128xf32, #tpu.memory_space<vmem>>, vector<8x128xf32>,
    %c40_130 = arith.constant 40 : index
    %c0_131 = arith.constant 0 : index
    %375 = vector.load %arg15[%c40_130, %c0_131] : memref<64x128xf32, #tpu.memory_space<vmem>>, vector<8x128xf32>
    tpu.vector_store %arg15[%c40_130, %c0_131], %373 {strides = array<i32>} : memref<64x128xf32, #tpu.memory_space<vmem>>, vector<8x128xf32>,
    %cst_132 = arith.constant dense<0.000000e+00> : vector<8x384xf32>
    %376 = tpu.matmul %373, %277, %cst_132 {dimension_numbers = #tpu.dot_dimension_numbers<[1], [0], [0], [1], [0, 0, 1, 1], [], []>} : vector<8x128xf32>, vector<128x384xf32>, vector<8x384xf32> -> vector<8x384xf32>
    %c24_133 = arith.constant 24 : index
    %c0_134 = arith.constant 0 : index
    %377 = vector.load %arg13[%c24_133, %c0_134] : memref<64x384xf32, #tpu.memory_space<vmem>>, vector<8x384xf32>
    %378 = vector.extract_strided_slice %377 {offsets = [0, 0], sizes = [8, 128], strides = [1, 1]} : vector<8x384xf32> to vector<8x128xf32>
    %379 = vector.extract_strided_slice %376 {offsets = [0, 0], sizes = [8, 128], strides = [1, 1]} : vector<8x384xf32> to vector<8x128xf32>
    %380 = arith.addf %378, %379 : vector<8x128xf32>
    %381 = arith.negf %380 : vector<8x128xf32>
    %382 = math.exp %381 : vector<8x128xf32>
    %cst_135 = arith.constant 1.000000e+00 : f32
    %383 = vector.broadcast %cst_135 : f32 to vector<8x128xf32>
    %384 = arith.addf %383, %382 : vector<8x128xf32>
    %385 = arith.divf %383, %384 : vector<8x128xf32>
    %386 = vector.extract_strided_slice %377 {offsets = [0, 128], sizes = [8, 128], strides = [1, 1]} : vector<8x384xf32> to vector<8x128xf32>
    %387 = vector.extract_strided_slice %376 {offsets = [0, 128], sizes = [8, 128], strides = [1, 1]} : vector<8x384xf32> to vector<8x128xf32>
    %388 = arith.addf %386, %387 : vector<8x128xf32>
    %389 = arith.negf %388 : vector<8x128xf32>
    %390 = math.exp %389 : vector<8x128xf32>
    %cst_136 = arith.constant 1.000000e+00 : f32
    %391 = vector.broadcast %cst_136 : f32 to vector<8x128xf32>
    %392 = arith.addf %391, %390 : vector<8x128xf32>
    %393 = arith.divf %391, %392 : vector<8x128xf32>
    %394 = vector.extract_strided_slice %377 {offsets = [0, 256], sizes = [8, 128], strides = [1, 1]} : vector<8x384xf32> to vector<8x128xf32>
    %395 = vector.extract_strided_slice %376 {offsets = [0, 256], sizes = [8, 128], strides = [1, 1]} : vector<8x384xf32> to vector<8x128xf32>
    %396 = vector.broadcast %278 : vector<1x128xf32> to vector<8x128xf32>
    %397 = arith.addf %395, %396 : vector<8x128xf32>
    %398 = arith.mulf %385, %397 : vector<8x128xf32>
    %399 = arith.addf %394, %398 : vector<8x128xf32>
    %400 = math.tanh %399 : vector<8x128xf32>
    %cst_137 = arith.constant 1.000000e+00 : f32
    %401 = vector.broadcast %cst_137 : f32 to vector<8x128xf32>
    %402 = arith.subf %401, %393 : vector<8x128xf32>
    %403 = arith.mulf %402, %400 : vector<8x128xf32>
    %404 = arith.mulf %393, %373 : vector<8x128xf32>
    %405 = arith.addf %403, %404 : vector<8x128xf32>
    %c24_138 = arith.constant 24 : index
    %c0_139 = arith.constant 0 : index
    %406 = vector.load %arg14[%c24_138, %c0_139] : memref<64x128xf32, #tpu.memory_space<vmem>>, vector<8x128xf32>
    tpu.vector_store %arg14[%c24_138, %c0_139], %405 {strides = array<i32>} : memref<64x128xf32, #tpu.memory_space<vmem>>, vector<8x128xf32>,
    %c32_140 = arith.constant 32 : index
    %c0_141 = arith.constant 0 : index
    %407 = vector.load %arg15[%c32_140, %c0_141] : memref<64x128xf32, #tpu.memory_space<vmem>>, vector<8x128xf32>
    tpu.vector_store %arg15[%c32_140, %c0_141], %405 {strides = array<i32>} : memref<64x128xf32, #tpu.memory_space<vmem>>, vector<8x128xf32>,
    %cst_142 = arith.constant dense<0.000000e+00> : vector<8x384xf32>
    %408 = tpu.matmul %405, %277, %cst_142 {dimension_numbers = #tpu.dot_dimension_numbers<[1], [0], [0], [1], [0, 0, 1, 1], [], []>} : vector<8x128xf32>, vector<128x384xf32>, vector<8x384xf32> -> vector<8x384xf32>
    %c32_143 = arith.constant 32 : index
    %c0_144 = arith.constant 0 : index
    %409 = vector.load %arg13[%c32_143, %c0_144] : memref<64x384xf32, #tpu.memory_space<vmem>>, vector<8x384xf32>
    %410 = vector.extract_strided_slice %409 {offsets = [0, 0], sizes = [8, 128], strides = [1, 1]} : vector<8x384xf32> to vector<8x128xf32>
    %411 = vector.extract_strided_slice %408 {offsets = [0, 0], sizes = [8, 128], strides = [1, 1]} : vector<8x384xf32> to vector<8x128xf32>
    %412 = arith.addf %410, %411 : vector<8x128xf32>
    %413 = arith.negf %412 : vector<8x128xf32>
    %414 = math.exp %413 : vector<8x128xf32>
    %cst_145 = arith.constant 1.000000e+00 : f32
    %415 = vector.broadcast %cst_145 : f32 to vector<8x128xf32>
    %416 = arith.addf %415, %414 : vector<8x128xf32>
    %417 = arith.divf %415, %416 : vector<8x128xf32>
    %418 = vector.extract_strided_slice %409 {offsets = [0, 128], sizes = [8, 128], strides = [1, 1]} : vector<8x384xf32> to vector<8x128xf32>
    %419 = vector.extract_strided_slice %408 {offsets = [0, 128], sizes = [8, 128], strides = [1, 1]} : vector<8x384xf32> to vector<8x128xf32>
    %420 = arith.addf %418, %419 : vector<8x128xf32>
    %421 = arith.negf %420 : vector<8x128xf32>
    %422 = math.exp %421 : vector<8x128xf32>
    %cst_146 = arith.constant 1.000000e+00 : f32
    %423 = vector.broadcast %cst_146 : f32 to vector<8x128xf32>
    %424 = arith.addf %423, %422 : vector<8x128xf32>
    %425 = arith.divf %423, %424 : vector<8x128xf32>
    %426 = vector.extract_strided_slice %409 {offsets = [0, 256], sizes = [8, 128], strides = [1, 1]} : vector<8x384xf32> to vector<8x128xf32>
    %427 = vector.extract_strided_slice %408 {offsets = [0, 256], sizes = [8, 128], strides = [1, 1]} : vector<8x384xf32> to vector<8x128xf32>
    %428 = vector.broadcast %278 : vector<1x128xf32> to vector<8x128xf32>
    %429 = arith.addf %427, %428 : vector<8x128xf32>
    %430 = arith.mulf %417, %429 : vector<8x128xf32>
    %431 = arith.addf %426, %430 : vector<8x128xf32>
    %432 = math.tanh %431 : vector<8x128xf32>
    %cst_147 = arith.constant 1.000000e+00 : f32
    %433 = vector.broadcast %cst_147 : f32 to vector<8x128xf32>
    %434 = arith.subf %433, %425 : vector<8x128xf32>
    %435 = arith.mulf %434, %432 : vector<8x128xf32>
    %436 = arith.mulf %425, %405 : vector<8x128xf32>
    %437 = arith.addf %435, %436 : vector<8x128xf32>
    %c32_148 = arith.constant 32 : index
    %c0_149 = arith.constant 0 : index
    %438 = vector.load %arg14[%c32_148, %c0_149] : memref<64x128xf32, #tpu.memory_space<vmem>>, vector<8x128xf32>
    tpu.vector_store %arg14[%c32_148, %c0_149], %437 {strides = array<i32>} : memref<64x128xf32, #tpu.memory_space<vmem>>, vector<8x128xf32>,
    %c24_150 = arith.constant 24 : index
    %c0_151 = arith.constant 0 : index
    %439 = vector.load %arg15[%c24_150, %c0_151] : memref<64x128xf32, #tpu.memory_space<vmem>>, vector<8x128xf32>
    tpu.vector_store %arg15[%c24_150, %c0_151], %437 {strides = array<i32>} : memref<64x128xf32, #tpu.memory_space<vmem>>, vector<8x128xf32>,
    %cst_152 = arith.constant dense<0.000000e+00> : vector<8x384xf32>
    %440 = tpu.matmul %437, %277, %cst_152 {dimension_numbers = #tpu.dot_dimension_numbers<[1], [0], [0], [1], [0, 0, 1, 1], [], []>} : vector<8x128xf32>, vector<128x384xf32>, vector<8x384xf32> -> vector<8x384xf32>
    %c40_153 = arith.constant 40 : index
    %c0_154 = arith.constant 0 : index
    %441 = vector.load %arg13[%c40_153, %c0_154] : memref<64x384xf32, #tpu.memory_space<vmem>>, vector<8x384xf32>
    %442 = vector.extract_strided_slice %441 {offsets = [0, 0], sizes = [8, 128], strides = [1, 1]} : vector<8x384xf32> to vector<8x128xf32>
    %443 = vector.extract_strided_slice %440 {offsets = [0, 0], sizes = [8, 128], strides = [1, 1]} : vector<8x384xf32> to vector<8x128xf32>
    %444 = arith.addf %442, %443 : vector<8x128xf32>
    %445 = arith.negf %444 : vector<8x128xf32>
    %446 = math.exp %445 : vector<8x128xf32>
    %cst_155 = arith.constant 1.000000e+00 : f32
    %447 = vector.broadcast %cst_155 : f32 to vector<8x128xf32>
    %448 = arith.addf %447, %446 : vector<8x128xf32>
    %449 = arith.divf %447, %448 : vector<8x128xf32>
    %450 = vector.extract_strided_slice %441 {offsets = [0, 128], sizes = [8, 128], strides = [1, 1]} : vector<8x384xf32> to vector<8x128xf32>
    %451 = vector.extract_strided_slice %440 {offsets = [0, 128], sizes = [8, 128], strides = [1, 1]} : vector<8x384xf32> to vector<8x128xf32>
    %452 = arith.addf %450, %451 : vector<8x128xf32>
    %453 = arith.negf %452 : vector<8x128xf32>
    %454 = math.exp %453 : vector<8x128xf32>
    %cst_156 = arith.constant 1.000000e+00 : f32
    %455 = vector.broadcast %cst_156 : f32 to vector<8x128xf32>
    %456 = arith.addf %455, %454 : vector<8x128xf32>
    %457 = arith.divf %455, %456 : vector<8x128xf32>
    %458 = vector.extract_strided_slice %441 {offsets = [0, 256], sizes = [8, 128], strides = [1, 1]} : vector<8x384xf32> to vector<8x128xf32>
    %459 = vector.extract_strided_slice %440 {offsets = [0, 256], sizes = [8, 128], strides = [1, 1]} : vector<8x384xf32> to vector<8x128xf32>
    %460 = vector.broadcast %278 : vector<1x128xf32> to vector<8x128xf32>
    %461 = arith.addf %459, %460 : vector<8x128xf32>
    %462 = arith.mulf %449, %461 : vector<8x128xf32>
    %463 = arith.addf %458, %462 : vector<8x128xf32>
    %464 = math.tanh %463 : vector<8x128xf32>
    %cst_157 = arith.constant 1.000000e+00 : f32
    %465 = vector.broadcast %cst_157 : f32 to vector<8x128xf32>
    %466 = arith.subf %465, %457 : vector<8x128xf32>
    %467 = arith.mulf %466, %464 : vector<8x128xf32>
    %468 = arith.mulf %457, %437 : vector<8x128xf32>
    %469 = arith.addf %467, %468 : vector<8x128xf32>
    %c40_158 = arith.constant 40 : index
    %c0_159 = arith.constant 0 : index
    %470 = vector.load %arg14[%c40_158, %c0_159] : memref<64x128xf32, #tpu.memory_space<vmem>>, vector<8x128xf32>
    tpu.vector_store %arg14[%c40_158, %c0_159], %469 {strides = array<i32>} : memref<64x128xf32, #tpu.memory_space<vmem>>, vector<8x128xf32>,
    %c16_160 = arith.constant 16 : index
    %c0_161 = arith.constant 0 : index
    %471 = vector.load %arg15[%c16_160, %c0_161] : memref<64x128xf32, #tpu.memory_space<vmem>>, vector<8x128xf32>
    tpu.vector_store %arg15[%c16_160, %c0_161], %469 {strides = array<i32>} : memref<64x128xf32, #tpu.memory_space<vmem>>, vector<8x128xf32>,
    %cst_162 = arith.constant dense<0.000000e+00> : vector<8x384xf32>
    %472 = tpu.matmul %469, %277, %cst_162 {dimension_numbers = #tpu.dot_dimension_numbers<[1], [0], [0], [1], [0, 0, 1, 1], [], []>} : vector<8x128xf32>, vector<128x384xf32>, vector<8x384xf32> -> vector<8x384xf32>
    %c48_163 = arith.constant 48 : index
    %c0_164 = arith.constant 0 : index
    %473 = vector.load %arg13[%c48_163, %c0_164] : memref<64x384xf32, #tpu.memory_space<vmem>>, vector<8x384xf32>
    %474 = vector.extract_strided_slice %473 {offsets = [0, 0], sizes = [8, 128], strides = [1, 1]} : vector<8x384xf32> to vector<8x128xf32>
    %475 = vector.extract_strided_slice %472 {offsets = [0, 0], sizes = [8, 128], strides = [1, 1]} : vector<8x384xf32> to vector<8x128xf32>
    %476 = arith.addf %474, %475 : vector<8x128xf32>
    %477 = arith.negf %476 : vector<8x128xf32>
    %478 = math.exp %477 : vector<8x128xf32>
    %cst_165 = arith.constant 1.000000e+00 : f32
    %479 = vector.broadcast %cst_165 : f32 to vector<8x128xf32>
    %480 = arith.addf %479, %478 : vector<8x128xf32>
    %481 = arith.divf %479, %480 : vector<8x128xf32>
    %482 = vector.extract_strided_slice %473 {offsets = [0, 128], sizes = [8, 128], strides = [1, 1]} : vector<8x384xf32> to vector<8x128xf32>
    %483 = vector.extract_strided_slice %472 {offsets = [0, 128], sizes = [8, 128], strides = [1, 1]} : vector<8x384xf32> to vector<8x128xf32>
    %484 = arith.addf %482, %483 : vector<8x128xf32>
    %485 = arith.negf %484 : vector<8x128xf32>
    %486 = math.exp %485 : vector<8x128xf32>
    %cst_166 = arith.constant 1.000000e+00 : f32
    %487 = vector.broadcast %cst_166 : f32 to vector<8x128xf32>
    %488 = arith.addf %487, %486 : vector<8x128xf32>
    %489 = arith.divf %487, %488 : vector<8x128xf32>
    %490 = vector.extract_strided_slice %473 {offsets = [0, 256], sizes = [8, 128], strides = [1, 1]} : vector<8x384xf32> to vector<8x128xf32>
    %491 = vector.extract_strided_slice %472 {offsets = [0, 256], sizes = [8, 128], strides = [1, 1]} : vector<8x384xf32> to vector<8x128xf32>
    %492 = vector.broadcast %278 : vector<1x128xf32> to vector<8x128xf32>
    %493 = arith.addf %491, %492 : vector<8x128xf32>
    %494 = arith.mulf %481, %493 : vector<8x128xf32>
    %495 = arith.addf %490, %494 : vector<8x128xf32>
    %496 = math.tanh %495 : vector<8x128xf32>
    %cst_167 = arith.constant 1.000000e+00 : f32
    %497 = vector.broadcast %cst_167 : f32 to vector<8x128xf32>
    %498 = arith.subf %497, %489 : vector<8x128xf32>
    %499 = arith.mulf %498, %496 : vector<8x128xf32>
    %500 = arith.mulf %489, %469 : vector<8x128xf32>
    %501 = arith.addf %499, %500 : vector<8x128xf32>
    %c48_168 = arith.constant 48 : index
    %c0_169 = arith.constant 0 : index
    %502 = vector.load %arg14[%c48_168, %c0_169] : memref<64x128xf32, #tpu.memory_space<vmem>>, vector<8x128xf32>
    tpu.vector_store %arg14[%c48_168, %c0_169], %501 {strides = array<i32>} : memref<64x128xf32, #tpu.memory_space<vmem>>, vector<8x128xf32>,
    %c8_170 = arith.constant 8 : index
    %c0_171 = arith.constant 0 : index
    %503 = vector.load %arg15[%c8_170, %c0_171] : memref<64x128xf32, #tpu.memory_space<vmem>>, vector<8x128xf32>
    tpu.vector_store %arg15[%c8_170, %c0_171], %501 {strides = array<i32>} : memref<64x128xf32, #tpu.memory_space<vmem>>, vector<8x128xf32>,
    %cst_172 = arith.constant dense<0.000000e+00> : vector<8x384xf32>
    %504 = tpu.matmul %501, %277, %cst_172 {dimension_numbers = #tpu.dot_dimension_numbers<[1], [0], [0], [1], [0, 0, 1, 1], [], []>} : vector<8x128xf32>, vector<128x384xf32>, vector<8x384xf32> -> vector<8x384xf32>
    %c56_173 = arith.constant 56 : index
    %c0_174 = arith.constant 0 : index
    %505 = vector.load %arg13[%c56_173, %c0_174] : memref<64x384xf32, #tpu.memory_space<vmem>>, vector<8x384xf32>
    %506 = vector.extract_strided_slice %505 {offsets = [0, 0], sizes = [8, 128], strides = [1, 1]} : vector<8x384xf32> to vector<8x128xf32>
    %507 = vector.extract_strided_slice %504 {offsets = [0, 0], sizes = [8, 128], strides = [1, 1]} : vector<8x384xf32> to vector<8x128xf32>
    %508 = arith.addf %506, %507 : vector<8x128xf32>
    %509 = arith.negf %508 : vector<8x128xf32>
    %510 = math.exp %509 : vector<8x128xf32>
    %cst_175 = arith.constant 1.000000e+00 : f32
    %511 = vector.broadcast %cst_175 : f32 to vector<8x128xf32>
    %512 = arith.addf %511, %510 : vector<8x128xf32>
    %513 = arith.divf %511, %512 : vector<8x128xf32>
    %514 = vector.extract_strided_slice %505 {offsets = [0, 128], sizes = [8, 128], strides = [1, 1]} : vector<8x384xf32> to vector<8x128xf32>
    %515 = vector.extract_strided_slice %504 {offsets = [0, 128], sizes = [8, 128], strides = [1, 1]} : vector<8x384xf32> to vector<8x128xf32>
    %516 = arith.addf %514, %515 : vector<8x128xf32>
    %517 = arith.negf %516 : vector<8x128xf32>
    %518 = math.exp %517 : vector<8x128xf32>
    %cst_176 = arith.constant 1.000000e+00 : f32
    %519 = vector.broadcast %cst_176 : f32 to vector<8x128xf32>
    %520 = arith.addf %519, %518 : vector<8x128xf32>
    %521 = arith.divf %519, %520 : vector<8x128xf32>
    %522 = vector.extract_strided_slice %505 {offsets = [0, 256], sizes = [8, 128], strides = [1, 1]} : vector<8x384xf32> to vector<8x128xf32>
    %523 = vector.extract_strided_slice %504 {offsets = [0, 256], sizes = [8, 128], strides = [1, 1]} : vector<8x384xf32> to vector<8x128xf32>
    %524 = vector.broadcast %278 : vector<1x128xf32> to vector<8x128xf32>
    %525 = arith.addf %523, %524 : vector<8x128xf32>
    %526 = arith.mulf %513, %525 : vector<8x128xf32>
    %527 = arith.addf %522, %526 : vector<8x128xf32>
    %528 = math.tanh %527 : vector<8x128xf32>
    %cst_177 = arith.constant 1.000000e+00 : f32
    %529 = vector.broadcast %cst_177 : f32 to vector<8x128xf32>
    %530 = arith.subf %529, %521 : vector<8x128xf32>
    %531 = arith.mulf %530, %528 : vector<8x128xf32>
    %532 = arith.mulf %521, %501 : vector<8x128xf32>
    %533 = arith.addf %531, %532 : vector<8x128xf32>
    %c56_178 = arith.constant 56 : index
    %c0_179 = arith.constant 0 : index
    %534 = vector.load %arg14[%c56_178, %c0_179] : memref<64x128xf32, #tpu.memory_space<vmem>>, vector<8x128xf32>
    tpu.vector_store %arg14[%c56_178, %c0_179], %533 {strides = array<i32>} : memref<64x128xf32, #tpu.memory_space<vmem>>, vector<8x128xf32>,
    %c0_180 = arith.constant 0 : index
    %c0_181 = arith.constant 0 : index
    %535 = vector.load %arg15[%c0_180, %c0_181] : memref<64x128xf32, #tpu.memory_space<vmem>>, vector<8x128xf32>
    tpu.vector_store %arg15[%c0_180, %c0_181], %533 {strides = array<i32>} : memref<64x128xf32, #tpu.memory_space<vmem>>, vector<8x128xf32>,
    %c0_182 = arith.constant 0 : index
    %c0_183 = arith.constant 0 : index
    %536 = vector.load %arg14[%c0_182, %c0_183] : memref<64x128xf32, #tpu.memory_space<vmem>>, vector<64x128xf32>
    %c0_184 = arith.constant 0 : index
    %c0_185 = arith.constant 0 : index
    %537 = vector.load %arg15[%c0_184, %c0_185] : memref<64x128xf32, #tpu.memory_space<vmem>>, vector<64x128xf32>
    %538 = tpu.concatenate %536, %537 in 1 : vector<64x128xf32>, vector<64x128xf32> -> vector<64x256xf32>
    %c0_186 = arith.constant 0 : index
    %c0_187 = arith.constant 0 : index
    %539 = vector.load %arg6[%c0_186, %c0_187] : memref<256x128xf32, #tpu.memory_space<vmem>>, vector<256x128xf32>
    %cst_188 = arith.constant dense<0.000000e+00> : vector<64x128xf32>
    %540 = tpu.matmul %538, %539, %cst_188 {dimension_numbers = #tpu.dot_dimension_numbers<[1], [0], [0], [1], [0, 0, 1, 1], [], []>} : vector<64x256xf32>, vector<256x128xf32>, vector<64x128xf32> -> vector<64x128xf32>
    %c0_189 = arith.constant 0 : index
    %c0_190 = arith.constant 0 : index
    %541 = vector.load %arg7[%c0_189, %c0_190] : memref<1x128xf32, #tpu.memory_space<vmem>>, vector<1x128xf32>
    %542 = vector.broadcast %541 : vector<1x128xf32> to vector<64x128xf32>
    %543 = arith.addf %540, %542 : vector<64x128xf32>
    %544 = math.tanh %543 : vector<64x128xf32>
    %c0_191 = arith.constant 0 : index
    %c0_192 = arith.constant 0 : index
    %545 = vector.load %arg8[%c0_191, %c0_192] : memref<128x1xf32, #tpu.memory_space<vmem>>, vector<128x1xf32>
    %cst_193 = arith.constant dense<0.000000e+00> : vector<64x1xf32>
    %546 = tpu.matmul %544, %545, %cst_193 {dimension_numbers = #tpu.dot_dimension_numbers<[1], [0], [0], [1], [0, 0, 1, 1], [], []>} : vector<64x128xf32>, vector<128x1xf32>, vector<64x1xf32> -> vector<64x1xf32>
    %547 = vector.extract_strided_slice %546 {offsets = [0, 0], sizes = [8, 1], strides = [1, 1]} : vector<64x1xf32> to vector<8x1xf32>
    %548 = vector.extract_strided_slice %546 {offsets = [8, 0], sizes = [8, 1], strides = [1, 1]} : vector<64x1xf32> to vector<8x1xf32>
    %549 = vector.extract_strided_slice %546 {offsets = [16, 0], sizes = [8, 1], strides = [1, 1]} : vector<64x1xf32> to vector<8x1xf32>
    %550 = vector.extract_strided_slice %546 {offsets = [24, 0], sizes = [8, 1], strides = [1, 1]} : vector<64x1xf32> to vector<8x1xf32>
    %551 = vector.extract_strided_slice %546 {offsets = [32, 0], sizes = [8, 1], strides = [1, 1]} : vector<64x1xf32> to vector<8x1xf32>
    %552 = vector.extract_strided_slice %546 {offsets = [40, 0], sizes = [8, 1], strides = [1, 1]} : vector<64x1xf32> to vector<8x1xf32>
    %553 = vector.extract_strided_slice %546 {offsets = [48, 0], sizes = [8, 1], strides = [1, 1]} : vector<64x1xf32> to vector<8x1xf32>
    %554 = vector.extract_strided_slice %546 {offsets = [56, 0], sizes = [8, 1], strides = [1, 1]} : vector<64x1xf32> to vector<8x1xf32>
    %555 = arith.maximumf %547, %548 : vector<8x1xf32>
    %556 = arith.maximumf %549, %550 : vector<8x1xf32>
    %557 = arith.maximumf %551, %552 : vector<8x1xf32>
    %558 = arith.maximumf %553, %554 : vector<8x1xf32>
    %559 = arith.maximumf %555, %556 : vector<8x1xf32>
    %560 = arith.maximumf %557, %558 : vector<8x1xf32>
    %561 = arith.maximumf %559, %560 : vector<8x1xf32>
    %562 = arith.subf %547, %561 : vector<8x1xf32>
    %563 = math.exp %562 : vector<8x1xf32>
    %564 = arith.subf %548, %561 : vector<8x1xf32>
    %565 = math.exp %564 : vector<8x1xf32>
    %566 = arith.subf %549, %561 : vector<8x1xf32>
    %567 = math.exp %566 : vector<8x1xf32>
    %568 = arith.subf %550, %561 : vector<8x1xf32>
    %569 = math.exp %568 : vector<8x1xf32>
    %570 = arith.subf %551, %561 : vector<8x1xf32>
    %571 = math.exp %570 : vector<8x1xf32>
    %572 = arith.subf %552, %561 : vector<8x1xf32>
    %573 = math.exp %572 : vector<8x1xf32>
    %574 = arith.subf %553, %561 : vector<8x1xf32>
    %575 = math.exp %574 : vector<8x1xf32>
    %576 = arith.subf %554, %561 : vector<8x1xf32>
    %577 = math.exp %576 : vector<8x1xf32>
    %578 = arith.addf %563, %565 : vector<8x1xf32>
    %579 = arith.addf %567, %569 : vector<8x1xf32>
    %580 = arith.addf %571, %573 : vector<8x1xf32>
    %581 = arith.addf %575, %577 : vector<8x1xf32>
    %582 = arith.addf %578, %579 : vector<8x1xf32>
    %583 = arith.addf %580, %581 : vector<8x1xf32>
    %584 = arith.addf %582, %583 : vector<8x1xf32>
    %cst_194 = arith.constant 1.000000e+00 : f32
    %585 = vector.broadcast %cst_194 : f32 to vector<8x1xf32>
    %586 = arith.divf %585, %584 : vector<8x1xf32>
    %587 = arith.mulf %563, %586 : vector<8x1xf32>
    %588 = arith.mulf %565, %586 : vector<8x1xf32>
    %589 = arith.mulf %567, %586 : vector<8x1xf32>
    %590 = arith.mulf %569, %586 : vector<8x1xf32>
    %591 = arith.mulf %571, %586 : vector<8x1xf32>
    %592 = arith.mulf %573, %586 : vector<8x1xf32>
    %593 = arith.mulf %575, %586 : vector<8x1xf32>
    %594 = arith.mulf %577, %586 : vector<8x1xf32>
    %c0_195 = arith.constant 0 : index
    %c0_196 = arith.constant 0 : index
    %595 = vector.load %arg14[%c0_195, %c0_196] : memref<64x128xf32, #tpu.memory_space<vmem>>, vector<8x128xf32>
    %596 = vector.broadcast %587 : vector<8x1xf32> to vector<8x128xf32>
    %597 = arith.mulf %596, %595 : vector<8x128xf32>
    %c8_197 = arith.constant 8 : index
    %c0_198 = arith.constant 0 : index
    %598 = vector.load %arg14[%c8_197, %c0_198] : memref<64x128xf32, #tpu.memory_space<vmem>>, vector<8x128xf32>
    %599 = vector.broadcast %588 : vector<8x1xf32> to vector<8x128xf32>
    %600 = arith.mulf %599, %598 : vector<8x128xf32>
    %c16_199 = arith.constant 16 : index
    %c0_200 = arith.constant 0 : index
    %601 = vector.load %arg14[%c16_199, %c0_200] : memref<64x128xf32, #tpu.memory_space<vmem>>, vector<8x128xf32>
    %602 = vector.broadcast %589 : vector<8x1xf32> to vector<8x128xf32>
    %603 = arith.mulf %602, %601 : vector<8x128xf32>
    %c24_201 = arith.constant 24 : index
    %c0_202 = arith.constant 0 : index
    %604 = vector.load %arg14[%c24_201, %c0_202] : memref<64x128xf32, #tpu.memory_space<vmem>>, vector<8x128xf32>
    %605 = vector.broadcast %590 : vector<8x1xf32> to vector<8x128xf32>
    %606 = arith.mulf %605, %604 : vector<8x128xf32>
    %c32_203 = arith.constant 32 : index
    %c0_204 = arith.constant 0 : index
    %607 = vector.load %arg14[%c32_203, %c0_204] : memref<64x128xf32, #tpu.memory_space<vmem>>, vector<8x128xf32>
    %608 = vector.broadcast %591 : vector<8x1xf32> to vector<8x128xf32>
    %609 = arith.mulf %608, %607 : vector<8x128xf32>
    %c40_205 = arith.constant 40 : index
    %c0_206 = arith.constant 0 : index
    %610 = vector.load %arg14[%c40_205, %c0_206] : memref<64x128xf32, #tpu.memory_space<vmem>>, vector<8x128xf32>
    %611 = vector.broadcast %592 : vector<8x1xf32> to vector<8x128xf32>
    %612 = arith.mulf %611, %610 : vector<8x128xf32>
    %c48_207 = arith.constant 48 : index
    %c0_208 = arith.constant 0 : index
    %613 = vector.load %arg14[%c48_207, %c0_208] : memref<64x128xf32, #tpu.memory_space<vmem>>, vector<8x128xf32>
    %614 = vector.broadcast %593 : vector<8x1xf32> to vector<8x128xf32>
    %615 = arith.mulf %614, %613 : vector<8x128xf32>
    %c56_209 = arith.constant 56 : index
    %c0_210 = arith.constant 0 : index
    %616 = vector.load %arg14[%c56_209, %c0_210] : memref<64x128xf32, #tpu.memory_space<vmem>>, vector<8x128xf32>
    %617 = vector.broadcast %594 : vector<8x1xf32> to vector<8x128xf32>
    %618 = arith.mulf %617, %616 : vector<8x128xf32>
    %619 = arith.addf %597, %600 : vector<8x128xf32>
    %620 = arith.addf %603, %606 : vector<8x128xf32>
    %621 = arith.addf %609, %612 : vector<8x128xf32>
    %622 = arith.addf %615, %618 : vector<8x128xf32>
    %623 = arith.addf %619, %620 : vector<8x128xf32>
    %624 = arith.addf %621, %622 : vector<8x128xf32>
    %625 = arith.addf %623, %624 : vector<8x128xf32>
    %c0_211 = arith.constant 0 : index
    %c0_212 = arith.constant 0 : index
    %626 = vector.load %arg15[%c0_211, %c0_212] : memref<64x128xf32, #tpu.memory_space<vmem>>, vector<8x128xf32>
    %627 = vector.broadcast %587 : vector<8x1xf32> to vector<8x128xf32>
    %628 = arith.mulf %627, %626 : vector<8x128xf32>
    %c8_213 = arith.constant 8 : index
    %c0_214 = arith.constant 0 : index
    %629 = vector.load %arg15[%c8_213, %c0_214] : memref<64x128xf32, #tpu.memory_space<vmem>>, vector<8x128xf32>
    %630 = vector.broadcast %588 : vector<8x1xf32> to vector<8x128xf32>
    %631 = arith.mulf %630, %629 : vector<8x128xf32>
    %c16_215 = arith.constant 16 : index
    %c0_216 = arith.constant 0 : index
    %632 = vector.load %arg15[%c16_215, %c0_216] : memref<64x128xf32, #tpu.memory_space<vmem>>, vector<8x128xf32>
    %633 = vector.broadcast %589 : vector<8x1xf32> to vector<8x128xf32>
    %634 = arith.mulf %633, %632 : vector<8x128xf32>
    %c24_217 = arith.constant 24 : index
    %c0_218 = arith.constant 0 : index
    %635 = vector.load %arg15[%c24_217, %c0_218] : memref<64x128xf32, #tpu.memory_space<vmem>>, vector<8x128xf32>
    %636 = vector.broadcast %590 : vector<8x1xf32> to vector<8x128xf32>
    %637 = arith.mulf %636, %635 : vector<8x128xf32>
    %c32_219 = arith.constant 32 : index
    %c0_220 = arith.constant 0 : index
    %638 = vector.load %arg15[%c32_219, %c0_220] : memref<64x128xf32, #tpu.memory_space<vmem>>, vector<8x128xf32>
    %639 = vector.broadcast %591 : vector<8x1xf32> to vector<8x128xf32>
    %640 = arith.mulf %639, %638 : vector<8x128xf32>
    %c40_221 = arith.constant 40 : index
    %c0_222 = arith.constant 0 : index
    %641 = vector.load %arg15[%c40_221, %c0_222] : memref<64x128xf32, #tpu.memory_space<vmem>>, vector<8x128xf32>
    %642 = vector.broadcast %592 : vector<8x1xf32> to vector<8x128xf32>
    %643 = arith.mulf %642, %641 : vector<8x128xf32>
    %c48_223 = arith.constant 48 : index
    %c0_224 = arith.constant 0 : index
    %644 = vector.load %arg15[%c48_223, %c0_224] : memref<64x128xf32, #tpu.memory_space<vmem>>, vector<8x128xf32>
    %645 = vector.broadcast %593 : vector<8x1xf32> to vector<8x128xf32>
    %646 = arith.mulf %645, %644 : vector<8x128xf32>
    %c56_225 = arith.constant 56 : index
    %c0_226 = arith.constant 0 : index
    %647 = vector.load %arg15[%c56_225, %c0_226] : memref<64x128xf32, #tpu.memory_space<vmem>>, vector<8x128xf32>
    %648 = vector.broadcast %594 : vector<8x1xf32> to vector<8x128xf32>
    %649 = arith.mulf %648, %647 : vector<8x128xf32>
    %650 = arith.addf %628, %631 : vector<8x128xf32>
    %651 = arith.addf %634, %637 : vector<8x128xf32>
    %652 = arith.addf %640, %643 : vector<8x128xf32>
    %653 = arith.addf %646, %649 : vector<8x128xf32>
    %654 = arith.addf %650, %651 : vector<8x128xf32>
    %655 = arith.addf %652, %653 : vector<8x128xf32>
    %656 = arith.addf %654, %655 : vector<8x128xf32>
    %657 = tpu.iota {dimensions = array<i32: 1>} : vector<8x128xi32>
    %c64_i32 = arith.constant 64 : i32
    %658 = vector.broadcast %c64_i32 : i32 to vector<8x128xi32>
    %659 = arith.cmpi slt, %657, %658 : vector<8x128xi32>
    %660 = arith.select %659, %625, %656 : vector<8x128xi1>, vector<8x128xf32>
    %cst_227 = arith.constant dense<0.000000e+00> : vector<8xf32>
    %661 = vector.multi_reduction <add>, %660, %cst_227 [1] : vector<8x128xf32> to vector<8xf32>
    %662 = vector.shape_cast %661 : vector<8xf32> to vector<8x1xf32>
    %cst_228 = arith.constant 1.562500e-02 : f32
    %663 = vector.broadcast %cst_228 : f32 to vector<8x1xf32>
    %664 = arith.mulf %662, %663 : vector<8x1xf32>
    %665 = arith.mulf %660, %660 : vector<8x128xf32>
    %cst_229 = arith.constant dense<0.000000e+00> : vector<8xf32>
    %666 = vector.multi_reduction <add>, %665, %cst_229 [1] : vector<8x128xf32> to vector<8xf32>
    %667 = vector.shape_cast %666 : vector<8xf32> to vector<8x1xf32>
    %cst_230 = arith.constant 1.562500e-02 : f32
    %668 = vector.broadcast %cst_230 : f32 to vector<8x1xf32>
    %669 = arith.mulf %667, %668 : vector<8x1xf32>
    %670 = arith.mulf %664, %664 : vector<8x1xf32>
    %671 = arith.subf %669, %670 : vector<8x1xf32>
    %672 = vector.broadcast %664 : vector<8x1xf32> to vector<8x128xf32>
    %673 = arith.subf %660, %672 : vector<8x128xf32>
    %cst_231 = arith.constant 9.99999974E-6 : f32
    %674 = vector.broadcast %cst_231 : f32 to vector<8x1xf32>
    %675 = arith.addf %671, %674 : vector<8x1xf32>
    %676 = math.rsqrt %675 : vector<8x1xf32>
    %677 = vector.broadcast %676 : vector<8x1xf32> to vector<8x128xf32>
    %678 = arith.mulf %673, %677 : vector<8x128xf32>
    %c0_232 = arith.constant 0 : index
    %c0_233 = arith.constant 0 : index
    %679 = vector.load %arg9[%c0_232, %c0_233] : memref<2x128xf32, #tpu.memory_space<vmem>>, vector<2x128xf32>
    %680 = vector.extract_strided_slice %679 {offsets = [0, 0], sizes = [1, 128], strides = [1, 1]} : vector<2x128xf32> to vector<1x128xf32>
    %681 = vector.broadcast %680 : vector<1x128xf32> to vector<8x128xf32>
    %682 = arith.mulf %678, %681 : vector<8x128xf32>
    %683 = vector.extract_strided_slice %679 {offsets = [1, 0], sizes = [1, 128], strides = [1, 1]} : vector<2x128xf32> to vector<1x128xf32>
    %684 = vector.broadcast %683 : vector<1x128xf32> to vector<8x128xf32>
    %685 = arith.addf %682, %684 : vector<8x128xf32>
    %c0_234 = arith.constant 0 : index
    %c0_235 = arith.constant 0 : index
    %686 = vector.load %arg10[%c0_234, %c0_235] : memref<128x2xf32, #tpu.memory_space<vmem>>, vector<128x2xf32>
    %cst_236 = arith.constant dense<0.000000e+00> : vector<8x2xf32>
    %687 = tpu.matmul %685, %686, %cst_236 {dimension_numbers = #tpu.dot_dimension_numbers<[1], [0], [0], [1], [0, 0, 1, 1], [], []>} : vector<8x128xf32>, vector<128x2xf32>, vector<8x2xf32> -> vector<8x2xf32>
    %c0_237 = arith.constant 0 : index
    %c0_238 = arith.constant 0 : index
    %688 = vector.load %arg11[%c0_237, %c0_238] : memref<1x2xf32, #tpu.memory_space<vmem>>, vector<1x2xf32>
    %689 = vector.broadcast %688 : vector<1x2xf32> to vector<8x2xf32>
    %690 = arith.addf %687, %689 : vector<8x2xf32>
    %c0_239 = arith.constant 0 : index
    %c0_240 = arith.constant 0 : index
    %691 = vector.load %arg12[%c0_239, %c0_240] : memref<8x2xf32, #tpu.memory_space<vmem>>, vector<8x2xf32>
    tpu.vector_store %arg12[%c0_239, %c0_240], %690 {strides = array<i32>} : memref<8x2xf32, #tpu.memory_space<vmem>>, vector<8x2xf32>,
    return
  }
}

</mosaic_0001>

<bundles_post_ra>
// kernel: gru_model_forward.1
= control target key start
LH: loop header
LB: loop body
LE: loop exit
PB: predicated region body
PF: predicated region fallthrough
CT: control target
= control target key end

     0   :  { %17 = vsyncpa [#allocation6], 0  ;;  %s3388_s24 = smov [#allocation5]   ;;  %s3389_s26 = smov 384   ;;  %s5705_s0 = inlined_call_operand.vmem [shape: f32[64,64], index: 0, kind: input, shape index: {}]   ;;  %s5706_s1 = inlined_call_operand.vmem [shape: f32[64,384], index: 1, kind: input, shape index: {}]   ;;  %s5707_s2 = inlined_call_operand.vmem [shape: f32[256,384], index: 2, kind: input, shape index: {}]   ;;  %s5708_s3 = inlined_call_operand.hbm [shape: f32[2,128,384], index: 3, kind: input, shape index: {}]   ;;  %s5709_s4 = inlined_call_operand.vmem [shape: f32[2,384], index: 4, kind: input, shape index: {}]   ;;  %s5710_s5 = inlined_call_operand.vmem [shape: f32[2,128], index: 5, kind: input, shape index: {}]   ;;  %s5711_s6 = inlined_call_operand.vmem [shape: f32[256,128], index: 6, kind: input, shape index: {}]   ;;  %s5712_s7 = inlined_call_operand.vmem [shape: f32[1,128], index: 7, kind: input, shape index: {}]   ;;  %s5713_s8 = inlined_call_operand.vmem [shape: f32[128,1], index: 8, kind: input, shape index: {}]   ;;  %s5714_s9 = inlined_call_operand.vmem [shape: f32[2,128], index: 9, kind: input, shape index: {}]   ;;  %s5715_s10 = inlined_call_operand.vmem [shape: f32[128,2], index: 10, kind: input, shape index: {}]   ;;  %s5716_s11 = inlined_call_operand.vmem [shape: f32[1,2], index: 11, kind: input, shape index: {}]   ;;  %s5717_s12 = inlined_call_operand.vmem [shape: f32[8,2], index: 12, kind: output, shape index: {}]  }
   0x1   :  { %s28_s23 = sshll.u32 %s5708_s3, 4  ;;  %s30_s25 = sshll.u32 %s3388_s24, 4  ;;  %s29_s23 = int_to_ptr.hbm [resolvable:$true] %s28_s23  ;;  %s31_s25 = int_to_ptr.vmem [resolvable:$true] %s30_s25 }
   0x2   :  { %s3390_s27 = smov 24  }
   0x3   :  { %36 = dma.hbm_to_vmem [thread:$0]  %s29_s23, 12288, %s31_s25, [#allocation6], %s3389_s26, %s3389_s26, %s3390_s27  }
   0x4   :  { %3386 = dma.done.wait [#allocation6], 12288  }
   0x5   :  { %3387 = vsyncadd [#allocation6], 4294955008  ;;  %v3461_v0 = vld [vmem:[#allocation5 + $0x168] sm:$0xff]  ;;  %v3463_v1 = vld [vmem:[#allocation5 + $0x150] sm:$0xff]  ;;  %vm97_vm0 = vcmask 523264   ;;  %v5718_v51 = vmov 0.0  }
   0x6   :  { %318 = vmatpush.msra.mxu3 %v3461_v0  ;;  %v3466_v2 = vld [vmem:[#allocation5 + $0x138] sm:$0xff]  ;;  %v86_v3 = vld [vmem:[%s5706_s1 + $0xa8] sm:$0xff]  ;;  %v3472_v4 = vld [vmem:[#allocation5 + $0x120] sm:$0xff] }
   0x7   :  { %3048 = vmatpush.msra.mxu1 %v86_v3  ;;  %v83_v5 = vld [vmem:[%s5706_s1 + $0x90] sm:$0xff]  ;;  %130 = vmatpush.msra.mxu0 %v86_v3  ;;  %v80_v6 = vld [vmem:[%s5706_s1 + $0x78] sm:$0xff]  ;;  %v3481_v7 = vld [vmem:[#allocation5 + $0x108] sm:$0xff] }
   0x8   :  { %319 = vmatpush.msra.mxu3 %v3463_v1  ;;  %v77_v8 = vld [vmem:[%s5706_s1 + $0x60] sm:$0xff]  ;;  %v3487_v9 = vld [vmem:[#allocation5 + $0xf0] sm:$0xff]  ;;  %v74_v10 = vld [vmem:[%s5706_s1 + $0x48] sm:$0xff] }
   0x9   :  { %3049 = vmatpush.msra.mxu1 %v83_v5  ;;  %131 = vmatpush.msra.mxu0 %v83_v5  ;;  %v3493_v11 = vld [vmem:[#allocation5 + $0xd8] sm:$0xff]  ;;  %v71_v12 = vld [vmem:[%s5706_s1 + $0x30] sm:$0xff]  ;;  %v3499_v13 = vld [vmem:[#allocation5 + $0xc0] sm:$0xff] }
   0xa   :  { %320 = vmatpush.msra.mxu3 %v3466_v2  ;;  %v68_v14 = vld [vmem:[%s5706_s1 + $0x18] sm:$0xff]  ;;  %v3505_v15 = vld [vmem:[#allocation5 + $0xa8] sm:$0xff]  ;;  %v65_v16 = vld [vmem:[%s5706_s1] sm:$0xff] }
   0xb   :  { %3050 = vmatpush.msra.mxu1 %v80_v6  ;;  %132 = vmatpush.msra.mxu0 %v80_v6  ;;  %v3511_v17 = vld [vmem:[#allocation5 + $0x90] sm:$0xff]  ;;  %v3516_v18 = vld [vmem:[%s5705_s0 + $0x20] sm:$0xff]  ;;  %v3527_v21 = vld [vmem:[#allocation5 + $0x78] sm:$0xff] }
   0xc   :  { %321 = vmatpush.msra.mxu3 %v3472_v4  ;;  %v87_v19 = vld [vmem:[%s5706_s1 + $0xb0] sm:$0xff]  ;;  %v3525_v20 = vld [vmem:[%s5705_s0] sm:$0xff]  ;;  %v3529_v22 = vld [vmem:[#allocation5 + $0x178] sm:$0xff] }
   0xd   :  { %3051 = vmatpush.msra.mxu1 %v77_v8  ;;  %133 = vmatpush.msra.mxu0 %v77_v8  ;;  %v84_v23 = vld [vmem:[%s5706_s1 + $0x98] sm:$0xff]  ;;  %v3537_v24 = vld [vmem:[#allocation5 + $0x60] sm:$0xff]  ;;  %v3551_v28 = vld [vmem:[#allocation5 + $0x48] sm:$0xff] }
   0xe   :  { %322 = vmatpush.msra.mxu3 %v3481_v7  ;;  %v3541_v25 = vld [vmem:[#allocation5 + $0x160] sm:$0xff]  ;;  %v88_v26 = vld [vmem:[%s5706_s1 + $0xb8] sm:$0xff]  ;;  %v3553_v29 = vld [vmem:[#allocation5 + $0x148] sm:$0xff] }
   0xf   :  { %3052 = vmatpush.msra.mxu1 %v74_v10  ;;  %134 = vmatpush.msra.mxu0 %v74_v10  ;;  %v81_v27 = vld [vmem:[%s5706_s1 + $0x80] sm:$0xff]  ;;  %v78_v31 = vld [vmem:[%s5706_s1 + $0x68] sm:$0xff]  ;;  %v3563_v32 = vld [vmem:[#allocation5 + $0x30] sm:$0xff] }
  0x10   :  { %323 = vmatpush.msra.mxu3 %v3487_v9  ;;  %212 = vmatpush.msra.mxu2 %v88_v26  ;;  %v85_v30 = vld [vmem:[%s5706_s1 + $0xa0] sm:$0xff]  ;;  %v3568_v33 = vld [vmem:[%s5705_s0 + $0x28] sm:$0xff]  ;;  %v3575_v35 = vld [vmem:[#allocation5 + $0x130] sm:$0xff] }
  0x11   :  { %3053 = vmatpush.msra.mxu1 %v71_v12  ;;  %135 = vmatpush.msra.mxu0 %v71_v12  ;;  %v82_v34 = vld [vmem:[%s5706_s1 + $0x88] sm:$0xff]  ;;  %v75_v36 = vld [vmem:[%s5706_s1 + $0x50] sm:$0xff]  ;;  %v3580_v37 = vld [vmem:[#allocation5 + $0x18] sm:$0xff] }
  0x12   :  { %324 = vmatpush.msra.mxu3 %v3493_v11  ;;  %213 = vmatpush.msra.mxu2 %v85_v30  ;;  %5759 = vst [vmem:[#allocation8_spill] sm:$0xff] %v3580_v37  ;;  %v3585_v38 = vld [vmem:[%s5705_s0 + $0x8] sm:$0xff]  ;;  %v3590_v39 = vld [vmem:[#allocation5 + $0x118] sm:$0xff]  ;;  %v3595_v41 = vld [vmem:[#allocation5] sm:$0xff] }
  0x13   :  { %3054 = vmatpush.msra.mxu1 %v68_v14  ;;  %136 = vmatpush.msra.mxu0 %v68_v14  ;;  %v72_v40 = vld [vmem:[%s5706_s1 + $0x38] sm:$0xff]  ;;  %5760 = vst [vmem:[#allocation9_spill] sm:$0xff] %v3595_v41  ;;  %v79_v42 = vld [vmem:[%s5706_s1 + $0x70] sm:$0xff]  ;;  %v3606_v44 = vld [vmem:[#allocation5 + $0x100] sm:$0xff] }
  0x14   :  { %325 = vmatpush.msra.mxu3 %v3499_v13  ;;  %214 = vmatpush.msra.mxu2 %v82_v34  ;;  %v3602_v43 = vld [vmem:[#allocation5 + $0x170] sm:$0xff]  ;;  %v69_v45 = vld [vmem:[%s5706_s1 + $0x20] sm:$0xff]  ;;  %v3613_v46 = vld [vmem:[#allocation5 + $0x158] sm:$0xff] }
  0x15   :  { %3055 = vmatpush.msra.mxu1 %v65_v16  ;;  %137 = vmatpush.msra.mxu0 %v65_v16  ;;  %v3615_v47 = vld [vmem:[#allocation5 + $0xe8] sm:$0xff]  ;;  %v3621_v48 = vld [vmem:[%s5705_s0 + $0x30] sm:$0xff]  ;;  %v76_v49 = vld [vmem:[%s5706_s1 + $0x58] sm:$0xff] }
  0x16   :  { %326 = vmatpush.msra.mxu3 %v3505_v15  ;;  %2995 = vmatmul.msk.f32.vlgmr.msra.gmra.mxu1 %vm97_vm0, %v3516_v18  ;;  %v3627_v50 = vld [vmem:[#allocation5 + $0x140] sm:$0xff]  ;;  %v3630_v52 = vld [vmem:[#allocation5 + $0xd0] sm:$0xff]  ;;  %v66_v54 = vld [vmem:[%s5706_s1 + $0x8] sm:$0xff] }
  0x17   :  { %171 = vmatpush.msrb.mxu1 %v87_v19  ;;  %2991 = vmatmul.msk.f32.vlgmr.msra.gmra.mxu0 %vm97_vm0, %v3525_v20  ;;  %v3637_v53 = vld [vmem:[%s5705_s0 + $0x10] sm:$0xff]  ;;  %v3642_v55 = vld [vmem:[#allocation5 + $0x128] sm:$0xff]  ;;  %v3646_v56 = vld [vmem:[#allocation5 + $0xb8] sm:$0xff] }
  0x18   :  { %327 = vmatpush.msra.mxu3 %v3511_v17  ;;  %358 = vmatpush.msrb.mxu0 %v3529_v22  ;;  %v73_v57 = vld [vmem:[%s5706_s1 + $0x40] sm:$0xff]  ;;  %v3653_v58 = vld [vmem:[#allocation5 + $0x110] sm:$0xff]  ;;  %v70_v60 = vld [vmem:[%s5706_s1 + $0x28] sm:$0xff] }
  0x19   :  { %172 = vmatpush.msrb.mxu1 %v84_v23  ;;  %215 = vmatpush.msra.mxu2 %v79_v42  ;;  %v3657_v59 = vld [vmem:[#allocation5 + $0xa0] sm:$0xff]  ;;  %v3664_v61 = vld [vmem:[#allocation5 + $0xf8] sm:$0xff]  ;;  %v3666_v62 = vld [vmem:[#allocation5 + $0x88] sm:$0xff] }
  0x1a   :  { %328 = vmatpush.msra.mxu3 %v3527_v21  ;;  %359 = vmatpush.msrb.mxu0 %v3541_v25  ;;  %v3673_v63 = vld [vmem:[%s5705_s0 + $0x38] sm:$0xff]  ;;  %v67_v3 = vld [vmem:[%s5706_s1 + $0x10] sm:$0xff]  ;;  %v3679_v5 = vld [vmem:[#allocation5 + $0xe0] sm:$0xff] }
  0x1b   :  { %173 = vmatpush.msrb.mxu1 %v81_v27  ;;  %216 = vmatpush.msra.mxu2 %v76_v49  ;;  %v3681_v6 = vld [vmem:[#allocation5 + $0x70] sm:$0xff]  ;;  %v3689_v8 = vld [vmem:[%s5705_s0 + $0x18] sm:$0xff]  ;;  %v3691_v10 = vld [vmem:[#allocation5 + $0xc8] sm:$0xff] }
  0x1c   :  { %329 = vmatpush.msra.mxu3 %v3537_v24  ;;  %360 = vmatpush.msrb.mxu0 %v3553_v29  ;;  %v3695_v12 = vld [vmem:[#allocation5 + $0x58] sm:$0xff]  ;;  %v3699_v14 = vld [vmem:[#allocation5 + $0xb0] sm:$0xff]  ;;  %v3703_v16 = vld [vmem:[#allocation5 + $0x40] sm:$0xff] }
  0x1d   :  { %174 = vmatpush.msrb.mxu1 %v78_v31  ;;  %217 = vmatpush.msra.mxu2 %v73_v57  ;;  %v3709_v19 = vld [vmem:[#allocation5 + $0x98] sm:$0xff]  ;;  %v3711_v23 = vld [vmem:[#allocation5 + $0x28] sm:$0xff]  ;;  %v3717_v26 = vld [vmem:[#allocation5 + $0x80] sm:$0xff] }
  0x1e   :  { %330 = vmatpush.msra.mxu3 %v3551_v28  ;;  %2996 = vmatmul.msk.f32.gmra.mxu1 %vm97_vm0, %v3568_v33  ;;  %5761 = vst [vmem:[#allocation10_spill] sm:$0xff] %v3711_v23  ;;  %v3719_v27 = vld [vmem:[#allocation5 + $0x10] sm:$0xff]  ;;  %v3725_v30 = vld [vmem:[#allocation5 + $0x68] sm:$0xff]  ;;  %v3739_v34 = vld [vmem:[#allocation5 + $0x38] sm:$0xff] }
  0x1f   :  { %361 = vmatpush.msrb.mxu0 %v3575_v35  ;;  %175 = vmatpush.msrb.mxu1 %v75_v36  ;;  %5762 = vst [vmem:[#allocation11_spill] sm:$0xff] %v3719_v27  ;;  %v3732_v31 = vld [vmem:[#allocation5 + $0x50] sm:$0xff]  ;;  %v3751_v36 = vld [vmem:[#allocation5 + $0x8] sm:$0xff] }
  0x20   :  { %331 = vmatpush.msra.mxu3 %v3563_v32  ;;  %2992 = vmatmul.msk.f32.gmra.mxu0 %vm97_vm0, %v3585_v38  ;;  %5763 = vst [vmem:[#allocation12_spill] sm:$0xff] %v3739_v34 }
  0x21   :  { %362 = vmatpush.msrb.mxu0 %v3590_v39  ;;  %176 = vmatpush.msrb.mxu1 %v72_v40  ;;  %5765 = vst [vmem:[#allocation14_spill] sm:$0xff] %v3751_v36 }
  0x22   :  { %332 = vmatpush.msra.mxu3 %v3580_v37  ;;  %218 = vmatpush.msra.mxu2 %v70_v60 }
  0x23   :  { %363 = vmatpush.msrb.mxu0 %v3606_v44  ;;  %177 = vmatpush.msrb.mxu1 %v69_v45 }
  0x24   :  { %333 = vmatpush.msra.mxu3 %v3595_v41  ;;  %219 = vmatpush.msra.mxu2 %v67_v3 }
  0x25   :  { %334 = vmatmul.f32.vlgmr.msra.gmra.mxu3 %v5718_v51  ;;  %364 = vmatpush.msrb.mxu0 %v3615_v47 }
  0x26   :  { %338 = vmatpush.msrb.mxu3 %v3602_v43  ;;  %2997 = vmatmul.msk.f32.gmra.mxu1 %vm97_vm0, %v3621_v48 }
  0x27   :  { %365 = vmatpush.msrb.mxu0 %v3630_v52  ;;  %178 = vmatpush.msrb.mxu1 %v66_v54 }
  0x28   :  { %339 = vmatpush.msrb.mxu3 %v3613_v46  ;;  %2993 = vmatmul.msk.f32.gmra.mxu0 %vm97_vm0, %v3637_v53 }
  0x29   :  { %366 = vmatpush.msrb.mxu0 %v3646_v56  ;;  %432 = vmatpush.msra.mxu1 %v3461_v0 }
  0x2a   :  { %340 = vmatpush.msrb.mxu3 %v3627_v50  ;;  %3007 = vmatmul.msk.f32.vlgmr.msra.gmra.mxu2 %vm97_vm0, %v3525_v20 }
  0x2b   :  { %367 = vmatpush.msrb.mxu0 %v3657_v59  ;;  %433 = vmatpush.msra.mxu1 %v3463_v1 }
  0x2c   :  { %341 = vmatpush.msrb.mxu3 %v3642_v55  ;;  %452 = vmatpush.msrb.mxu2 %v3602_v43 }
  0x2d   :  { %368 = vmatpush.msrb.mxu0 %v3666_v62  ;;  %434 = vmatpush.msra.mxu1 %v3466_v2 }
  0x2e   :  { %342 = vmatpush.msrb.mxu3 %v3653_v58  ;;  %2998 = vmatmul.msk.f32.gmra.mxu1 %vm97_vm0, %v3673_v63 }
  0x2f   :  { %369 = vmatpush.msrb.mxu0 %v3681_v6  ;;  %453 = vmatpush.msrb.mxu2 %v3613_v46 }
  0x30   :  { %343 = vmatpush.msrb.mxu3 %v3664_v61  ;;  %2994 = vmatmul.msk.f32.gmra.mxu0 %vm97_vm0, %v3689_v8 }
  0x31   :  { %370 = vmatpush.msrb.mxu0 %v3695_v12  ;;  %435 = vmatpush.msra.mxu1 %v3472_v4 }
  0x32   :  { %344 = vmatpush.msrb.mxu3 %v3679_v5  ;;  %454 = vmatpush.msrb.mxu2 %v3627_v50 }
  0x33   :  { %371 = vmatpush.msrb.mxu0 %v3703_v16  ;;  %3008 = vmatmul.msk.f32.gmra.mxu2 %vm97_vm0, %v3585_v38 }
  0x34   :  { %345 = vmatpush.msrb.mxu3 %v3691_v10  ;;  %455 = vmatpush.msrb.mxu2 %v3642_v55 }
  0x35   :  { %372 = vmatpush.msrb.mxu0 %v3711_v23  ;;  %436 = vmatpush.msra.mxu1 %v3481_v7 }
  0x36   :  { %346 = vmatpush.msrb.mxu3 %v3699_v14  ;;  %2999 = vmatmul.msk.f32.vlgmr.msrb.gmra.mxu1 %vm97_vm0, %v3525_v20  ;;  %v3745_v20 = vld [vmem:[#allocation5 + $0x20] sm:$0xff] }
  0x37   :  { %373 = vmatpush.msrb.mxu0 %v3719_v27  ;;  %456 = vmatpush.msrb.mxu2 %v3653_v58  ;;  %5764 = vst [vmem:[#allocation13_spill] sm:$0xff] %v3745_v20 }
  0x38   :  { %347 = vmatpush.msrb.mxu3 %v3709_v19  ;;  %374 = vmatmul.f32.vlgmr.msrb.gmra.mxu0 %v5718_v51 }
  0x39   :  { %545 = vmatpush.msra.mxu0 %v3461_v0  ;;  %437 = vmatpush.msra.mxu1 %v3487_v9 }
  0x3a   :  { %348 = vmatpush.msrb.mxu3 %v3717_v26  ;;  %457 = vmatpush.msrb.mxu2 %v3664_v61 }
  0x3b   :  { %546 = vmatpush.msra.mxu0 %v3463_v1  ;;  %438 = vmatpush.msra.mxu1 %v3493_v11 }
  0x3c   :  { %349 = vmatpush.msrb.mxu3 %v3725_v30  ;;  %3009 = vmatmul.msk.f32.gmra.mxu2 %vm97_vm0, %v3637_v53 }
  0x3d   :  { %547 = vmatpush.msra.mxu0 %v3466_v2  ;;  %458 = vmatpush.msrb.mxu2 %v3679_v5 }
  0x3e   :  { %350 = vmatpush.msrb.mxu3 %v3732_v31  ;;  %3000 = vmatmul.msk.f32.gmra.mxu1 %vm97_vm0, %v3585_v38 }
  0x3f   :  { %548 = vmatpush.msra.mxu0 %v3472_v4  ;;  %439 = vmatpush.msra.mxu1 %v3499_v13 }
  0x40   :  { %351 = vmatpush.msrb.mxu3 %v3739_v34  ;;  %459 = vmatpush.msrb.mxu2 %v3691_v10 }
  0x41   :  { %440 = vmatpush.msra.mxu1 %v3505_v15  ;;  %549 = vmatpush.msra.mxu0 %v3481_v7 }
  0x42   :  { %352 = vmatpush.msrb.mxu3 %v3745_v20  ;;  %460 = vmatpush.msrb.mxu2 %v3699_v14 }
  0x43   :  { %550 = vmatpush.msra.mxu0 %v3487_v9  ;;  %441 = vmatpush.msra.mxu1 %v3511_v17 }
  0x44   :  { %353 = vmatpush.msrb.mxu3 %v3751_v36  ;;  %3010 = vmatmul.msk.f32.gmra.mxu2 %vm97_vm0, %v3689_v8 }
  0x45   :  { %354 = vmatmul.f32.vlgmr.msrb.gmra.mxu3 %v5718_v51  ;;  %551 = vmatpush.msra.mxu0 %v3493_v11 }
  0x46   :  { %472 = vmatpush.msra.mxu3 %v3529_v22  ;;  %3001 = vmatmul.msk.f32.gmra.mxu1 %vm97_vm0, %v3637_v53 }
  0x47   :  { %461 = vmatpush.msrb.mxu2 %v3709_v19  ;;  %442 = vmatpush.msra.mxu1 %v3527_v21 }
  0x48   :  { %473 = vmatpush.msra.mxu3 %v3541_v25  ;;  %552 = vmatpush.msra.mxu0 %v3499_v13 }
  0x49   :  { %462 = vmatpush.msrb.mxu2 %v3717_v26  ;;  %443 = vmatpush.msra.mxu1 %v3537_v24 }
  0x4a   :  { %474 = vmatpush.msra.mxu3 %v3553_v29  ;;  %553 = vmatpush.msra.mxu0 %v3505_v15 }
  0x4b   :  { %463 = vmatpush.msrb.mxu2 %v3725_v30  ;;  %444 = vmatpush.msra.mxu1 %v3551_v28 }
  0x4c   :  { %475 = vmatpush.msra.mxu3 %v3575_v35  ;;  %554 = vmatpush.msra.mxu0 %v3511_v17 }
  0x4d   :  { %3011 = vmatmul.msk.f32.gmra.mxu2 %vm97_vm0, %v3516_v18  ;;  %445 = vmatpush.msra.mxu1 %v3563_v32 }
  0x4e   :  { %476 = vmatpush.msra.mxu3 %v3590_v39  ;;  %3002 = vmatmul.msk.f32.gmra.mxu1 %vm97_vm0, %v3689_v8 }
  0x4f   :  { %555 = vmatpush.msra.mxu0 %v3527_v21  ;;  %464 = vmatpush.msrb.mxu2 %v3732_v31 }
  0x50   :  { %477 = vmatpush.msra.mxu3 %v3606_v44  ;;  %446 = vmatpush.msra.mxu1 %v3580_v37 }
  0x51   :  { %556 = vmatpush.msra.mxu0 %v3537_v24  ;;  %465 = vmatpush.msrb.mxu2 %v3739_v34 }
  0x52   :  { %478 = vmatpush.msra.mxu3 %v3615_v47  ;;  %447 = vmatpush.msra.mxu1 %v3595_v41 }
  0x53   :  { %557 = vmatpush.msra.mxu0 %v3551_v28  ;;  %466 = vmatpush.msrb.mxu2 %v3745_v20 }
  0x54   :  { %479 = vmatpush.msra.mxu3 %v3630_v52  ;;  %565 = vmatpush.msrb.mxu1 %v3602_v43 }
  0x55   :  { %558 = vmatpush.msra.mxu0 %v3563_v32  ;;  %3012 = vmatmul.msk.f32.gmra.mxu2 %vm97_vm0, %v3568_v33 }
  0x56   :  { %480 = vmatpush.msra.mxu3 %v3646_v56  ;;  %3003 = vmatmul.msk.f32.gmra.mxu1 %vm97_vm0, %v3516_v18 }
  0x57   :  { %467 = vmatpush.msrb.mxu2 %v3751_v36  ;;  %566 = vmatpush.msrb.mxu1 %v3613_v46 }
  0x58   :  { %481 = vmatpush.msra.mxu3 %v3657_v59  ;;  %559 = vmatpush.msra.mxu0 %v3580_v37 }
  0x59   :  { %585 = vmatpush.msra.mxu2 %v3529_v22  ;;  %567 = vmatpush.msrb.mxu1 %v3627_v50 }
  0x5a   :  { %482 = vmatpush.msra.mxu3 %v3666_v62  ;;  %560 = vmatpush.msra.mxu0 %v3595_v41 }
  0x5b   :  { %586 = vmatpush.msra.mxu2 %v3541_v25  ;;  %568 = vmatpush.msrb.mxu1 %v3642_v55 }
  0x5c   :  { %483 = vmatpush.msra.mxu3 %v3681_v6  ;;  %678 = vmatpush.msrb.mxu0 %v3602_v43 }
  0x5d   :  { %587 = vmatpush.msra.mxu2 %v3553_v29  ;;  %569 = vmatpush.msrb.mxu1 %v3653_v58 }
  0x5e   :  { %484 = vmatpush.msra.mxu3 %v3695_v12  ;;  %3004 = vmatmul.msk.f32.gmra.mxu1 %vm97_vm0, %v3568_v33  ;;  %v89_v33 = vld [vmem:[%s5709_s4] ss:$2 sm:$0x7] }
  0x5f   :  { %3013 = vmatmul.msk.f32.gmra.mxu2 %vm97_vm0, %v3621_v48  ;;  %679 = vmatpush.msrb.mxu0 %v3613_v46  ;;  %v3903_v40 = vperm.slane %v89_v33, 0 }
  0x60   :  { %485 = vmatpush.msra.mxu3 %v3703_v16  ;;  %588 = vmatpush.msra.mxu2 %v3575_v35 }
  0x61   :  { %570 = vmatpush.msrb.mxu1 %v3664_v61  ;;  %680 = vmatpush.msrb.mxu0 %v3627_v50  ;;  %5768 = vst [vmem:[#allocation17_spill] sm:$0xff] %v3903_v40 }
  0x62   :  { %486 = vmatpush.msra.mxu3 %v3711_v23  ;;  %589 = vmatpush.msra.mxu2 %v3590_v39 }
  0x63   :  { %571 = vmatpush.msrb.mxu1 %v3679_v5  ;;  %681 = vmatpush.msrb.mxu0 %v3642_v55 }
  0x64   :  { %487 = vmatpush.msra.mxu3 %v3719_v27  ;;  %590 = vmatpush.msra.mxu2 %v3606_v44 }
  0x65   :  { %572 = vmatpush.msrb.mxu1 %v3691_v10  ;;  %682 = vmatpush.msrb.mxu0 %v3653_v58 }
  0x66   :  { %658 = vmatpush.msrb.mxu3 %v3461_v0  ;;  %3005 = vmatmul.msk.f32.gmra.mxu1 %vm97_vm0, %v3621_v48 }
  0x67   :  { %591 = vmatpush.msra.mxu2 %v3615_v47  ;;  %573 = vmatpush.msrb.mxu1 %v3699_v14 }
  0x68   :  { %659 = vmatpush.msrb.mxu3 %v3463_v1  ;;  %3014 = vmatmul.msk.f32.gmra.mxu2 %vm97_vm0, %v3673_v63 }
  0x69   :  { %592 = vmatpush.msra.mxu2 %v3630_v52  ;;  %574 = vmatpush.msrb.mxu1 %v3709_v19 }
  0x6a   :  { %660 = vmatpush.msrb.mxu3 %v3466_v2  ;;  %683 = vmatpush.msrb.mxu0 %v3664_v61 }
  0x6b   :  { %593 = vmatpush.msra.mxu2 %v3646_v56  ;;  %575 = vmatpush.msrb.mxu1 %v3717_v26 }
  0x6c   :  { %661 = vmatpush.msrb.mxu3 %v3472_v4  ;;  %684 = vmatpush.msrb.mxu0 %v3679_v5 }
  0x6d   :  { %594 = vmatpush.msra.mxu2 %v3657_v59  ;;  %576 = vmatpush.msrb.mxu1 %v3725_v30 }
  0x6e   :  { %662 = vmatpush.msrb.mxu3 %v3481_v7  ;;  %3006 = vmatmul.msk.f32.gmra.mxu1 %vm97_vm0, %v3673_v63 }
  0x6f   :  { %595 = vmatpush.msra.mxu2 %v3666_v62  ;;  %685 = vmatpush.msrb.mxu0 %v3691_v10 }
  0x70   :  { %663 = vmatpush.msrb.mxu3 %v3487_v9  ;;  %577 = vmatpush.msrb.mxu1 %v3732_v31 }
  0x71   :  { %596 = vmatpush.msra.mxu2 %v3681_v6  ;;  %686 = vmatpush.msrb.mxu0 %v3699_v14 }
  0x72   :  { %664 = vmatpush.msrb.mxu3 %v3493_v11  ;;  %578 = vmatpush.msrb.mxu1 %v3739_v34 }
  0x73   :  { %597 = vmatpush.msra.mxu2 %v3695_v12  ;;  %687 = vmatpush.msrb.mxu0 %v3709_v19 }
  0x74   :  { %665 = vmatpush.msrb.mxu3 %v3499_v13  ;;  %579 = vmatpush.msrb.mxu1 %v3745_v20 }
  0x75   :  { %598 = vmatpush.msra.mxu2 %v3703_v16  ;;  %688 = vmatpush.msrb.mxu0 %v3717_v26 }
  0x76   :  { %666 = vmatpush.msrb.mxu3 %v3505_v15  ;;  %580 = vmatpush.msrb.mxu1 %v3751_v36 }
  0x77   :  { %599 = vmatpush.msra.mxu2 %v3711_v23  ;;  %689 = vmatpush.msrb.mxu0 %v3725_v30 }
  0x78   :  { %667 = vmatpush.msrb.mxu3 %v3511_v17 }
  0x79   :  { %600 = vmatpush.msra.mxu2 %v3719_v27  ;;  %690 = vmatpush.msrb.mxu0 %v3732_v31 }
  0x7a   :  { %668 = vmatpush.msrb.mxu3 %v3527_v21 }
  0x7b   :  { %691 = vmatpush.msrb.mxu0 %v3739_v34 }
  0x7c   :  { %669 = vmatpush.msrb.mxu3 %v3537_v24 }
  0x7d   :  { %692 = vmatpush.msrb.mxu0 %v3745_v20 }
  0x7e   :  { %670 = vmatpush.msrb.mxu3 %v3551_v28 }
  0x7f   :  { %693 = vmatpush.msrb.mxu0 %v3751_v36  ;;  %v3922_v36 = vld [vmem:[%s5710_s5] ss:$0 sm:$0xff] }
  0x80   :  { %671 = vmatpush.msrb.mxu3 %v3563_v32 }
  0x82   :  { %672 = vmatpush.msrb.mxu3 %v3580_v37 }
  0x84   :  { %673 = vmatpush.msrb.mxu3 %v3595_v41 }
  0x93   :  { %v3896_v18 = vpop.f32.mrf.mxu1 }
  0x94   :  { %5766 = vst [vmem:[#allocation15_spill] sm:$0xff] %v3896_v18  ;;  %v139_v42 = vpop.f32.mrf.mxu0 }
  0x95   :  { %v140_v45 = vadd.f32 %v139_v42, %v3903_v40 }
  0x9b   :  { %v3901_v38 = vpop.f32.mrf.mxu1 }
  0x9c   :  { %5767 = vst [vmem:[#allocation16_spill] sm:$0xff] %v3901_v38  ;;  %v3914_v38 = vperm.slane %v89_v33, 1 }
  0x9d   :  { %v3908_v60 = vpop.f32.mrf.mxu0 }
  0x9e   :  { %5770 = vst [vmem:[#allocation19_spill] sm:$0xff] %v3908_v60 }
  0x9f   :  { %5773 = vst [vmem:[#allocation22_spill] sm:$0xff] %v3914_v38 }
  0xa3   :  { %v3906_v54 = vpop.f32.mrf.mxu1 }
  0xa4   :  { %5769 = vst [vmem:[#allocation18_spill] sm:$0xff] %v3906_v54 }
  0xa5   :  { %v3912_v8 = vpop.f32.mrf.mxu0 }
  0xa6   :  { %5772 = vst [vmem:[#allocation21_spill] sm:$0xff] %v3912_v8 }
  0xa8   :  { %v335_v48 = vpop.f32.mrf.mxu3 }
  0xa9   :  { %v381_v49 = vadd.f32 %v335_v48, %v140_v45 }
  0xab   :  { %v3015_v53 = vmul.f32 -1.442695, %v381_v49  ;;  %v3910_v3 = vpop.f32.mrf.mxu1 }
  0xac   :  { %5771 = vst [vmem:[#allocation20_spill] sm:$0xff] %v3910_v3 }
  0xad   :  { %3068 = vpow2.f32 %v3015_v53  ;;  %v3917_v54 = vpop.f32.mrf.mxu0 }
  0xae   :  { %5774 = vst [vmem:[#allocation23_spill] sm:$0xff] %v3917_v54 }
  0xb3   :  { %v3069_v57 = vpop.eup %3068  ;;  %v180_v18 = vpop.f32.mrf.mxu1 }
  0xb4   :  { %v385_v63 = vadd.f32 1.0, %v3069_v57  ;;  %v181_v45 = vadd.f32 %v180_v18, %v3914_v38 }
  0xb5   :  { %v375_v38 = vpop.f32.mrf.mxu0 }
  0xb6   :  { %3070 = vrcp.f32 %v385_v63  ;;  %vm391_vm1 = vweird.f32 %v385_v63  ;;  %v397_v57 = vand.u32 2147483648, %v385_v63  ;;  %v395_v8 = vand.u32 2147483647, %v385_v63 }
  0xb8   :  { %vm396_vm4 = vcmp.eq.f32.partialorder %v395_v8, 8.507059e+37 }
  0xbc   :  { %v3071_v51 = vpop.eup %3070 }
  0xbd   :  { %v387_v42 = vmul.f32 %v3071_v51, %v385_v63  ;;  %vm392_vm2 = vweird.f32 %v3071_v51 }
  0xbe   :  { %vm393_vm3 = vmor %vm391_vm1, %vm392_vm2 }
  0xbf   :  { %v388_v49 = vsub.f32 1.0, %v387_v42  ;;  %v398_v42 = vor.u32 1.1754944e-38, %v397_v57 }
  0xc1   :  { %v389_v60 = vmul.f32 %v3071_v51, %v388_v49 }
  0xc3   :  { %v390_v3 = vadd.f32 %v3071_v51, %v389_v60  ;;  %v221_v60 = vpop.f32.mrf.mxu2 }
  0xc5   :  { %v394_v54 = vsel %vm393_vm3, %v3071_v51, %v390_v3 }
  0xc8   :  { %v355_v48 = vpop.f32.mrf.mxu3 }
  0xc9   :  { %v401_v53 = vadd.f32 %v355_v48, %v181_v45  ;;  %v3925_v45 = vperm.slane %v89_v33, 2  ;;  %v399_v48 = vsel %vm396_vm4, %v398_v42, %v394_v54 }
  0xcb   :  { %v3016_v40 = vmul.f32 -1.442695, %v401_v53  ;;  %v222_v49 = vadd.f32 %v221_v60, %v3925_v45 }
  0xcd   :  { %3072 = vpow2.f32 %v3016_v40  ;;  %v422_v40 = vadd.f32 %v3922_v36, %v375_v38 }
  0xcf   :  { %v423_v63 = vmul.f32 %v422_v40, %v399_v48 }
  0xd1   :  { %v424_v20 = vadd.f32 %v423_v63, %v222_v49 }
  0xd3   :  { %v3073_v18 = vpop.eup %3072 }
  0xd4   :  { %v405_v41 = vadd.f32 1.0, %v3073_v18 }
  0xd6   :  { %3074 = vrcp.f32 %v405_v41  ;;  %v417_v23 = vand.u32 2147483648, %v405_v41  ;;  %v415_v57 = vand.u32 2147483647, %v405_v41  ;;  %vm411_vm6 = vweird.f32 %v405_v41 }
  0xd7   :  { %3076 = vtanh.f32 %v424_v20 }
  0xd8   :  { %v418_v38 = vor.u32 1.1754944e-38, %v417_v23  ;;  %vm416_vm8 = vcmp.eq.f32.partialorder %v415_v57, 8.507059e+37  ;;  %v224_v23 = vpop.f32.mrf.mxu2 }
  0xdc   :  { %v3075_v53 = vpop.eup %3074 }
  0xdd   :  { %v407_v27 = vmul.f32 %v3075_v53, %v405_v41  ;;  %vm412_vm5 = vweird.f32 %v3075_v53  ;;  %v3077_v8 = vpop.eup %3076  ;;  %v183_v41 = vpop.f32.mrf.mxu1 }
  0xde   :  { %vm413_vm7 = vmor %vm411_vm6, %vm412_vm5 }
  0xdf   :  { %v408_v37 = vsub.f32 1.0, %v407_v27 }
  0xe1   :  { %v409_v34 = vmul.f32 %v3075_v53, %v408_v37  ;;  %v5781_v37 = vld [vmem:[#allocation14_spill] sm:$0xff] }
  0xe3   :  { %v410_v51 = vadd.f32 %v3075_v53, %v409_v34  ;;  %v3983_v34 = vpop.f32.mrf.mxu2 }
  0xe5   :  { %v414_v33 = vsel %vm413_vm7, %v3075_v53, %v410_v51  ;;  %v3981_v27 = vpop.f32.mrf.mxu1 }
  0xe6   :  { %v419_v54 = vsel %vm416_vm8, %v418_v38, %v414_v33 }
  0xe7   :  { %v426_v3 = vsub.f32 1.0, %v419_v54  ;;  %v428_v42 = vmul.f32 0.0, %v419_v54  ;;  %v5794_v54 = vld [vmem:[#allocation17_spill] sm:$0xff] }
  0xe9   :  { %v427_v18 = vmul.f32 %v3077_v8, %v426_v3  ;;  %v5795_v3 = vld [vmem:[#allocation19_spill] sm:$0xff] }
  0xea   :  { %v143_v8 = vadd.f32 %v5795_v3, %v5794_v54 }
  0xeb   :  { %v3928_v40 = vadd.f32 %v428_v42, %v427_v18  ;;  %v3987_v48 = vpop.f32.mrf.mxu2 }
  0xec   :  { %5785 = vst [vmem:[#allocation24_spill] sm:$0xff] %v3987_v48  ;;  %v5796_v48 = vld [vmem:[#allocation22_spill] sm:$0xff] }
  0xed   :  { %448 = vmatmul.f32.vlgmr.msra.gmra.mxu1 %v3928_v40  ;;  %468 = vmatmul.f32.vlgmr.msrb.gmra.mxu2 %v3928_v40  ;;  %v3985_v20 = vpop.f32.mrf.mxu1 }
  0xee   :  { %488 = vmatmul.f32.vlgmr.msra.gmra.mxu3 %v3928_v40  ;;  %698 = vmatpush.msra.mxu1 %v3529_v22 }
  0xef   :  { %771 = vmatpush.msrb.mxu2 %v3461_v0  ;;  %791 = vmatpush.msra.mxu3 %v3602_v43  ;;  %v5775_v0 = vld [vmem:[#allocation12_spill] sm:$0xff] }
  0xf0   :  { %699 = vmatpush.msra.mxu1 %v3541_v25  ;;  %5782 = vst [vmem:[#allocation12_spill] sm:$0xff] %v3981_v27 }
  0xf1   :  { %772 = vmatpush.msrb.mxu2 %v3463_v1  ;;  %792 = vmatpush.msra.mxu3 %v3613_v46  ;;  %v5776_v1 = vld [vmem:[#allocation10_spill] sm:$0xff] }
  0xf2   :  { %700 = vmatpush.msra.mxu1 %v3553_v29  ;;  %5783 = vst [vmem:[#allocation10_spill] sm:$0xff] %v3983_v34 }
  0xf3   :  { %773 = vmatpush.msrb.mxu2 %v3466_v2  ;;  %793 = vmatpush.msra.mxu3 %v3627_v50  ;;  %v5777_v2 = vld [vmem:[#allocation8_spill] sm:$0xff]  ;;  %v3991_v63 = vpop.f32.mrf.mxu2 }
  0xf4   :  { %701 = vmatpush.msra.mxu1 %v3575_v35  ;;  %5784 = vst [vmem:[#allocation8_spill] sm:$0xff] %v3985_v20 }
  0xf5   :  { %774 = vmatpush.msrb.mxu2 %v3472_v4  ;;  %794 = vmatpush.msra.mxu3 %v3642_v55  ;;  %v5778_v4 = vld [vmem:[#allocation13_spill] sm:$0xff]  ;;  %v3989_v60 = vpop.f32.mrf.mxu1  ;;  %5787 = vst [vmem:[#allocation26_spill] sm:$0xff] %v3991_v63  ;;  %v184_v63 = vadd.f32 %v183_v41, %v5796_v48 }
  0xf6   :  { %702 = vmatpush.msra.mxu1 %v3590_v39  ;;  %5786 = vst [vmem:[#allocation25_spill] sm:$0xff] %v3989_v60 }
  0xf7   :  { %775 = vmatpush.msrb.mxu2 %v3481_v7  ;;  %795 = vmatpush.msra.mxu3 %v3653_v58  ;;  %v5779_v7 = vld [vmem:[#allocation11_spill] sm:$0xff] }
  0xf8   :  { %703 = vmatpush.msra.mxu1 %v3606_v44 }
  0xf9   :  { %776 = vmatpush.msrb.mxu2 %v3487_v9  ;;  %796 = vmatpush.msra.mxu3 %v3664_v61  ;;  %v5780_v9 = vld [vmem:[#allocation9_spill] sm:$0xff] }
  0xfa   :  { %704 = vmatpush.msra.mxu1 %v3615_v47 }
  0xfb   :  { %777 = vmatpush.msrb.mxu2 %v3493_v11  ;;  %797 = vmatpush.msra.mxu3 %v3679_v5  ;;  %v3995_v53 = vpop.f32.mrf.mxu2 }
  0xfc   :  { %705 = vmatpush.msra.mxu1 %v3630_v52  ;;  %5789 = vst [vmem:[#allocation28_spill] sm:$0xff] %v3995_v53 }
  0xfd   :  { %778 = vmatpush.msrb.mxu2 %v3499_v13  ;;  %798 = vmatpush.msra.mxu3 %v3691_v10  ;;  %v3993_v49 = vpop.f32.mrf.mxu1 }
  0xfe   :  { %706 = vmatpush.msra.mxu1 %v3646_v56  ;;  %5788 = vst [vmem:[#allocation27_spill] sm:$0xff] %v3993_v49 }
  0xff   :  { %779 = vmatpush.msrb.mxu2 %v3505_v15  ;;  %799 = vmatpush.msra.mxu3 %v3699_v14 }
 0x100   :  { %707 = vmatpush.msra.mxu1 %v3657_v59 }
 0x101   :  { %780 = vmatpush.msrb.mxu2 %v3511_v17  ;;  %800 = vmatpush.msra.mxu3 %v3709_v19 }
 0x102   :  { %708 = vmatpush.msra.mxu1 %v3666_v62 }
 0x103   :  { %781 = vmatpush.msrb.mxu2 %v3527_v21  ;;  %801 = vmatpush.msra.mxu3 %v3717_v26  ;;  %v3999_v51 = vpop.f32.mrf.mxu2 }
 0x104   :  { %709 = vmatpush.msra.mxu1 %v3681_v6  ;;  %5791 = vst [vmem:[#allocation30_spill] sm:$0xff] %v3999_v51 }
 0x105   :  { %782 = vmatpush.msrb.mxu2 %v3537_v24  ;;  %802 = vmatpush.msra.mxu3 %v3725_v30  ;;  %v3997_v57 = vpop.f32.mrf.mxu1 }
 0x106   :  { %710 = vmatpush.msra.mxu1 %v3695_v12  ;;  %5790 = vst [vmem:[#allocation29_spill] sm:$0xff] %v3997_v57 }
 0x107   :  { %783 = vmatpush.msrb.mxu2 %v3551_v28  ;;  %803 = vmatpush.msra.mxu3 %v3732_v31 }
 0x108   :  { %711 = vmatpush.msra.mxu1 %v3703_v16 }
 0x109   :  { %784 = vmatpush.msrb.mxu2 %v3563_v32  ;;  %804 = vmatpush.msra.mxu3 %v5775_v0 }
 0x10a   :  { %712 = vmatpush.msra.mxu1 %v5776_v1 }
 0x10b   :  { %785 = vmatpush.msrb.mxu2 %v5777_v2  ;;  %805 = vmatpush.msra.mxu3 %v5778_v4  ;;  %v4003_v33 = vpop.f32.mrf.mxu2 }
 0x10c   :  { %713 = vmatpush.msra.mxu1 %v5779_v7  ;;  %5793 = vst [vmem:[#allocation32_spill] sm:$0xff] %v4003_v33 }
 0x10d   :  { %786 = vmatpush.msrb.mxu2 %v5780_v9  ;;  %806 = vmatpush.msra.mxu3 %v5781_v37  ;;  %v4001_v38 = vpop.f32.mrf.mxu1 }
 0x10e   :  { %5792 = vst [vmem:[#allocation31_spill] sm:$0xff] %v4001_v38 }
 0x16a   :  { %v449_v18 = vpop.f32.mrf.mxu1 }
 0x16b   :  { %v495_v42 = vadd.f32 %v449_v18, %v143_v8 }
 0x16d   :  { %v3017_v60 = vmul.f32 -1.442695, %v495_v42 }
 0x16f   :  { %3078 = vpow2.f32 %v3017_v60 }
 0x170   :  { %v469_v49 = vpop.f32.mrf.mxu2 }
 0x171   :  { %v515_v20 = vadd.f32 %v469_v49, %v184_v63  ;;  %v489_v41 = vpop.f32.mrf.mxu3 }
 0x172   :  { %v535_v49 = vadd.f32 %v3922_v36, %v489_v41 }
 0x173   :  { %v3018_v53 = vmul.f32 -1.442695, %v515_v20 }
 0x175   :  { %v3079_v34 = vpop.eup %3078  ;;  %3080 = vpow2.f32 %v3018_v53  ;;  %v225_v53 = vadd.f32 %v224_v23, %v3925_v45 }
 0x176   :  { %v499_v57 = vadd.f32 1.0, %v3079_v34 }
 0x178   :  { %3082 = vrcp.f32 %v499_v57  ;;  %v511_v3 = vand.u32 2147483648, %v499_v57  ;;  %v509_v8 = vand.u32 2147483647, %v499_v57  ;;  %vm505_vm10 = vweird.f32 %v499_v57 }
 0x17a   :  { %v512_v20 = vor.u32 1.1754944e-38, %v511_v3  ;;  %vm510_vm12 = vcmp.eq.f32.partialorder %v509_v8, 8.507059e+37 }
 0x17b   :  { %v3081_v51 = vpop.eup %3080 }
 0x17c   :  { %v519_v38 = vadd.f32 1.0, %v3081_v51 }
 0x17e   :  { %v3083_v27 = vpop.eup %3082  ;;  %3084 = vrcp.f32 %v519_v38  ;;  %v529_v9 = vand.u32 2147483647, %v519_v38  ;;  %vm525_vm14 = vweird.f32 %v519_v38 }
 0x17f   :  { %v501_v33 = vmul.f32 %v3083_v27, %v499_v57  ;;  %vm506_vm9 = vweird.f32 %v3083_v27 }
 0x180   :  { %vm507_vm11 = vmor %vm505_vm10, %vm506_vm9  ;;  %vm530_vm0 = vcmp.eq.f32.partialorder %v529_v9, 8.507059e+37 }
 0x181   :  { %v502_v37 = vsub.f32 1.0, %v501_v33 }
 0x183   :  { %v503_v54 = vmul.f32 %v3083_v27, %v502_v37  ;;  %v531_v37 = vand.u32 2147483648, %v519_v38 }
 0x184   :  { %v3085_v18 = vpop.eup %3084 }
 0x185   :  { %v521_v60 = vmul.f32 %v3085_v18, %v519_v38  ;;  %v504_v42 = vadd.f32 %v3083_v27, %v503_v54  ;;  %vm526_vm13 = vweird.f32 %v3085_v18  ;;  %v532_v57 = vor.u32 1.1754944e-38, %v531_v37 }
 0x186   :  { %vm527_vm15 = vmor %vm525_vm14, %vm526_vm13 }
 0x187   :  { %v522_v63 = vsub.f32 1.0, %v521_v60  ;;  %v508_v34 = vsel %vm507_vm11, %v3083_v27, %v504_v42 }
 0x188   :  { %v513_v51 = vsel %vm510_vm12, %v512_v20, %v508_v34 }
 0x189   :  { %v523_v33 = vmul.f32 %v3085_v18, %v522_v63  ;;  %v536_v48 = vmul.f32 %v535_v49, %v513_v51 }
 0x18b   :  { %v524_v7 = vadd.f32 %v3085_v18, %v523_v33  ;;  %v537_v4 = vadd.f32 %v536_v48, %v225_v53  ;;  %v4017_v48 = vld [vmem:[#allocation5 + $0x168] sm:$0xff] }
 0x18d   :  { %v528_v54 = vsel %vm527_vm15, %v3085_v18, %v524_v7  ;;  %3086 = vtanh.f32 %v537_v4  ;;  %v4022_v4 = vld [vmem:[#allocation5 + $0x150] sm:$0xff]  ;;  %v4027_v7 = vld [vmem:[#allocation5 + $0x138] sm:$0xff] }
 0x18e   :  { %v533_v27 = vsel %vm530_vm0, %v532_v57, %v528_v54 }
 0x18f   :  { %v539_v3 = vsub.f32 1.0, %v533_v27  ;;  %v541_v23 = vmul.f32 %v533_v27, %v3928_v40 }
 0x193   :  { %v3087_v8 = vpop.eup %3086 }
 0x194   :  { %v540_v41 = vmul.f32 %v3087_v8, %v539_v3  ;;  %v5805_v3 = vld [vmem:[#allocation10_spill] sm:$0xff] }
 0x195   :  { %v228_v8 = vadd.f32 %v5805_v3, %v3925_v45 }
 0x196   :  { %v4011_v60 = vadd.f32 %v541_v23, %v540_v41 }
 0x198   :  { %561 = vmatmul.f32.vlgmr.msra.gmra.mxu0 %v4011_v60  ;;  %581 = vmatmul.f32.vlgmr.msrb.gmra.mxu1 %v4011_v60 }
 0x199   :  { %601 = vmatmul.f32.vlgmr.msra.gmra.mxu2 %v4011_v60  ;;  %811 = vmatpush.msra.mxu0 %v3529_v22  ;;  %v4032_v22 = vld [vmem:[#allocation5 + $0x120] sm:$0xff] }
 0x19a   :  { %884 = vmatpush.msrb.mxu1 %v4017_v48  ;;  %904 = vmatpush.msra.mxu2 %v3602_v43 }
 0x19b   :  { %812 = vmatpush.msra.mxu0 %v3541_v25  ;;  %v4037_v25 = vld [vmem:[#allocation5 + $0x108] sm:$0xff] }
 0x19c   :  { %885 = vmatpush.msrb.mxu1 %v4022_v4  ;;  %905 = vmatpush.msra.mxu2 %v3613_v46 }
 0x19d   :  { %813 = vmatpush.msra.mxu0 %v3553_v29  ;;  %v4042_v29 = vld [vmem:[#allocation5 + $0xf0] sm:$0xff] }
 0x19e   :  { %886 = vmatpush.msrb.mxu1 %v4027_v7  ;;  %906 = vmatpush.msra.mxu2 %v3627_v50 }
 0x19f   :  { %814 = vmatpush.msra.mxu0 %v3575_v35  ;;  %v5803_v35 = vld [vmem:[#allocation22_spill] sm:$0xff] }
 0x1a0   :  { %887 = vmatpush.msrb.mxu1 %v4032_v22  ;;  %907 = vmatpush.msra.mxu2 %v3642_v55 }
 0x1a1   :  { %815 = vmatpush.msra.mxu0 %v3590_v39  ;;  %v5804_v39 = vld [vmem:[#allocation12_spill] sm:$0xff] }
 0x1a2   :  { %888 = vmatpush.msrb.mxu1 %v4037_v25  ;;  %908 = vmatpush.msra.mxu2 %v3653_v58 }
 0x1a3   :  { %816 = vmatpush.msra.mxu0 %v3606_v44 }
 0x1a4   :  { %889 = vmatpush.msrb.mxu1 %v4042_v29  ;;  %909 = vmatpush.msra.mxu2 %v3664_v61 }
 0x1a5   :  { %817 = vmatpush.msra.mxu0 %v3615_v47 }
 0x1a6   :  { %890 = vmatpush.msrb.mxu1 %v3493_v11  ;;  %910 = vmatpush.msra.mxu2 %v3679_v5  ;;  %v5797_v11 = vld [vmem:[#allocation13_spill] sm:$0xff] }
 0x1a7   :  { %818 = vmatpush.msra.mxu0 %v3630_v52 }
 0x1a8   :  { %891 = vmatpush.msrb.mxu1 %v3499_v13  ;;  %911 = vmatpush.msra.mxu2 %v3691_v10  ;;  %v5798_v13 = vld [vmem:[#allocation11_spill] sm:$0xff] }
 0x1a9   :  { %819 = vmatpush.msra.mxu0 %v3646_v56 }
 0x1aa   :  { %892 = vmatpush.msrb.mxu1 %v3505_v15  ;;  %912 = vmatpush.msra.mxu2 %v3699_v14  ;;  %v5799_v15 = vld [vmem:[#allocation9_spill] sm:$0xff] }
 0x1ab   :  { %820 = vmatpush.msra.mxu0 %v3657_v59 }
 0x1ac   :  { %893 = vmatpush.msrb.mxu1 %v3511_v17  ;;  %913 = vmatpush.msra.mxu2 %v3709_v19  ;;  %v5800_v17 = vld [vmem:[#allocation14_spill] sm:$0xff] }
 0x1ad   :  { %821 = vmatpush.msra.mxu0 %v3666_v62 }
 0x1ae   :  { %894 = vmatpush.msrb.mxu1 %v3527_v21  ;;  %914 = vmatpush.msra.mxu2 %v3717_v26  ;;  %v5801_v21 = vld [vmem:[#allocation17_spill] sm:$0xff] }
 0x1af   :  { %822 = vmatpush.msra.mxu0 %v3681_v6 }
 0x1b0   :  { %895 = vmatpush.msrb.mxu1 %v3537_v24  ;;  %915 = vmatpush.msra.mxu2 %v3725_v30  ;;  %v5802_v24 = vld [vmem:[#allocation21_spill] sm:$0xff] }
 0x1b1   :  { %823 = vmatpush.msra.mxu0 %v3695_v12 }
 0x1b2   :  { %896 = vmatpush.msrb.mxu1 %v3551_v28  ;;  %916 = vmatpush.msra.mxu2 %v3732_v31  ;;  %v146_v28 = vadd.f32 %v5802_v24, %v5801_v21 }
 0x1b3   :  { %824 = vmatpush.msra.mxu0 %v3703_v16 }
 0x1b4   :  { %897 = vmatpush.msrb.mxu1 %v3563_v32  ;;  %917 = vmatpush.msra.mxu2 %v5775_v0  ;;  %v187_v32 = vadd.f32 %v5804_v39, %v5803_v35 }
 0x1b5   :  { %825 = vmatpush.msra.mxu0 %v5776_v1 }
 0x1b6   :  { %898 = vmatpush.msrb.mxu1 %v5777_v2  ;;  %918 = vmatpush.msra.mxu2 %v5797_v11 }
 0x1b7   :  { %826 = vmatpush.msra.mxu0 %v5798_v13 }
 0x1b8   :  { %899 = vmatpush.msrb.mxu1 %v5799_v15  ;;  %919 = vmatpush.msra.mxu2 %v5800_v17 }
 0x215   :  { %v562_v43 = vpop.f32.mrf.mxu0  ;;  %v582_v44 = vpop.f32.mrf.mxu1 }
 0x216   :  { %v608_v46 = vadd.f32 %v562_v43, %v146_v28  ;;  %v628_v47 = vadd.f32 %v582_v44, %v187_v32 }
 0x218   :  { %v3019_v50 = vmul.f32 -1.442695, %v608_v46  ;;  %v3020_v52 = vmul.f32 -1.442695, %v628_v47 }
 0x21a   :  { %3088 = vpow2.f32 %v3019_v50 }
 0x21b   :  { %3090 = vpow2.f32 %v3020_v52  ;;  %v4089_v52 = vld [vmem:[#allocation5 + $0x178] sm:$0xff] }
 0x21c   :  { %v602_v53 = vpop.f32.mrf.mxu2 }
 0x21d   :  { %v648_v57 = vadd.f32 %v3922_v36, %v602_v53  ;;  %v4158_v53 = vld [vmem:[#allocation5 + $0x78] sm:$0xff] }
 0x220   :  { %v3089_v55 = vpop.eup %3088 }
 0x221   :  { %v3091_v56 = vpop.eup %3090  ;;  %v612_v59 = vadd.f32 1.0, %v3089_v55  ;;  %v4093_v55 = vld [vmem:[#allocation5 + $0x170] sm:$0xff] }
 0x222   :  { %v632_v62 = vadd.f32 1.0, %v3091_v56  ;;  %v4096_v56 = vld [vmem:[#allocation5 + $0x160] sm:$0xff] }
 0x223   :  { %3092 = vrcp.f32 %v612_v59  ;;  %v624_v20 = vand.u32 2147483648, %v612_v59  ;;  %v622_v34 = vand.u32 2147483647, %v612_v59  ;;  %vm618_vm2 = vweird.f32 %v612_v59 }
 0x224   :  { %3094 = vrcp.f32 %v632_v62  ;;  %v644_v41 = vand.u32 2147483648, %v632_v62  ;;  %vm638_vm6 = vweird.f32 %v632_v62  ;;  %v642_v15 = vand.u32 2147483647, %v632_v62 }
 0x225   :  { %v625_v33 = vor.u32 1.1754944e-38, %v624_v20  ;;  %vm623_vm4 = vcmp.eq.f32.partialorder %v622_v34, 8.507059e+37  ;;  %v4130_v20 = vld [vmem:[#allocation5 + $0xd8] sm:$0xff]  ;;  %v4144_v34 = vld [vmem:[#allocation5 + $0xa8] sm:$0xff] }
 0x226   :  { %v645_v39 = vor.u32 1.1754944e-38, %v644_v41  ;;  %vm643_vm8 = vcmp.eq.f32.partialorder %v642_v15, 8.507059e+37 }
 0x229   :  { %v3093_v6 = vpop.eup %3092 }
 0x22a   :  { %v3095_v2 = vpop.eup %3094  ;;  %v614_v9 = vmul.f32 %v3093_v6, %v612_v59  ;;  %vm619_vm1 = vweird.f32 %v3093_v6  ;;  %v4100_v59 = vld [vmem:[#allocation5 + $0x158] sm:$0xff] }
 0x22b   :  { %v634_v38 = vmul.f32 %v3095_v2, %v632_v62  ;;  %vm620_vm3 = vmor %vm618_vm2, %vm619_vm1  ;;  %vm639_vm5 = vweird.f32 %v3095_v2  ;;  %v4103_v62 = vld [vmem:[#allocation5 + $0x148] sm:$0xff] }
 0x22c   :  { %v615_v18 = vsub.f32 1.0, %v614_v9  ;;  %vm640_vm7 = vmor %vm638_vm6, %vm639_vm5  ;;  %v4114_v9 = vld [vmem:[#allocation5 + $0x128] sm:$0xff] }
 0x22d   :  { %v635_v42 = vsub.f32 1.0, %v634_v38  ;;  %v4117_v38 = vld [vmem:[#allocation5 + $0x118] sm:$0xff] }
 0x22e   :  { %v616_v63 = vmul.f32 %v3093_v6, %v615_v18  ;;  %v4122_v18 = vld [vmem:[#allocation5 + $0x100] sm:$0xff] }
 0x22f   :  { %v636_v49 = vmul.f32 %v3095_v2, %v635_v42  ;;  %v4127_v42 = vld [vmem:[#allocation5 + $0xe8] sm:$0xff] }
 0x230   :  { %v617_v51 = vadd.f32 %v3093_v6, %v616_v63  ;;  %v4134_v63 = vld [vmem:[#allocation5 + $0xd0] sm:$0xff] }
 0x231   :  { %v637_v54 = vadd.f32 %v3095_v2, %v636_v49  ;;  %v4151_v49 = vld [vmem:[#allocation5 + $0x90] sm:$0xff] }
 0x232   :  { %v621_v37 = vsel %vm620_vm3, %v3093_v6, %v617_v51  ;;  %v4107_v6 = vld [vmem:[#allocation5 + $0x140] sm:$0xff] }
 0x233   :  { %v626_v27 = vsel %vm623_vm4, %v625_v33, %v621_v37  ;;  %v641_v28 = vsel %vm640_vm7, %v3095_v2, %v637_v54  ;;  %v4110_v2 = vld [vmem:[#allocation5 + $0x130] sm:$0xff]  ;;  %v4165_v51 = vld [vmem:[#allocation5 + $0x60] sm:$0xff]  ;;  %v4180_v33 = vld [vmem:[#allocation5 + $0x18] sm:$0xff] }
 0x234   :  { %v649_v23 = vmul.f32 %v648_v57, %v626_v27  ;;  %v646_v32 = vsel %vm643_vm8, %v645_v39, %v641_v28  ;;  %v5807_v37 = vld [vmem:[#allocation23_spill] sm:$0xff] }
 0x235   :  { %v652_v43 = vsub.f32 1.0, %v646_v32  ;;  %v654_v47 = vmul.f32 %v646_v32, %v4011_v60  ;;  %v149_v57 = vadd.f32 %v5807_v37, %v5801_v21 }
 0x236   :  { %v650_v24 = vadd.f32 %v649_v23, %v228_v8 }
 0x238   :  { %3096 = vtanh.f32 %v650_v24 }
 0x23e   :  { %v3097_v44 = vpop.eup %3096 }
 0x23f   :  { %v653_v46 = vmul.f32 %v3097_v44, %v652_v43 }
 0x241   :  { %v4084_v50 = vadd.f32 %v654_v47, %v653_v46 }
 0x243   :  { %674 = vmatmul.f32.vlgmr.msrb.gmra.mxu3 %v4084_v50  ;;  %694 = vmatmul.f32.vlgmr.msrb.gmra.mxu0 %v4084_v50 }
 0x244   :  { %714 = vmatmul.f32.vlgmr.msra.gmra.mxu1 %v4084_v50  ;;  %924 = vmatpush.msrb.mxu3 %v4089_v52 }
 0x245   :  { %997 = vmatpush.msrb.mxu0 %v4017_v48  ;;  %1017 = vmatpush.msra.mxu1 %v4093_v55 }
 0x246   :  { %925 = vmatpush.msrb.mxu3 %v4096_v56 }
 0x247   :  { %998 = vmatpush.msrb.mxu0 %v4022_v4  ;;  %1018 = vmatpush.msra.mxu1 %v4100_v59 }
 0x248   :  { %926 = vmatpush.msrb.mxu3 %v4103_v62 }
 0x249   :  { %999 = vmatpush.msrb.mxu0 %v4027_v7  ;;  %1019 = vmatpush.msra.mxu1 %v4107_v6 }
 0x24a   :  { %927 = vmatpush.msrb.mxu3 %v4110_v2 }
 0x24b   :  { %1000 = vmatpush.msrb.mxu0 %v4032_v22  ;;  %1020 = vmatpush.msra.mxu1 %v4114_v9 }
 0x24c   :  { %928 = vmatpush.msrb.mxu3 %v4117_v38 }
 0x24d   :  { %1001 = vmatpush.msrb.mxu0 %v4037_v25  ;;  %1021 = vmatpush.msra.mxu1 %v3653_v58  ;;  %v4137_v58 = vld [vmem:[#allocation5 + $0xc0] sm:$0xff] }
 0x24e   :  { %929 = vmatpush.msrb.mxu3 %v4122_v18 }
 0x24f   :  { %1002 = vmatpush.msrb.mxu0 %v4042_v29  ;;  %1022 = vmatpush.msra.mxu1 %v3664_v61  ;;  %v4141_v61 = vld [vmem:[#allocation5 + $0xb8] sm:$0xff] }
 0x250   :  { %930 = vmatpush.msrb.mxu3 %v4127_v42 }
 0x251   :  { %1003 = vmatpush.msrb.mxu0 %v4130_v20  ;;  %1023 = vmatpush.msra.mxu1 %v3679_v5  ;;  %v4148_v5 = vld [vmem:[#allocation5 + $0xa0] sm:$0xff] }
 0x252   :  { %931 = vmatpush.msrb.mxu3 %v4134_v63 }
 0x253   :  { %1004 = vmatpush.msrb.mxu0 %v4137_v58  ;;  %1024 = vmatpush.msra.mxu1 %v3691_v10  ;;  %v4155_v10 = vld [vmem:[#allocation5 + $0x88] sm:$0xff] }
 0x254   :  { %932 = vmatpush.msrb.mxu3 %v4141_v61 }
 0x255   :  { %1005 = vmatpush.msrb.mxu0 %v4144_v34  ;;  %1025 = vmatpush.msra.mxu1 %v3699_v14  ;;  %v4162_v14 = vld [vmem:[#allocation5 + $0x70] sm:$0xff] }
 0x256   :  { %933 = vmatpush.msrb.mxu3 %v4148_v5 }
 0x257   :  { %1006 = vmatpush.msrb.mxu0 %v4151_v49  ;;  %1026 = vmatpush.msra.mxu1 %v3709_v19  ;;  %v4170_v19 = vld [vmem:[#allocation5 + $0x48] sm:$0xff] }
 0x258   :  { %934 = vmatpush.msrb.mxu3 %v4155_v10 }
 0x259   :  { %1007 = vmatpush.msrb.mxu0 %v4158_v53  ;;  %1027 = vmatpush.msra.mxu1 %v3717_v26  ;;  %v4175_v26 = vld [vmem:[#allocation5 + $0x30] sm:$0xff] }
 0x25a   :  { %935 = vmatpush.msrb.mxu3 %v4162_v14 }
 0x25b   :  { %1008 = vmatpush.msrb.mxu0 %v4165_v51  ;;  %1028 = vmatpush.msra.mxu1 %v3725_v30 }
 0x25c   :  { %936 = vmatpush.msrb.mxu3 %v3695_v12  ;;  %v4185_v12 = vld [vmem:[#allocation5] sm:$0xff] }
 0x25d   :  { %1009 = vmatpush.msrb.mxu0 %v4170_v19  ;;  %1029 = vmatpush.msra.mxu1 %v3732_v31 }
 0x25e   :  { %937 = vmatpush.msrb.mxu3 %v3703_v16  ;;  %v5806_v16 = vld [vmem:[#allocation8_spill] sm:$0xff] }
 0x25f   :  { %1010 = vmatpush.msrb.mxu0 %v4175_v26  ;;  %1030 = vmatpush.msra.mxu1 %v5775_v0  ;;  %v190_v30 = vadd.f32 %v5806_v16, %v5803_v35 }
 0x260   :  { %938 = vmatpush.msrb.mxu3 %v5776_v1 }
 0x261   :  { %1011 = vmatpush.msrb.mxu0 %v4180_v33  ;;  %1031 = vmatpush.msra.mxu1 %v5797_v11 }
 0x262   :  { %939 = vmatpush.msrb.mxu3 %v5798_v13 }
 0x263   :  { %1012 = vmatpush.msrb.mxu0 %v4185_v12  ;;  %1032 = vmatpush.msra.mxu1 %v5800_v17 }
 0x2c0   :  { %v695_v31 = vpop.f32.mrf.mxu0 }
 0x2c1   :  { %v741_v0 = vadd.f32 %v695_v31, %v190_v30  ;;  %v715_v47 = vpop.f32.mrf.mxu1 }
 0x2c2   :  { %v761_v31 = vadd.f32 %v3922_v36, %v715_v47 }
 0x2c3   :  { %v3022_v1 = vmul.f32 -1.442695, %v741_v0 }
 0x2c5   :  { %3098 = vpow2.f32 %v3022_v1 }
 0x2c6   :  { %v675_v54 = vpop.f32.mrf.mxu3 }
 0x2c7   :  { %v721_v11 = vadd.f32 %v675_v54, %v149_v57  ;;  %v5808_v57 = vld [vmem:[#allocation24_spill] sm:$0xff] }
 0x2c8   :  { %v231_v54 = vadd.f32 %v5808_v57, %v3925_v45 }
 0x2c9   :  { %v3021_v27 = vmul.f32 -1.442695, %v721_v11 }
 0x2cb   :  { %v3099_v13 = vpop.eup %3098  ;;  %3100 = vpow2.f32 %v3021_v27 }
 0x2cc   :  { %v745_v3 = vadd.f32 1.0, %v3099_v13 }
 0x2ce   :  { %3102 = vrcp.f32 %v745_v3  ;;  %v757_v11 = vand.u32 2147483648, %v745_v3  ;;  %vm751_vm14 = vweird.f32 %v745_v3  ;;  %v755_v13 = vand.u32 2147483647, %v745_v3 }
 0x2d0   :  { %vm756_vm0 = vcmp.eq.f32.partialorder %v755_v13, 8.507059e+37 }
 0x2d1   :  { %v3101_v8 = vpop.eup %3100 }
 0x2d2   :  { %v725_v41 = vadd.f32 1.0, %v3101_v8 }
 0x2d4   :  { %3104 = vrcp.f32 %v725_v41  ;;  %v3103_v17 = vpop.eup %3102  ;;  %v737_v32 = vand.u32 2147483648, %v725_v41  ;;  %v735_v44 = vand.u32 2147483647, %v725_v41  ;;  %vm731_vm10 = vweird.f32 %v725_v41 }
 0x2d5   :  { %v747_v23 = vmul.f32 %v3103_v17, %v745_v3  ;;  %vm752_vm13 = vweird.f32 %v3103_v17 }
 0x2d6   :  { %v738_v30 = vor.u32 1.1754944e-38, %v737_v32  ;;  %vm736_vm12 = vcmp.eq.f32.partialorder %v735_v44, 8.507059e+37  ;;  %vm753_vm15 = vmor %vm751_vm14, %vm752_vm13 }
 0x2d7   :  { %v748_v28 = vsub.f32 1.0, %v747_v23 }
 0x2d9   :  { %v749_v46 = vmul.f32 %v3103_v17, %v748_v28 }
 0x2da   :  { %v3105_v15 = vpop.eup %3104 }
 0x2db   :  { %v727_v24 = vmul.f32 %v3105_v15, %v725_v41  ;;  %vm732_vm9 = vweird.f32 %v3105_v15  ;;  %v750_v1 = vadd.f32 %v3103_v17, %v749_v46  ;;  %v758_v41 = vor.u32 1.1754944e-38, %v757_v11 }
 0x2dc   :  { %vm733_vm11 = vmor %vm731_vm10, %vm732_vm9 }
 0x2dd   :  { %v728_v39 = vsub.f32 1.0, %v727_v24  ;;  %v754_v23 = vsel %vm753_vm15, %v3103_v17, %v750_v1 }
 0x2de   :  { %v759_v24 = vsel %vm756_vm0, %v758_v41, %v754_v23 }
 0x2df   :  { %v729_v43 = vmul.f32 %v3105_v15, %v728_v39  ;;  %v765_v28 = vsub.f32 1.0, %v759_v24  ;;  %v767_v39 = vmul.f32 %v759_v24, %v4084_v50 }
 0x2e1   :  { %v730_v16 = vadd.f32 %v3105_v15, %v729_v43 }
 0x2e3   :  { %v734_v0 = vsel %vm733_vm11, %v3105_v15, %v730_v16 }
 0x2e4   :  { %v739_v37 = vsel %vm736_vm12, %v738_v30, %v734_v0 }
 0x2e5   :  { %v762_v27 = vmul.f32 %v761_v31, %v739_v37 }
 0x2e7   :  { %v763_v8 = vadd.f32 %v762_v27, %v231_v54 }
 0x2e9   :  { %3106 = vtanh.f32 %v763_v8 }
 0x2ef   :  { %v3107_v15 = vpop.eup %3106 }
 0x2f0   :  { %v766_v32 = vmul.f32 %v3107_v15, %v765_v28 }
 0x2f2   :  { %v4197_v43 = vadd.f32 %v767_v39, %v766_v32 }
 0x2f4   :  { %787 = vmatmul.f32.vlgmr.msrb.gmra.mxu2 %v4197_v43  ;;  %807 = vmatmul.f32.vlgmr.msra.gmra.mxu3 %v4197_v43 }
 0x2f5   :  { %827 = vmatmul.f32.vlgmr.msra.gmra.mxu0 %v4197_v43  ;;  %1037 = vmatpush.msrb.mxu2 %v4089_v52 }
 0x2f6   :  { %1130 = vmatpush.msra.mxu0 %v4093_v55  ;;  %1110 = vmatpush.msra.mxu3 %v4017_v48  ;;  %v3296_v48 = vld [vmem:[#allocation5 + $0x110] sm:$0xff]  ;;  %v3302_v55 = vld [vmem:[#allocation5 + $0x80] sm:$0xff] }
 0x2f7   :  { %1038 = vmatpush.msrb.mxu2 %v4096_v56 }
 0x2f8   :  { %1131 = vmatpush.msra.mxu0 %v4100_v59  ;;  %1111 = vmatpush.msra.mxu3 %v4022_v4  ;;  %v3297_v4 = vld [vmem:[#allocation5 + $0xf8] sm:$0xff]  ;;  %v3303_v59 = vld [vmem:[#allocation5 + $0x68] sm:$0xff] }
 0x2f9   :  { %1039 = vmatpush.msrb.mxu2 %v4103_v62 }
 0x2fa   :  { %1132 = vmatpush.msra.mxu0 %v4107_v6  ;;  %1112 = vmatpush.msra.mxu3 %v4027_v7  ;;  %v3298_v7 = vld [vmem:[#allocation5 + $0xe0] sm:$0xff]  ;;  %v4230_v6 = vld [vmem:[#allocation5 + $0x58] sm:$0xff] }
 0x2fb   :  { %1040 = vmatpush.msrb.mxu2 %v4110_v2 }
 0x2fc   :  { %1133 = vmatpush.msra.mxu0 %v4114_v9  ;;  %1113 = vmatpush.msra.mxu3 %v4032_v22  ;;  %v3299_v22 = vld [vmem:[#allocation5 + $0xc8] sm:$0xff]  ;;  %v3305_v9 = vld [vmem:[#allocation5 + $0x50] sm:$0xff] }
 0x2fd   :  { %1041 = vmatpush.msrb.mxu2 %v4117_v38 }
 0x2fe   :  { %1134 = vmatpush.msra.mxu0 %v3296_v48  ;;  %1114 = vmatpush.msra.mxu3 %v4037_v25  ;;  %v3300_v25 = vld [vmem:[#allocation5 + $0xb0] sm:$0xff] }
 0x2ff   :  { %1042 = vmatpush.msrb.mxu2 %v4122_v18 }
 0x300   :  { %1135 = vmatpush.msra.mxu0 %v3297_v4  ;;  %1115 = vmatpush.msra.mxu3 %v4042_v29  ;;  %v3301_v29 = vld [vmem:[#allocation5 + $0x98] sm:$0xff] }
 0x301   :  { %1043 = vmatpush.msrb.mxu2 %v4127_v42 }
 0x302   :  { %1136 = vmatpush.msra.mxu0 %v3298_v7  ;;  %1116 = vmatpush.msra.mxu3 %v4130_v20  ;;  %v4234_v20 = vld [vmem:[#allocation5 + $0x40] sm:$0xff] }
 0x303   :  { %1044 = vmatpush.msrb.mxu2 %v4134_v63 }
 0x304   :  { %1137 = vmatpush.msra.mxu0 %v3299_v22  ;;  %1117 = vmatpush.msra.mxu3 %v4137_v58  ;;  %v3307_v58 = vld [vmem:[#allocation5 + $0x38] sm:$0xff]  ;;  %v5811_v22 = vld [vmem:[#allocation26_spill] sm:$0xff] }
 0x305   :  { %1045 = vmatpush.msrb.mxu2 %v4141_v61 }
 0x306   :  { %1138 = vmatpush.msra.mxu0 %v3300_v25  ;;  %1118 = vmatpush.msra.mxu3 %v4144_v34  ;;  %v4238_v34 = vld [vmem:[#allocation5 + $0x28] sm:$0xff]  ;;  %v234_v25 = vadd.f32 %v5811_v22, %v3925_v45  ;;  %v4330_v22 = vld [vmem:[%s5710_s5] ss:$0 sm:$0xff] }
 0x307   :  { %1046 = vmatpush.msrb.mxu2 %v4148_v5 }
 0x308   :  { %1139 = vmatpush.msra.mxu0 %v3301_v29  ;;  %1119 = vmatpush.msra.mxu3 %v4151_v49  ;;  %v3309_v49 = vld [vmem:[#allocation5 + $0x20] sm:$0xff] }
 0x309   :  { %1047 = vmatpush.msrb.mxu2 %v4155_v10 }
 0x30a   :  { %1140 = vmatpush.msra.mxu0 %v3302_v55  ;;  %1120 = vmatpush.msra.mxu3 %v4158_v53  ;;  %v4242_v53 = vld [vmem:[#allocation5 + $0x10] sm:$0xff] }
 0x30b   :  { %1048 = vmatpush.msrb.mxu2 %v4162_v14 }
 0x30c   :  { %1141 = vmatpush.msra.mxu0 %v3303_v59  ;;  %1121 = vmatpush.msra.mxu3 %v4165_v51  ;;  %v3311_v51 = vld [vmem:[#allocation5 + $0x8] sm:$0xff] }
 0x30d   :  { %1049 = vmatpush.msrb.mxu2 %v4230_v6 }
 0x30e   :  { %1142 = vmatpush.msra.mxu0 %v3305_v9  ;;  %1122 = vmatpush.msra.mxu3 %v4170_v19  ;;  %v5809_v19 = vld [vmem:[#allocation15_spill] sm:$0xff] }
 0x30f   :  { %1050 = vmatpush.msrb.mxu2 %v4234_v20  ;;  %v152_v3 = vadd.f32 %v5809_v19, %v5801_v21 }
 0x310   :  { %1143 = vmatpush.msra.mxu0 %v3307_v58  ;;  %1123 = vmatpush.msra.mxu3 %v4175_v26  ;;  %v5810_v26 = vld [vmem:[#allocation25_spill] sm:$0xff] }
 0x311   :  { %1051 = vmatpush.msrb.mxu2 %v4238_v34  ;;  %v193_v17 = vadd.f32 %v5810_v26, %v5803_v35 }
 0x312   :  { %1144 = vmatpush.msra.mxu0 %v3309_v49  ;;  %1124 = vmatpush.msra.mxu3 %v4180_v33 }
 0x313   :  { %1052 = vmatpush.msrb.mxu2 %v4242_v53 }
 0x314   :  { %1145 = vmatpush.msra.mxu0 %v3311_v51  ;;  %1125 = vmatpush.msra.mxu3 %v4185_v12 }
 0x372   :  { %v828_v24 = vpop.f32.mrf.mxu0 }
 0x373   :  { %v874_v32 = vadd.f32 %v3922_v36, %v828_v24 }
 0x377   :  { %v788_v44 = vpop.f32.mrf.mxu2  ;;  %v808_v46 = vpop.f32.mrf.mxu3 }
 0x378   :  { %v834_v47 = vadd.f32 %v788_v44, %v152_v3  ;;  %v854_v16 = vadd.f32 %v808_v46, %v193_v17  ;;  %v1260_v46 = vld [vmem:[%s5707_s2 + $0xa8] sm:$0xff] }
 0x37a   :  { %v3023_v30 = vmul.f32 -1.442695, %v834_v47  ;;  %v3024_v33 = vmul.f32 -1.442695, %v854_v16  ;;  %v1257_v16 = vld [vmem:[%s5707_s2 + $0x90] sm:$0xff] }
 0x37c   :  { %3108 = vpow2.f32 %v3023_v30 }
 0x37d   :  { %3110 = vpow2.f32 %v3024_v33  ;;  %v1254_v33 = vld [vmem:[%s5707_s2 + $0x78] sm:$0xff] }
 0x382   :  { %v3109_v31 = vpop.eup %3108 }
 0x383   :  { %v3111_v0 = vpop.eup %3110  ;;  %v838_v1 = vadd.f32 1.0, %v3109_v31 }
 0x384   :  { %v858_v37 = vadd.f32 1.0, %v3111_v0  ;;  %v1251_v0 = vld [vmem:[%s5707_s2 + $0x60] sm:$0xff] }
 0x385   :  { %3112 = vrcp.f32 %v838_v1  ;;  %v850_v13 = vand.u32 2147483648, %v838_v1  ;;  %v848_v41 = vand.u32 2147483647, %v838_v1  ;;  %vm844_vm2 = vweird.f32 %v838_v1 }
 0x386   :  { %3114 = vrcp.f32 %v858_v37  ;;  %v870_v55 = vand.u32 2147483648, %v858_v37  ;;  %vm864_vm6 = vweird.f32 %v858_v37  ;;  %v868_v59 = vand.u32 2147483647, %v858_v37 }
 0x387   :  { %v851_v39 = vor.u32 1.1754944e-38, %v850_v13  ;;  %vm849_vm4 = vcmp.eq.f32.partialorder %v848_v41, 8.507059e+37 }
 0x388   :  { %v871_v49 = vor.u32 1.1754944e-38, %v870_v55  ;;  %vm869_vm8 = vcmp.eq.f32.partialorder %v868_v59, 8.507059e+37 }
 0x38b   :  { %v3113_v12 = vpop.eup %3112 }
 0x38c   :  { %v3115_v57 = vpop.eup %3114  ;;  %v840_v54 = vmul.f32 %v3113_v12, %v838_v1  ;;  %vm845_vm1 = vweird.f32 %v3113_v12  ;;  %v1248_v1 = vld [vmem:[%s5707_s2 + $0x48] sm:$0xff] }
 0x38d   :  { %v860_v11 = vmul.f32 %v3115_v57, %v858_v37  ;;  %vm846_vm3 = vmor %vm844_vm2, %vm845_vm1  ;;  %vm865_vm5 = vweird.f32 %v3115_v57  ;;  %v1245_v37 = vld [vmem:[%s5707_s2 + $0x30] sm:$0xff] }
 0x38e   :  { %v841_v27 = vsub.f32 1.0, %v840_v54  ;;  %vm866_vm7 = vmor %vm864_vm6, %vm865_vm5 }
 0x38f   :  { %v861_v8 = vsub.f32 1.0, %v860_v11  ;;  %v1239_v11 = vld [vmem:[%s5707_s2] sm:$0xff] }
 0x390   :  { %v842_v23 = vmul.f32 %v3113_v12, %v841_v27 }
 0x391   :  { %v862_v28 = vmul.f32 %v3115_v57, %v861_v8 }
 0x392   :  { %v843_v15 = vadd.f32 %v3113_v12, %v842_v23 }
 0x393   :  { %v863_v7 = vadd.f32 %v3115_v57, %v862_v28 }
 0x394   :  { %v847_v48 = vsel %vm846_vm3, %v3113_v12, %v843_v15 }
 0x395   :  { %v852_v4 = vsel %vm849_vm4, %v851_v39, %v847_v48  ;;  %v867_v58 = vsel %vm866_vm7, %v3115_v57, %v863_v7  ;;  %v1242_v57 = vld [vmem:[%s5707_s2 + $0x18] sm:$0xff] }
 0x396   :  { %v875_v29 = vmul.f32 %v874_v32, %v852_v4  ;;  %v872_v51 = vsel %vm869_vm8, %v871_v49, %v867_v58 }
 0x397   :  { %v878_v36 = vsub.f32 1.0, %v872_v51  ;;  %v880_v26 = vmul.f32 %v872_v51, %v4197_v43 }
 0x398   :  { %v876_v9 = vadd.f32 %v875_v29, %v234_v25  ;;  %v5814_v29 = vld [vmem:[#allocation28_spill] sm:$0xff] }
 0x399   :  { %v237_v55 = vadd.f32 %v5814_v29, %v3925_v45 }
 0x39a   :  { %3116 = vtanh.f32 %v876_v9 }
 0x3a0   :  { %v3117_v19 = vpop.eup %3116 }
 0x3a1   :  { %v879_v3 = vmul.f32 %v3117_v19, %v878_v36 }
 0x3a3   :  { %v4254_v17 = vadd.f32 %v880_v26, %v879_v3 }
 0x3a5   :  { %900 = vmatmul.f32.vlgmr.msrb.gmra.mxu1 %v4254_v17  ;;  %920 = vmatmul.f32.vlgmr.msra.gmra.mxu2 %v4254_v17 }
 0x3a6   :  { %940 = vmatmul.f32.vlgmr.msrb.gmra.mxu3 %v4254_v17  ;;  %1150 = vmatpush.msrb.mxu1 %v4089_v52  ;;  %v1284_v52 = vld [vmem:[%s5707_s2 + $0x168] sm:$0xff] }
 0x3a7   :  { %1344 = vmatpush.msra.mxu2 %v1284_v52 }
 0x3a8   :  { %1151 = vmatpush.msrb.mxu1 %v4096_v56  ;;  %v1281_v56 = vld [vmem:[%s5707_s2 + $0x150] sm:$0xff] }
 0x3a9   :  { %1345 = vmatpush.msra.mxu2 %v1281_v56 }
 0x3aa   :  { %1152 = vmatpush.msrb.mxu1 %v4103_v62  ;;  %v1278_v62 = vld [vmem:[%s5707_s2 + $0x138] sm:$0xff] }
 0x3ab   :  { %1346 = vmatpush.msra.mxu2 %v1278_v62 }
 0x3ac   :  { %1153 = vmatpush.msrb.mxu1 %v4110_v2  ;;  %v1275_v2 = vld [vmem:[%s5707_s2 + $0x120] sm:$0xff] }
 0x3ad   :  { %1347 = vmatpush.msra.mxu2 %v1275_v2 }
 0x3ae   :  { %1154 = vmatpush.msrb.mxu1 %v4117_v38  ;;  %v5812_v38 = vld [vmem:[#allocation16_spill] sm:$0xff] }
 0x3b0   :  { %1155 = vmatpush.msrb.mxu1 %v4122_v18  ;;  %v155_v18 = vadd.f32 %v5812_v38, %v5801_v21 }
 0x3b2   :  { %1156 = vmatpush.msrb.mxu1 %v4127_v42  ;;  %v1272_v42 = vld [vmem:[%s5707_s2 + $0x108] sm:$0xff] }
 0x3b3   :  { %1348 = vmatpush.msra.mxu2 %v1272_v42  ;;  %v1285_v42 = vld [vmem:[%s5707_s2 + $0x170] sm:$0xff] }
 0x3b4   :  { %1157 = vmatpush.msrb.mxu1 %v4134_v63 }
 0x3b6   :  { %1158 = vmatpush.msrb.mxu1 %v4141_v61 }
 0x3b8   :  { %1159 = vmatpush.msrb.mxu1 %v4148_v5  ;;  %v1269_v5 = vld [vmem:[%s5707_s2 + $0xf0] sm:$0xff] }
 0x3b9   :  { %1349 = vmatpush.msra.mxu2 %v1269_v5  ;;  %v1276_v5 = vld [vmem:[%s5707_s2 + $0x128] sm:$0xff] }
 0x3ba   :  { %1160 = vmatpush.msrb.mxu1 %v4155_v10 }
 0x3bc   :  { %1161 = vmatpush.msrb.mxu1 %v4162_v14  ;;  %v1266_v14 = vld [vmem:[%s5707_s2 + $0xd8] sm:$0xff] }
 0x3bd   :  { %1350 = vmatpush.msra.mxu2 %v1266_v14 }
 0x3be   :  { %1162 = vmatpush.msrb.mxu1 %v4230_v6  ;;  %v5813_v6 = vld [vmem:[#allocation27_spill] sm:$0xff] }
 0x3c0   :  { %1163 = vmatpush.msrb.mxu1 %v4234_v20  ;;  %v196_v20 = vadd.f32 %v5813_v6, %v5803_v35  ;;  %v5816_v6 = vld [vmem:[#allocation29_spill] sm:$0xff] }
 0x3c2   :  { %1164 = vmatpush.msrb.mxu1 %v4238_v34  ;;  %v1263_v34 = vld [vmem:[%s5707_s2 + $0xc0] sm:$0xff] }
 0x3c3   :  { %1351 = vmatpush.msra.mxu2 %v1263_v34  ;;  %v1273_v34 = vld [vmem:[%s5707_s2 + $0x110] sm:$0xff] }
 0x3c4   :  { %1165 = vmatpush.msrb.mxu1 %v4242_v53 }
 0x3c5   :  { %1352 = vmatpush.msra.mxu2 %v1260_v46 }
 0x3c7   :  { %1353 = vmatpush.msra.mxu2 %v1257_v16  ;;  %v1270_v16 = vld [vmem:[%s5707_s2 + $0xf8] sm:$0xff] }
 0x3c9   :  { %1354 = vmatpush.msra.mxu2 %v1254_v33 }
 0x3cb   :  { %1355 = vmatpush.msra.mxu2 %v1251_v0  ;;  %v1264_v0 = vld [vmem:[%s5707_s2 + $0xc8] sm:$0xff] }
 0x3cd   :  { %1356 = vmatpush.msra.mxu2 %v1248_v1  ;;  %v1261_v1 = vld [vmem:[%s5707_s2 + $0xb0] sm:$0xff] }
 0x3cf   :  { %1357 = vmatpush.msra.mxu2 %v1245_v37  ;;  %v1258_v37 = vld [vmem:[%s5707_s2 + $0x98] sm:$0xff] }
 0x3d1   :  { %1358 = vmatpush.msra.mxu2 %v1242_v57  ;;  %v1255_v57 = vld [vmem:[%s5707_s2 + $0x80] sm:$0xff] }
 0x3d3   :  { %1359 = vmatpush.msra.mxu2 %v1239_v11 }
 0x422   :  { %v901_v63 = vpop.f32.mrf.mxu1 }
 0x423   :  { %v947_v61 = vadd.f32 %v901_v63, %v155_v18  ;;  %v1282_v63 = vld [vmem:[%s5707_s2 + $0x158] sm:$0xff] }
 0x425   :  { %v3025_v10 = vmul.f32 -1.442695, %v947_v61  ;;  %v1279_v61 = vld [vmem:[%s5707_s2 + $0x140] sm:$0xff] }
 0x427   :  { %3118 = vpow2.f32 %v3025_v10  ;;  %v5815_v10 = vld [vmem:[#allocation18_spill] sm:$0xff] }
 0x428   :  { %v921_v53 = vpop.f32.mrf.mxu2  ;;  %v158_v14 = vadd.f32 %v5815_v10, %v5801_v21 }
 0x429   :  { %v967_v44 = vadd.f32 %v921_v53, %v196_v20  ;;  %v941_v15 = vpop.f32.mrf.mxu3  ;;  %v199_v20 = vadd.f32 %v5816_v6, %v5803_v35 }
 0x42a   :  { %v987_v25 = vadd.f32 %v4330_v22, %v941_v15 }
 0x42b   :  { %v3026_v47 = vmul.f32 -1.442695, %v967_v44 }
 0x42d   :  { %v3119_v30 = vpop.eup %3118  ;;  %3120 = vpow2.f32 %v3026_v47 }
 0x42e   :  { %v951_v31 = vadd.f32 1.0, %v3119_v30 }
 0x430   :  { %3122 = vrcp.f32 %v951_v31  ;;  %v963_v23 = vand.u32 2147483648, %v951_v31  ;;  %v961_v24 = vand.u32 2147483647, %v951_v31  ;;  %vm957_vm10 = vweird.f32 %v951_v31 }
 0x432   :  { %v964_v48 = vor.u32 1.1754944e-38, %v963_v23  ;;  %vm962_vm12 = vcmp.eq.f32.partialorder %v961_v24, 8.507059e+37  ;;  %v1246_v23 = vld [vmem:[%s5707_s2 + $0x38] sm:$0xff]  ;;  %v1240_v24 = vld [vmem:[%s5707_s2 + $0x8] sm:$0xff] }
 0x433   :  { %v3121_v12 = vpop.eup %3120 }
 0x434   :  { %v971_v54 = vadd.f32 1.0, %v3121_v12 }
 0x436   :  { %v3123_v27 = vpop.eup %3122  ;;  %3124 = vrcp.f32 %v971_v54  ;;  %v983_v58 = vand.u32 2147483648, %v971_v54  ;;  %v981_v51 = vand.u32 2147483647, %v971_v54  ;;  %vm977_vm14 = vweird.f32 %v971_v54 }
 0x437   :  { %v953_v13 = vmul.f32 %v3123_v27, %v951_v31  ;;  %vm958_vm9 = vweird.f32 %v3123_v27  ;;  %v1267_v31 = vld [vmem:[%s5707_s2 + $0xe0] sm:$0xff] }
 0x438   :  { %vm959_vm11 = vmor %vm957_vm10, %vm958_vm9  ;;  %v984_v3 = vor.u32 1.1754944e-38, %v983_v58  ;;  %vm982_vm0 = vcmp.eq.f32.partialorder %v981_v51, 8.507059e+37 }
 0x439   :  { %v954_v8 = vsub.f32 1.0, %v953_v13 }
 0x43b   :  { %v955_v41 = vmul.f32 %v3123_v27, %v954_v8  ;;  %v1249_v8 = vld [vmem:[%s5707_s2 + $0x50] sm:$0xff] }
 0x43c   :  { %v3125_v28 = vpop.eup %3124 }
 0x43d   :  { %v973_v39 = vmul.f32 %v3125_v28, %v971_v54  ;;  %v956_v32 = vadd.f32 %v3123_v27, %v955_v41  ;;  %vm978_vm13 = vweird.f32 %v3125_v28  ;;  %v1243_v41 = vld [vmem:[%s5707_s2 + $0x20] sm:$0xff] }
 0x43e   :  { %vm979_vm15 = vmor %vm977_vm14, %vm978_vm13 }
 0x43f   :  { %v974_v4 = vsub.f32 1.0, %v973_v39  ;;  %v960_v7 = vsel %vm959_vm11, %v3123_v27, %v956_v32  ;;  %v1252_v27 = vld [vmem:[%s5707_s2 + $0x68] sm:$0xff] }
 0x440   :  { %v965_v59 = vsel %vm962_vm12, %v964_v48, %v960_v7 }
 0x441   :  { %v975_v9 = vmul.f32 %v3125_v28, %v974_v4  ;;  %v988_v49 = vmul.f32 %v987_v25, %v965_v59 }
 0x443   :  { %v976_v36 = vadd.f32 %v3125_v28, %v975_v9  ;;  %v989_v19 = vadd.f32 %v988_v49, %v237_v55 }
 0x445   :  { %v980_v26 = vsel %vm979_vm15, %v3125_v28, %v976_v36  ;;  %3126 = vtanh.f32 %v989_v19 }
 0x446   :  { %v985_v52 = vsel %vm982_vm0, %v984_v3, %v980_v26  ;;  %v5817_v3 = vld [vmem:[#allocation30_spill] sm:$0xff] }
 0x447   :  { %v991_v56 = vsub.f32 1.0, %v985_v52  ;;  %v993_v38 = vmul.f32 %v985_v52, %v4254_v17  ;;  %v240_v26 = vadd.f32 %v5817_v3, %v3925_v45  ;;  %v4519_v3 = vld [vmem:[#allocation5 + $0x240] sm:$0xff] }
 0x44b   :  { %v3127_v62 = vpop.eup %3126 }
 0x44c   :  { %v992_v2 = vmul.f32 %v3127_v62, %v991_v56 }
 0x44e   :  { %v4336_v18 = vadd.f32 %v993_v38, %v992_v2 }
 0x450   :  { %1013 = vmatmul.f32.vlgmr.msrb.gmra.mxu0 %v4336_v18  ;;  %1033 = vmatmul.f32.vlgmr.msra.gmra.mxu1 %v4336_v18 }
 0x451   :  { %1053 = vmatmul.f32.vlgmr.msrb.gmra.mxu2 %v4336_v18  ;;  %1426 = vmatpush.msrb.mxu0 %v1285_v42 }
 0x453   :  { %1427 = vmatpush.msrb.mxu0 %v1282_v63 }
 0x455   :  { %1428 = vmatpush.msrb.mxu0 %v1279_v61 }
 0x457   :  { %1429 = vmatpush.msrb.mxu0 %v1276_v5 }
 0x459   :  { %1360 = vmatmul.f32.vlgmr.msra.gmra.mxu2 %v3928_v40  ;;  %1430 = vmatpush.msrb.mxu0 %v1273_v34  ;;  %v1333_v34 = vld [vmem:[%s5707_s2 + $0x2f0] sm:$0xff] }
 0x45a   :  { %1467 = vmatpush.msra.mxu1 %v1333_v34  ;;  %v1262_v34 = vld [vmem:[%s5707_s2 + $0xb8] sm:$0xff] }
 0x45b   :  { %1431 = vmatpush.msrb.mxu0 %v1270_v16  ;;  %v4434_v16 = vld [vmem:[#allocation5 + $0x2e8] sm:$0xff] }
 0x45d   :  { %1432 = vmatpush.msrb.mxu0 %v1267_v31  ;;  %v4443_v31 = vld [vmem:[#allocation5 + $0x2d0] sm:$0xff] }
 0x45f   :  { %1433 = vmatpush.msrb.mxu0 %v1264_v0  ;;  %v1320_v0 = vld [vmem:[%s5707_s2 + $0x288] sm:$0xff] }
 0x461   :  { %1363 = vmatmul.f32.gmra.mxu2 %v4011_v60  ;;  %1434 = vmatpush.msrb.mxu0 %v1261_v1  ;;  %v1321_v1 = vld [vmem:[%s5707_s2 + $0x290] sm:$0xff] }
 0x463   :  { %1435 = vmatpush.msrb.mxu0 %v1258_v37  ;;  %v1286_v37 = vld [vmem:[%s5707_s2 + $0x178] sm:$0xff] }
 0x464   :  { %1508 = vmatpush.msrb.mxu2 %v1286_v37  ;;  %v1256_v37 = vld [vmem:[%s5707_s2 + $0x88] sm:$0xff] }
 0x465   :  { %1436 = vmatpush.msrb.mxu0 %v1255_v57  ;;  %v5818_v57 = vld [vmem:[#allocation31_spill] sm:$0xff] }
 0x467   :  { %1437 = vmatpush.msrb.mxu0 %v1252_v27  ;;  %v1318_v27 = vld [vmem:[%s5707_s2 + $0x278] sm:$0xff] }
 0x469   :  { %1366 = vmatmul.f32.gmra.mxu2 %v4084_v50  ;;  %1438 = vmatpush.msrb.mxu0 %v1249_v8 }
 0x46b   :  { %1439 = vmatpush.msrb.mxu0 %v1246_v23  ;;  %v4469_v23 = vld [vmem:[#allocation5 + $0x2a0] sm:$0xff] }
 0x46d   :  { %1440 = vmatpush.msrb.mxu0 %v1243_v41  ;;  %v1314_v41 = vld [vmem:[%s5707_s2 + $0x258] sm:$0xff] }
 0x46f   :  { %1441 = vmatpush.msrb.mxu0 %v1240_v24  ;;  %v1315_v24 = vld [vmem:[%s5707_s2 + $0x260] sm:$0xff] }
 0x471   :  { %1369 = vmatmul.f32.gmra.mxu2 %v4197_v43 }
 0x479   :  { %1372 = vmatmul.f32.gmra.mxu2 %v4254_v17 }
 0x481   :  { %1375 = vmatmul.f32.gmra.mxu2 %v4336_v18 }
 0x4cd   :  { %v1014_v53 = vpop.f32.mrf.mxu0  ;;  %v1034_v44 = vpop.f32.mrf.mxu1 }
 0x4ce   :  { %v1060_v46 = vadd.f32 %v1014_v53, %v158_v14  ;;  %v1080_v47 = vadd.f32 %v1034_v44, %v199_v20  ;;  %v1332_v20 = vld [vmem:[%s5707_s2 + $0x2e8] sm:$0xff]  ;;  %v1329_v53 = vld [vmem:[%s5707_s2 + $0x2d0] sm:$0xff]  ;;  %v1330_v44 = vld [vmem:[%s5707_s2 + $0x2d8] sm:$0xff] }
 0x4cf   :  { %1385 = vmatpush.msrb.mxu3 %v1332_v20  ;;  %1468 = vmatpush.msra.mxu1 %v1330_v44  ;;  %v1297_v20 = vld [vmem:[%s5707_s2 + $0x1d0] sm:$0xff] }
 0x4d0   :  { %v3027_v30 = vmul.f32 -1.442695, %v1060_v46  ;;  %v3028_v33 = vmul.f32 -1.442695, %v1080_v47  ;;  %v1326_v46 = vld [vmem:[%s5707_s2 + $0x2b8] sm:$0xff]  ;;  %v1327_v47 = vld [vmem:[%s5707_s2 + $0x2c0] sm:$0xff] }
 0x4d1   :  { %1386 = vmatpush.msrb.mxu3 %v1329_v53  ;;  %1469 = vmatpush.msra.mxu1 %v1327_v47  ;;  %v4556_v53 = vld [vmem:[#allocation5 + $0x1f8] sm:$0xff]  ;;  %v1293_v44 = vld [vmem:[%s5707_s2 + $0x1b0] sm:$0xff]  ;;  %v1259_v47 = vld [vmem:[%s5707_s2 + $0xa0] sm:$0xff] }
 0x4d2   :  { %3128 = vpow2.f32 %v3027_v30  ;;  %v1323_v30 = vld [vmem:[%s5707_s2 + $0x2a0] sm:$0xff] }
 0x4d3   :  { %3130 = vpow2.f32 %v3028_v33  ;;  %1387 = vmatpush.msrb.mxu3 %v1326_v46  ;;  %v1324_v33 = vld [vmem:[%s5707_s2 + $0x2a8] sm:$0xff]  ;;  %v1294_v46 = vld [vmem:[%s5707_s2 + $0x1b8] sm:$0xff] }
 0x4d4   :  { %v1054_v59 = vpop.f32.mrf.mxu2  ;;  %1470 = vmatpush.msra.mxu1 %v1324_v33 }
 0x4d5   :  { %v1100_v51 = vadd.f32 %v4330_v22, %v1054_v59  ;;  %1388 = vmatpush.msrb.mxu3 %v1323_v30  ;;  %v1309_v59 = vld [vmem:[%s5707_s2 + $0x230] sm:$0xff]  ;;  %v4570_v30 = vld [vmem:[#allocation5 + $0x1e0] sm:$0xff] }
 0x4d6   :  { %1471 = vmatpush.msra.mxu1 %v1321_v1  ;;  %v1291_v1 = vld [vmem:[%s5707_s2 + $0x1a0] sm:$0xff] }
 0x4d7   :  { %1389 = vmatpush.msrb.mxu3 %v1320_v0  ;;  %v1290_v0 = vld [vmem:[%s5707_s2 + $0x198] sm:$0xff] }
 0x4d8   :  { %v3129_v12 = vpop.eup %3128  ;;  %1472 = vmatpush.msra.mxu1 %v1318_v27  ;;  %v1288_v27 = vld [vmem:[%s5707_s2 + $0x188] sm:$0xff] }
 0x4d9   :  { %v3131_v54 = vpop.eup %3130  ;;  %v1064_v11 = vadd.f32 1.0, %v3129_v12  ;;  %v4455_v12 = vld [vmem:[#allocation5 + $0x2b8] sm:$0xff] }
 0x4da   :  { %v1084_v13 = vadd.f32 1.0, %v3131_v54  ;;  %v202_v54 = vadd.f32 %v5818_v57, %v5803_v35  ;;  %1473 = vmatpush.msra.mxu1 %v1315_v24  ;;  %v1250_v24 = vld [vmem:[%s5707_s2 + $0x58] sm:$0xff] }
 0x4db   :  { %3132 = vrcp.f32 %v1064_v11  ;;  %v1076_v7 = vand.u32 2147483648, %v1064_v11  ;;  %v1074_v29 = vand.u32 2147483647, %v1064_v11  ;;  %vm1070_vm2 = vweird.f32 %v1064_v11 }
 0x4dc   :  { %3134 = vrcp.f32 %v1084_v13  ;;  %v1096_v52 = vand.u32 2147483648, %v1084_v13  ;;  %vm1090_vm6 = vweird.f32 %v1084_v13  ;;  %v1094_v62 = vand.u32 2147483647, %v1084_v13 }
 0x4dd   :  { %v1077_v58 = vor.u32 1.1754944e-38, %v1076_v7  ;;  %vm1075_vm4 = vcmp.eq.f32.partialorder %v1074_v29, 8.507059e+37  ;;  %v4493_v7 = vld [vmem:[#allocation5 + $0x270] sm:$0xff] }
 0x4de   :  { %v1097_v42 = vor.u32 1.1754944e-38, %v1096_v52  ;;  %vm1095_vm8 = vcmp.eq.f32.partialorder %v1094_v62, 8.507059e+37  ;;  %v1302_v52 = vld [vmem:[%s5707_s2 + $0x1f8] sm:$0xff]  ;;  %v1268_v62 = vld [vmem:[%s5707_s2 + $0xe8] sm:$0xff] }
 0x4e1   :  { %v3133_v28 = vpop.eup %3132 }
 0x4e2   :  { %v3135_v15 = vpop.eup %3134  ;;  %v1066_v39 = vmul.f32 %v3133_v28, %v1064_v11  ;;  %vm1071_vm1 = vweird.f32 %v3133_v28  ;;  %v1317_v11 = vld [vmem:[%s5707_s2 + $0x270] sm:$0xff] }
 0x4e3   :  { %v1086_v32 = vmul.f32 %v3135_v15, %v1084_v13  ;;  %vm1072_vm3 = vmor %vm1070_vm2, %vm1071_vm1  ;;  %vm1091_vm5 = vweird.f32 %v3135_v15  ;;  %v1283_v13 = vld [vmem:[%s5707_s2 + $0x160] sm:$0xff]  ;;  %1390 = vmatpush.msrb.mxu3 %v1317_v11 }
 0x4e4   :  { %v1067_v48 = vsub.f32 1.0, %v1066_v39  ;;  %vm1092_vm7 = vmor %vm1090_vm6, %vm1091_vm5  ;;  %1509 = vmatpush.msrb.mxu2 %v1283_v13  ;;  %v1287_v11 = vld [vmem:[%s5707_s2 + $0x180] sm:$0xff]  ;;  %v1253_v13 = vld [vmem:[%s5707_s2 + $0x70] sm:$0xff] }
 0x4e5   :  { %v1087_v4 = vsub.f32 1.0, %v1086_v32  ;;  %1391 = vmatpush.msrb.mxu3 %v1314_v41  ;;  %v1311_v32 = vld [vmem:[%s5707_s2 + $0x240] sm:$0xff]  ;;  %v4602_v41 = vld [vmem:[#allocation5 + $0x2f0] sm:$0xff] }
 0x4e6   :  { %v1068_v25 = vmul.f32 %v3133_v28, %v1067_v48  ;;  %v1312_v48 = vld [vmem:[%s5707_s2 + $0x248] sm:$0xff] }
 0x4e7   :  { %v1088_v55 = vmul.f32 %v3135_v15, %v1087_v4  ;;  %v1277_v4 = vld [vmem:[%s5707_s2 + $0x130] sm:$0xff]  ;;  %1392 = vmatpush.msrb.mxu3 %v1311_v32  ;;  %1474 = vmatpush.msra.mxu1 %v1312_v48  ;;  %v4616_v48 = vld [vmem:[#allocation5 + $0x180] sm:$0xff] }
 0x4e8   :  { %v1069_v9 = vadd.f32 %v3133_v28, %v1068_v25  ;;  %v5819_v25 = vld [vmem:[#allocation20_spill] sm:$0xff] }
 0x4e9   :  { %v1089_v36 = vadd.f32 %v3135_v15, %v1088_v55  ;;  %v161_v29 = vadd.f32 %v5819_v25, %v5801_v21  ;;  %v1308_v55 = vld [vmem:[%s5707_s2 + $0x228] sm:$0xff]  ;;  %1475 = vmatpush.msra.mxu1 %v1309_v59  ;;  %v4507_v21 = vld [vmem:[#allocation5 + $0x258] sm:$0xff]  ;;  %v1241_v59 = vld [vmem:[%s5707_s2 + $0x10] sm:$0xff] }
 0x4ea   :  { %v1073_v49 = vsel %vm1072_vm3, %v3133_v28, %v1069_v9  ;;  %v1280_v28 = vld [vmem:[%s5707_s2 + $0x148] sm:$0xff]  ;;  %v1274_v9 = vld [vmem:[%s5707_s2 + $0x118] sm:$0xff]  ;;  %1393 = vmatpush.msrb.mxu3 %v1308_v55 }
 0x4eb   :  { %v1078_v19 = vsel %vm1075_vm4, %v1077_v58, %v1073_v49  ;;  %v1093_v38 = vsel %vm1092_vm7, %v3135_v15, %v1089_v36  ;;  %v4481_v15 = vld [vmem:[#allocation5 + $0x288] sm:$0xff]  ;;  %1510 = vmatpush.msrb.mxu2 %v1280_v28  ;;  %v1306_v36 = vld [vmem:[%s5707_s2 + $0x218] sm:$0xff] }
 0x4ec   :  { %v1101_v56 = vmul.f32 %v1100_v51, %v1078_v19  ;;  %v1098_v63 = vsel %vm1095_vm8, %v1097_v42, %v1093_v38  ;;  %v1305_v51 = vld [vmem:[%s5707_s2 + $0x210] sm:$0xff]  ;;  %v1271_v19 = vld [vmem:[%s5707_s2 + $0x100] sm:$0xff]  ;;  %1476 = vmatpush.msra.mxu1 %v1306_v36  ;;  %v1300_v42 = vld [vmem:[%s5707_s2 + $0x1e8] sm:$0xff] }
 0x4ed   :  { %v1104_v61 = vsub.f32 1.0, %v1098_v63  ;;  %v1106_v14 = vmul.f32 %v1098_v63, %v4336_v18  ;;  %1511 = vmatpush.msrb.mxu2 %v1277_v4  ;;  %1394 = vmatpush.msrb.mxu3 %v1305_v51  ;;  %v1299_v38 = vld [vmem:[%s5707_s2 + $0x1e0] sm:$0xff]  ;;  %v4607_v28 = vld [vmem:[#allocation5 + $0x198] sm:$0xff]  ;;  %v1244_v25 = vld [vmem:[%s5707_s2 + $0x28] sm:$0xff] }
 0x4ee   :  { %v1102_v2 = vadd.f32 %v1101_v56, %v240_v26  ;;  %v1303_v56 = vld [vmem:[%s5707_s2 + $0x200] sm:$0xff]  ;;  %v4619_v4 = vld [vmem:[#allocation5 + $0x2d8] sm:$0xff] }
 0x4ef   :  { %1512 = vmatpush.msrb.mxu2 %v1274_v9  ;;  %1395 = vmatpush.msrb.mxu3 %v1302_v52  ;;  %v4631_v9 = vld [vmem:[#allocation5 + $0x2e0] sm:$0xff] }
 0x4f0   :  { %3136 = vtanh.f32 %v1102_v2  ;;  %1477 = vmatpush.msra.mxu1 %v1303_v56  ;;  %v4531_v2 = vld [vmem:[#allocation5 + $0x228] sm:$0xff]  ;;  %v4635_v36 = vld [vmem:[#allocation5 + $0x2c0] sm:$0xff] }
 0x4f1   :  { %1513 = vmatpush.msrb.mxu2 %v1271_v19  ;;  %1396 = vmatpush.msrb.mxu3 %v1299_v38  ;;  %v4637_v19 = vld [vmem:[#allocation5 + $0x2c8] sm:$0xff] }
 0x4f2   :  { %1478 = vmatpush.msra.mxu1 %v1300_v42  ;;  %v4644_v56 = vld [vmem:[#allocation5 + $0x2a8] sm:$0xff] }
 0x4f3   :  { %1514 = vmatpush.msrb.mxu2 %v1268_v62  ;;  %v1334_v62 = vld [vmem:[%s5707_s2 + $0x2f8] sm:$0xff] }
 0x4f4   :  { %1479 = vmatpush.msra.mxu1 %v1297_v20 }
 0x4f6   :  { %v3137_v5 = vpop.eup %3136  ;;  %1480 = vmatpush.msra.mxu1 %v1294_v46 }
 0x4f7   :  { %v1105_v10 = vmul.f32 %v3137_v5, %v1104_v61  ;;  %v1265_v61 = vld [vmem:[%s5707_s2 + $0xd0] sm:$0xff] }
 0x4f8   :  { %v4543_v5 = vld [vmem:[#allocation5 + $0x210] sm:$0xff]  ;;  %1515 = vmatpush.msrb.mxu2 %v1265_v61  ;;  %1481 = vmatpush.msra.mxu1 %v1291_v1  ;;  %v5820_v1 = vld [vmem:[#allocation32_spill] sm:$0xff] }
 0x4f9   :  { %v4403_v6 = vadd.f32 %v1106_v14, %v1105_v10  ;;  %v1296_v10 = vld [vmem:[%s5707_s2 + $0x1c8] sm:$0xff] }
 0x4fa   :  { %1397 = vmatpush.msrb.mxu3 %v1296_v10  ;;  %1516 = vmatpush.msrb.mxu2 %v1262_v34  ;;  %v4657_v34 = vld [vmem:[#allocation5 + $0x280] sm:$0xff] }
 0x4fb   :  { %1126 = vmatmul.f32.vlgmr.msra.gmra.mxu3 %v4403_v6  ;;  %1146 = vmatmul.f32.vlgmr.msra.gmra.mxu0 %v4403_v6 }
 0x4fc   :  { %1166 = vmatmul.f32.vlgmr.msrb.gmra.mxu1 %v4403_v6  ;;  %1378 = vmatmul.f32.gmra.mxu2 %v4403_v6 }
 0x4fd   :  { %1664 = vmatpush.msra.mxu0 %v4434_v16  ;;  %1398 = vmatpush.msrb.mxu3 %v1293_v44 }
 0x4fe   :  { %1517 = vmatpush.msrb.mxu2 %v1259_v47  ;;  %1482 = vmatpush.msra.mxu1 %v1288_v27  ;;  %v4669_v27 = vld [vmem:[#allocation5 + $0x290] sm:$0xff] }
 0x4ff   :  { %1665 = vmatpush.msra.mxu0 %v4443_v31  ;;  %1399 = vmatpush.msrb.mxu3 %v1290_v0 }
 0x500   :  { %1518 = vmatpush.msrb.mxu2 %v1256_v37  ;;  %1684 = vmatpush.msrb.mxu1 %v4602_v41  ;;  %v243_v37 = vadd.f32 %v5820_v1, %v3925_v45  ;;  %v4681_v45 = vld [vmem:[#allocation5 + $0x250] sm:$0xff] }
 0x501   :  { %1666 = vmatpush.msra.mxu0 %v4455_v12  ;;  %1400 = vmatpush.msrb.mxu3 %v1287_v11  ;;  %v4739_v1 = vld [vmem:[#allocation5 + $0x230] sm:$0xff] }
 0x502   :  { %1519 = vmatpush.msrb.mxu2 %v1253_v13  ;;  %1685 = vmatpush.msrb.mxu1 %v4619_v4  ;;  %v1331_v13 = vld [vmem:[%s5707_s2 + $0x2e0] sm:$0xff] }
 0x503   :  { %1442 = vmatmul.f32.vlgmr.msrb.gmra.mxu0 %v3928_v40  ;;  %1549 = vmatpush.msra.mxu3 %v1334_v62  ;;  %v1325_v62 = vld [vmem:[%s5707_s2 + $0x2b0] sm:$0xff] }
 0x504   :  { %1667 = vmatpush.msra.mxu0 %v4469_v23  ;;  %1520 = vmatpush.msrb.mxu2 %v1250_v24 }
 0x505   :  { %1686 = vmatpush.msrb.mxu1 %v4635_v36  ;;  %1550 = vmatpush.msra.mxu3 %v1331_v13  ;;  %v1316_v13 = vld [vmem:[%s5707_s2 + $0x268] sm:$0xff] }
 0x506   :  { %1668 = vmatpush.msra.mxu0 %v4481_v15 }
 0x507   :  { %1687 = vmatpush.msrb.mxu1 %v4644_v56 }
 0x508   :  { %1669 = vmatpush.msra.mxu0 %v4493_v7 }
 0x509   :  { %1688 = vmatpush.msrb.mxu1 %v4669_v27 }
 0x50a   :  { %1670 = vmatpush.msra.mxu0 %v4507_v21 }
 0x50b   :  { %1445 = vmatmul.f32.gmra.mxu0 %v4011_v60 }
 0x50c   :  { %1671 = vmatpush.msra.mxu0 %v4519_v3 }
 0x50e   :  { %1672 = vmatpush.msra.mxu0 %v4531_v2 }
 0x510   :  { %1673 = vmatpush.msra.mxu0 %v4543_v5 }
 0x512   :  { %1674 = vmatpush.msra.mxu0 %v4556_v53 }
 0x513   :  { %1448 = vmatmul.f32.gmra.mxu0 %v4084_v50 }
 0x514   :  { %1675 = vmatpush.msra.mxu0 %v4570_v30 }
 0x51b   :  { %1451 = vmatmul.f32.gmra.mxu0 %v4197_v43 }
 0x523   :  { %1454 = vmatmul.f32.gmra.mxu0 %v4254_v17 }
 0x52b   :  { %1457 = vmatmul.f32.gmra.mxu0 %v4336_v18 }
 0x533   :  { %1460 = vmatmul.f32.gmra.mxu0 %v4403_v6 }
 0x578   :  { %v1147_v8 = vpop.f32.mrf.mxu0 }
 0x579   :  { %v1193_v35 = vadd.f32 %v1147_v8, %v202_v54  ;;  %v4584_v54 = vld [vmem:[#allocation5 + $0x1c8] sm:$0xff]  ;;  %v4597_v8 = vld [vmem:[#allocation5 + $0x1b0] sm:$0xff]  ;;  %v1167_v10 = vpop.f32.mrf.mxu1 }
 0x57a   :  { %1676 = vmatpush.msra.mxu0 %v4584_v54  ;;  %v1213_v46 = vadd.f32 %v4330_v22, %v1167_v10  ;;  %v4671_v22 = vld [vmem:[#allocation5 + $0x268] sm:$0xff] }
 0x57b   :  { %v3030_v39 = vmul.f32 -1.442695, %v1193_v35 }
 0x57c   :  { %1677 = vmatpush.msra.mxu0 %v4597_v8 }
 0x57d   :  { %3138 = vpow2.f32 %v3030_v39  ;;  %v1247_v39 = vld [vmem:[%s5707_s2 + $0x40] sm:$0xff] }
 0x57e   :  { %v1127_v58 = vpop.f32.mrf.mxu3  ;;  %1678 = vmatpush.msra.mxu0 %v4607_v28  ;;  %1521 = vmatpush.msrb.mxu2 %v1247_v39  ;;  %v4683_v39 = vld [vmem:[#allocation5 + $0x278] sm:$0xff] }
 0x57f   :  { %v1173_v49 = vadd.f32 %v1127_v58, %v161_v29  ;;  %v4624_v29 = vld [vmem:[#allocation5 + $0x2f8] sm:$0xff]  ;;  %1689 = vmatpush.msrb.mxu1 %v4683_v39 }
 0x580   :  { %1679 = vmatpush.msra.mxu0 %v4616_v48  ;;  %1522 = vmatpush.msrb.mxu2 %v1244_v25 }
 0x581   :  { %v3029_v26 = vmul.f32 -1.442695, %v1173_v49 }
 0x582   :  { %1704 = vmatpush.msrb.mxu0 %v4624_v29  ;;  %1523 = vmatpush.msrb.mxu2 %v1241_v59 }
 0x583   :  { %v3139_v63 = vpop.eup %3138  ;;  %3140 = vpow2.f32 %v3029_v26  ;;  %v4639_v26 = vld [vmem:[#allocation5 + $0x2b0] sm:$0xff] }
 0x584   :  { %v4548_v14 = vadd.f32 1.0, %v3139_v63  ;;  %1705 = vmatpush.msrb.mxu0 %v4631_v9  ;;  %v4650_v63 = vld [vmem:[#allocation5 + $0x298] sm:$0xff]  ;;  %1798 = vmatpush.msra.mxu2 %v4602_v41 }
 0x586   :  { %3142 = vrcp.f32 %v4548_v14  ;;  %1706 = vmatpush.msrb.mxu0 %v4637_v19  ;;  %1799 = vmatpush.msra.mxu2 %v4619_v4  ;;  %vm1203_vm14 = vweird.f32 %v4548_v14  ;;  %v1207_v24 = vand.u32 2147483647, %v4548_v14 }
 0x588   :  { %1707 = vmatpush.msrb.mxu0 %v4639_v26  ;;  %1800 = vmatpush.msra.mxu2 %v4635_v36  ;;  %vm1208_vm0 = vcmp.eq.f32.partialorder %v1207_v24, 8.507059e+37  ;;  %v4753_v24 = vld [vmem:[#allocation5 + $0x190] sm:$0xff] }
 0x589   :  { %v3141_v33 = vpop.eup %3140 }
 0x58a   :  { %v4582_v57 = vadd.f32 1.0, %v3141_v33  ;;  %1708 = vmatpush.msrb.mxu0 %v4650_v63  ;;  %1801 = vmatpush.msra.mxu2 %v4644_v56 }
 0x58c   :  { %3144 = vrcp.f32 %v4582_v57  ;;  %v4599_v35 = vpop.eup %3142  ;;  %v1189_v52 = vand.u32 2147483648, %v4582_v57  ;;  %v1187_v42 = vand.u32 2147483647, %v4582_v57  ;;  %vm1183_vm10 = vweird.f32 %v4582_v57  ;;  %1709 = vmatpush.msrb.mxu0 %v4657_v34  ;;  %1802 = vmatpush.msra.mxu2 %v4669_v27 }
 0x58d   :  { %v1199_v32 = vmul.f32 %v4599_v35, %v4548_v14  ;;  %vm1204_vm13 = vweird.f32 %v4599_v35 }
 0x58e   :  { %v1190_v44 = vor.u32 1.1754944e-38, %v1189_v52  ;;  %vm1188_vm12 = vcmp.eq.f32.partialorder %v1187_v42, 8.507059e+37  ;;  %1710 = vmatpush.msrb.mxu0 %v4671_v22  ;;  %vm4687_vm15 = vmor %vm1203_vm14, %vm1204_vm13  ;;  %1803 = vmatpush.msra.mxu2 %v4683_v39  ;;  %v4707_v52 = vld [vmem:[#allocation5 + $0x260] sm:$0xff]  ;;  %v4716_v42 = vld [vmem:[#allocation5 + $0x1f0] sm:$0xff] }
 0x58f   :  { %v1200_v49 = vsub.f32 1.0, %v1199_v32  ;;  %1690 = vmatpush.msrb.mxu1 %v4707_v52  ;;  %v5823_v32 = vmov 0.0  }
 0x590   :  { %1711 = vmatpush.msrb.mxu0 %v4681_v45  ;;  %1804 = vmatpush.msra.mxu2 %v4707_v52 }
 0x591   :  { %v1201_v61 = vmul.f32 %v4599_v35, %v1200_v49  ;;  %v4702_v49 = vld [vmem:[#allocation5 + $0x220] sm:$0xff] }
 0x592   :  { %v3145_v55 = vpop.eup %3144 }
 0x593   :  { %v1179_v58 = vmul.f32 %v3145_v55, %v4582_v57  ;;  %vm1184_vm9 = vweird.f32 %v3145_v55  ;;  %v1202_v33 = vadd.f32 %v4599_v35, %v1201_v61  ;;  %v1209_v57 = vand.u32 2147483648, %v4548_v14  ;;  %v1328_v14 = vld [vmem:[%s5707_s2 + $0x2c8] sm:$0xff] }
 0x594   :  { %vm1185_vm11 = vmor %vm1183_vm10, %vm1184_vm9  ;;  %1551 = vmatpush.msra.mxu3 %v1328_v14  ;;  %v4718_v61 = vld [vmem:[#allocation5 + $0x248] sm:$0xff]  ;;  %v1313_v14 = vld [vmem:[%s5707_s2 + $0x250] sm:$0xff] }
 0x595   :  { %v1180_v51 = vsub.f32 1.0, %v1179_v58  ;;  %v1206_v59 = vsel %vm4687_vm15, %v4599_v35, %v1202_v33  ;;  %v1210_v58 = vor.u32 1.1754944e-38, %v1209_v57  ;;  %v4709_v35 = vld [vmem:[#allocation5 + $0x208] sm:$0xff]  ;;  %1691 = vmatpush.msrb.mxu1 %v4718_v61  ;;  %1805 = vmatpush.msra.mxu2 %v4718_v61  ;;  %v1319_v57 = vld [vmem:[%s5707_s2 + $0x280] sm:$0xff] }
 0x596   :  { %1552 = vmatpush.msra.mxu3 %v1325_v62  ;;  %v1307_v62 = vld [vmem:[%s5707_s2 + $0x220] sm:$0xff] }
 0x597   :  { %v1181_v38 = vmul.f32 %v3145_v55, %v1180_v51  ;;  %v1211_v51 = vsel %vm1208_vm0, %v1210_v58, %v1206_v59  ;;  %1692 = vmatpush.msrb.mxu1 %v4739_v1  ;;  %1806 = vmatpush.msra.mxu2 %v4739_v1  ;;  %v4769_v59 = vld [vmem:[#allocation5 + $0x1e8] sm:$0xff]  ;;  %v1310_v58 = vld [vmem:[%s5707_s2 + $0x238] sm:$0xff] }
 0x599   :  { %v1182_v20 = vadd.f32 %v3145_v55, %v1181_v38  ;;  %v1217_v38 = vsub.f32 1.0, %v1211_v51 }
 0x59b   :  { %v1186_v47 = vsel %vm1185_vm11, %v3145_v55, %v1182_v20  ;;  %v4691_v55 = vld [vmem:[#allocation5 + $0x238] sm:$0xff] }
 0x59c   :  { %v1191_v0 = vsel %vm1188_vm12, %v1190_v44, %v1186_v47  ;;  %1712 = vmatpush.msrb.mxu0 %v4691_v55  ;;  %v4720_v20 = vld [vmem:[#allocation5 + $0x1d8] sm:$0xff]  ;;  %v1219_v47 = vmul.f32 %v1211_v51, %v4403_v6  ;;  %v4785_v51 = vld [vmem:[#allocation5 + $0x1d0] sm:$0xff] }
 0x59d   :  { %v1214_v11 = vmul.f32 %v1213_v46, %v1191_v0  ;;  %v1322_v44 = vld [vmem:[%s5707_s2 + $0x298] sm:$0xff]  ;;  %v4733_v0 = vld [vmem:[#allocation5 + $0x1c0] sm:$0xff] }
 0x59e   :  { %1713 = vmatpush.msrb.mxu0 %v4702_v49  ;;  %1553 = vmatpush.msra.mxu3 %v1322_v44  ;;  %v1301_v44 = vld [vmem:[%s5707_s2 + $0x1f0] sm:$0xff] }
 0x59f   :  { %v1215_v25 = vadd.f32 %v1214_v11, %v243_v37  ;;  %v4741_v37 = vld [vmem:[#allocation5 + $0x1a8] sm:$0xff]  ;;  %v4748_v11 = vld [vmem:[#allocation5 + $0x218] sm:$0xff] }
 0x5a0   :  { %1714 = vmatpush.msrb.mxu0 %v4709_v35  ;;  %1554 = vmatpush.msra.mxu3 %v1319_v57  ;;  %v1295_v57 = vld [vmem:[%s5707_s2 + $0x1c0] sm:$0xff] }
 0x5a1   :  { %3146 = vtanh.f32 %v1215_v25  ;;  %1693 = vmatpush.msrb.mxu1 %v4748_v11  ;;  %1807 = vmatpush.msra.mxu2 %v4748_v11  ;;  %v4764_v25 = vld [vmem:[#allocation5 + $0x200] sm:$0xff] }
 0x5a2   :  { %1715 = vmatpush.msrb.mxu0 %v4716_v42  ;;  %1555 = vmatpush.msra.mxu3 %v1316_v13  ;;  %v4818_v13 = vld [vmem:[#allocation5 + $0x188] sm:$0xff] }
 0x5a3   :  { %1694 = vmatpush.msrb.mxu1 %v4764_v25  ;;  %1808 = vmatpush.msra.mxu2 %v4764_v25  ;;  %5824 = vst [vmem:[#allocation19_spill] sm:$0xff] %v4818_v13 }
 0x5a4   :  { %1716 = vmatpush.msrb.mxu0 %v4720_v20  ;;  %1556 = vmatpush.msra.mxu3 %v1313_v14  ;;  %v1292_v14 = vld [vmem:[%s5707_s2 + $0x1a8] sm:$0xff] }
 0x5a5   :  { %1695 = vmatpush.msrb.mxu1 %v4769_v59  ;;  %1809 = vmatpush.msra.mxu2 %v4769_v59 }
 0x5a6   :  { %1717 = vmatpush.msrb.mxu0 %v4733_v0  ;;  %1557 = vmatpush.msra.mxu3 %v1310_v58  ;;  %v1289_v58 = vld [vmem:[%s5707_s2 + $0x190] sm:$0xff] }
 0x5a7   :  { %v3147_v10 = vpop.eup %3146  ;;  %1696 = vmatpush.msrb.mxu1 %v4785_v51  ;;  %1810 = vmatpush.msra.mxu2 %v4785_v51 }
 0x5a8   :  { %v1218_v46 = vmul.f32 %v3147_v10, %v1217_v38  ;;  %1718 = vmatpush.msrb.mxu0 %v4741_v37  ;;  %v4790_v38 = vld [vmem:[#allocation5 + $0x1b8] sm:$0xff]  ;;  %1558 = vmatpush.msra.mxu3 %v1307_v62  ;;  %v1304_v10 = vld [vmem:[%s5707_s2 + $0x208] sm:$0xff]  ;;  %v4899_v62 = vpop.f32.mrf.mxu2 }
 0x5a9   :  { %1697 = vmatpush.msrb.mxu1 %v4790_v38  ;;  %1811 = vmatpush.msra.mxu2 %v4790_v38 }
 0x5aa   :  { %v4730_v33 = vadd.f32 %v1219_v47, %v1218_v46  ;;  %1719 = vmatpush.msrb.mxu0 %v4753_v24  ;;  %1559 = vmatpush.msra.mxu3 %v1304_v10  ;;  %v4808_v46 = vld [vmem:[#allocation5 + $0x1a0] sm:$0xff]  ;;  %v1298_v47 = vld [vmem:[%s5707_s2 + $0x1d8] sm:$0xff] }
 0x5ab   :  { %1698 = vmatpush.msrb.mxu1 %v4808_v46  ;;  %1812 = vmatpush.msra.mxu2 %v4808_v46 }
 0x5ac   :  { %1381 = vmatmul.f32.gmra.mxu2 %v4730_v33  ;;  %1401 = vmatmul.f32.vlgmr.msrb.gmra.mxu3 %v4730_v33 }
 0x5ad   :  { %1463 = vmatmul.f32.gmra.mxu0 %v4730_v33  ;;  %1483 = vmatmul.f32.vlgmr.msra.gmra.mxu1 %v4730_v33 }
 0x5ae   :  { %1560 = vmatpush.msra.mxu3 %v1301_v44  ;;  %1699 = vmatpush.msrb.mxu1 %v4818_v13 }
 0x5af   :  { %1813 = vmatpush.msra.mxu2 %v4818_v13 }
 0x5b0   :  { %1561 = vmatpush.msra.mxu3 %v1298_v47  ;;  %1778 = vmatpush.msra.mxu1 %v4434_v16 }
 0x5b2   :  { %1562 = vmatpush.msra.mxu3 %v1295_v57  ;;  %1779 = vmatpush.msra.mxu1 %v4443_v31 }
 0x5b4   :  { %1404 = vmatmul.f32.gmra.mxu3 %v4403_v6  ;;  %1524 = vmatmul.f32.vlgmr.msrb.gmra.mxu2 %v3928_v40 }
 0x5b5   :  { %1486 = vmatmul.f32.gmra.mxu1 %v4403_v6  ;;  %1680 = vmatmul.f32.vlgmr.msra.gmra.mxu0 %v5823_v32 }
 0x5b6   :  { %1891 = vmatpush.msra.mxu0 %v4434_v16  ;;  %1563 = vmatpush.msra.mxu3 %v1292_v14 }
 0x5b7   :  { %1931 = vmatpush.msrb.mxu2 %v4624_v29  ;;  %1780 = vmatpush.msra.mxu1 %v4455_v12 }
 0x5b8   :  { %1892 = vmatpush.msra.mxu0 %v4443_v31  ;;  %1564 = vmatpush.msra.mxu3 %v1289_v58 }
 0x5b9   :  { %1932 = vmatpush.msrb.mxu2 %v4631_v9  ;;  %1781 = vmatpush.msra.mxu1 %v4469_v23 }
 0x5ba   :  { %1893 = vmatpush.msra.mxu0 %v4455_v12  ;;  %1818 = vmatpush.msrb.mxu3 %v4624_v29 }
 0x5bb   :  { %1933 = vmatpush.msrb.mxu2 %v4637_v19  ;;  %1782 = vmatpush.msra.mxu1 %v4481_v15 }
 0x5bc   :  { %1407 = vmatmul.f32.gmra.mxu3 %v4336_v18  ;;  %1527 = vmatmul.f32.gmra.mxu2 %v4011_v60 }
 0x5bd   :  { %1489 = vmatmul.f32.gmra.mxu1 %v4336_v18  ;;  %1720 = vmatmul.f32.vlgmr.msrb.gmra.mxu0 %v5823_v32 }
 0x5be   :  { %1894 = vmatpush.msra.mxu0 %v4469_v23  ;;  %1819 = vmatpush.msrb.mxu3 %v4631_v9 }
 0x5bf   :  { %1934 = vmatpush.msrb.mxu2 %v4639_v26  ;;  %1783 = vmatpush.msra.mxu1 %v4493_v7 }
 0x5c0   :  { %1895 = vmatpush.msra.mxu0 %v4481_v15  ;;  %1820 = vmatpush.msrb.mxu3 %v4637_v19 }
 0x5c1   :  { %1935 = vmatpush.msrb.mxu2 %v4650_v63  ;;  %1784 = vmatpush.msra.mxu1 %v4507_v21 }
 0x5c2   :  { %1896 = vmatpush.msra.mxu0 %v4493_v7  ;;  %1821 = vmatpush.msrb.mxu3 %v4639_v26 }
 0x5c3   :  { %1936 = vmatpush.msrb.mxu2 %v4657_v34  ;;  %1785 = vmatpush.msra.mxu1 %v4519_v3 }
 0x5c4   :  { %1410 = vmatmul.f32.gmra.mxu3 %v4254_v17  ;;  %1530 = vmatmul.f32.gmra.mxu2 %v4084_v50 }
 0x5c5   :  { %1492 = vmatmul.f32.gmra.mxu1 %v4254_v17  ;;  %1897 = vmatpush.msra.mxu0 %v4507_v21 }
 0x5c6   :  { %1822 = vmatpush.msrb.mxu3 %v4650_v63  ;;  %1937 = vmatpush.msrb.mxu2 %v4671_v22 }
 0x5c7   :  { %1898 = vmatpush.msra.mxu0 %v4519_v3  ;;  %1786 = vmatpush.msra.mxu1 %v4531_v2 }
 0x5c8   :  { %1823 = vmatpush.msrb.mxu3 %v4657_v34  ;;  %1938 = vmatpush.msrb.mxu2 %v4681_v45 }
 0x5c9   :  { %1899 = vmatpush.msra.mxu0 %v4531_v2  ;;  %1787 = vmatpush.msra.mxu1 %v4543_v5 }
 0x5ca   :  { %1824 = vmatpush.msrb.mxu3 %v4671_v22  ;;  %1939 = vmatpush.msrb.mxu2 %v4691_v55 }
 0x5cb   :  { %1900 = vmatpush.msra.mxu0 %v4543_v5  ;;  %1788 = vmatpush.msra.mxu1 %v4556_v53 }
 0x5cc   :  { %1413 = vmatmul.f32.gmra.mxu3 %v4197_v43  ;;  %1533 = vmatmul.f32.gmra.mxu2 %v4197_v43 }
 0x5cd   :  { %1495 = vmatmul.f32.gmra.mxu1 %v4197_v43  ;;  %1901 = vmatpush.msra.mxu0 %v4556_v53 }
 0x5ce   :  { %1825 = vmatpush.msrb.mxu3 %v4681_v45  ;;  %1940 = vmatpush.msrb.mxu2 %v4702_v49 }
 0x5cf   :  { %1902 = vmatpush.msra.mxu0 %v4570_v30  ;;  %1789 = vmatpush.msra.mxu1 %v4570_v30 }
 0x5d0   :  { %1826 = vmatpush.msrb.mxu3 %v4691_v55  ;;  %1941 = vmatpush.msrb.mxu2 %v4709_v35 }
 0x5d1   :  { %1903 = vmatpush.msra.mxu0 %v4584_v54  ;;  %1790 = vmatpush.msra.mxu1 %v4584_v54 }
 0x5d2   :  { %1827 = vmatpush.msrb.mxu3 %v4702_v49  ;;  %1942 = vmatpush.msrb.mxu2 %v4716_v42 }
 0x5d3   :  { %1904 = vmatpush.msra.mxu0 %v4597_v8  ;;  %1791 = vmatpush.msra.mxu1 %v4597_v8 }
 0x5d4   :  { %1416 = vmatmul.f32.gmra.mxu3 %v4084_v50  ;;  %1536 = vmatmul.f32.gmra.mxu2 %v4254_v17 }
 0x5d5   :  { %1498 = vmatmul.f32.gmra.mxu1 %v4084_v50  ;;  %1905 = vmatpush.msra.mxu0 %v4607_v28 }
 0x5d6   :  { %1828 = vmatpush.msrb.mxu3 %v4709_v35  ;;  %1943 = vmatpush.msrb.mxu2 %v4720_v20 }
 0x5d7   :  { %1906 = vmatpush.msra.mxu0 %v4616_v48  ;;  %1792 = vmatpush.msra.mxu1 %v4607_v28 }
 0x5d8   :  { %1829 = vmatpush.msrb.mxu3 %v4716_v42  ;;  %1944 = vmatpush.msrb.mxu2 %v4733_v0 }
 0x5d9   :  { %2024 = vmatpush.msrb.mxu0 %v4602_v41  ;;  %1793 = vmatpush.msra.mxu1 %v4616_v48 }
 0x5da   :  { %1830 = vmatpush.msrb.mxu3 %v4720_v20  ;;  %1945 = vmatpush.msrb.mxu2 %v4741_v37 }
 0x5db   :  { %2025 = vmatpush.msrb.mxu0 %v4619_v4 }
 0x5dc   :  { %1419 = vmatmul.f32.gmra.mxu3 %v4011_v60  ;;  %1539 = vmatmul.f32.gmra.mxu2 %v4336_v18 }
 0x5dd   :  { %1501 = vmatmul.f32.gmra.mxu1 %v4011_v60  ;;  %2026 = vmatpush.msrb.mxu0 %v4635_v36 }
 0x5de   :  { %1831 = vmatpush.msrb.mxu3 %v4733_v0  ;;  %1946 = vmatpush.msrb.mxu2 %v4753_v24 }
 0x5df   :  { %2027 = vmatpush.msrb.mxu0 %v4644_v56 }
 0x5e0   :  { %1832 = vmatpush.msrb.mxu3 %v4741_v37 }
 0x5e1   :  { %2028 = vmatpush.msrb.mxu0 %v4669_v27 }
 0x5e2   :  { %1833 = vmatpush.msrb.mxu3 %v4753_v24 }
 0x5e3   :  { %2029 = vmatpush.msrb.mxu0 %v4683_v39 }
 0x5e4   :  { %1422 = vmatmul.f32.gmra.mxu3 %v3928_v40  ;;  %1542 = vmatmul.f32.gmra.mxu2 %v4403_v6 }
 0x5e5   :  { %1504 = vmatmul.f32.gmra.mxu1 %v3928_v40  ;;  %2030 = vmatpush.msrb.mxu0 %v4707_v52 }
 0x5e7   :  { %2031 = vmatpush.msrb.mxu0 %v4718_v61 }
 0x5e9   :  { %2032 = vmatpush.msrb.mxu0 %v4739_v1 }
 0x5eb   :  { %2033 = vmatpush.msrb.mxu0 %v4748_v11 }
 0x5ec   :  { %1545 = vmatmul.f32.gmra.mxu2 %v4730_v33  ;;  %1565 = vmatmul.f32.vlgmr.msra.gmra.mxu3 %v4730_v33 }
 0x5ed   :  { %1700 = vmatmul.f32.vlgmr.msrb.gmra.mxu1 %v5823_v32  ;;  %2004 = vmatpush.msra.mxu3 %v4434_v16  ;;  %v4920_v16 = vpop.f32.mrf.mxu2 }
 0x5ee   :  { %1911 = vmatpush.msrb.mxu1 %v4602_v41  ;;  %5825 = vst [vmem:[#allocation13_spill] sm:$0xff] %v4920_v16  ;;  %2034 = vmatpush.msrb.mxu0 %v4764_v25 }
 0x5ef   :  { %2005 = vmatpush.msra.mxu3 %v4443_v31  ;;  %v4924_v31 = vpop.f32.mrf.mxu0 }
 0x5f0   :  { %1912 = vmatpush.msrb.mxu1 %v4619_v4  ;;  %2035 = vmatpush.msrb.mxu0 %v4769_v59 }
 0x5f1   :  { %2006 = vmatpush.msra.mxu3 %v4455_v12 }
 0x5f2   :  { %1913 = vmatpush.msrb.mxu1 %v4635_v36  ;;  %2036 = vmatpush.msrb.mxu0 %v4785_v51 }
 0x5f3   :  { %2007 = vmatpush.msra.mxu3 %v4469_v23 }
 0x5f4   :  { %1568 = vmatmul.f32.gmra.mxu3 %v4403_v6  ;;  %1914 = vmatpush.msrb.mxu1 %v4644_v56 }
 0x5f5   :  { %2008 = vmatpush.msra.mxu3 %v4481_v15  ;;  %2037 = vmatpush.msrb.mxu0 %v4790_v38  ;;  %v4940_v6 = vpop.f32.mrf.mxu2 }
 0x5f6   :  { %1915 = vmatpush.msrb.mxu1 %v4669_v27  ;;  %5826 = vst [vmem:[#allocation11_spill] sm:$0xff] %v4940_v6 }
 0x5f7   :  { %2009 = vmatpush.msra.mxu3 %v4493_v7  ;;  %2038 = vmatpush.msrb.mxu0 %v4808_v46 }
 0x5f8   :  { %1916 = vmatpush.msrb.mxu1 %v4683_v39 }
 0x5f9   :  { %2010 = vmatpush.msra.mxu3 %v4507_v21  ;;  %2039 = vmatpush.msrb.mxu0 %v4818_v13 }
 0x5fa   :  { %1917 = vmatpush.msrb.mxu1 %v4707_v52 }
 0x5fb   :  { %2011 = vmatpush.msra.mxu3 %v4519_v3 }
 0x5fc   :  { %1571 = vmatmul.f32.gmra.mxu3 %v4336_v18  ;;  %1918 = vmatpush.msrb.mxu1 %v4718_v61  ;;  %v1446_v18 = vpop.f32.mrf.mxu0 }
 0x5fd   :  { %2012 = vmatpush.msra.mxu3 %v4531_v2  ;;  %v4955_v12 = vpop.f32.mrf.mxu2 }
 0x5fe   :  { %1919 = vmatpush.msrb.mxu1 %v4739_v1  ;;  %5827 = vst [vmem:[#allocation9_spill] sm:$0xff] %v4955_v12 }
 0x5ff   :  { %2013 = vmatpush.msra.mxu3 %v4543_v5  ;;  %v3031_v5 = vld [vmem:[%s5709_s4 + $0x1] ss:$2 sm:$0x7] }
 0x600   :  { %1920 = vmatpush.msrb.mxu1 %v4748_v11  ;;  %v4993_v12 = vperm.slane %v3031_v5, 0 }
 0x601   :  { %2014 = vmatpush.msra.mxu3 %v4556_v53  ;;  %v4975_v53 = vperm.slane %v3031_v5, 1 }
 0x602   :  { %1921 = vmatpush.msrb.mxu1 %v4764_v25  ;;  %5838 = vst [vmem:[#allocation25_spill] sm:$0xff] %v4993_v12 }
 0x603   :  { %2015 = vmatpush.msra.mxu3 %v4570_v30  ;;  %5831 = vst [vmem:[#allocation22_spill] sm:$0xff] %v4975_v53  ;;  %v1447_v32 = vadd.f32 %v1446_v18, %v4975_v53 }
 0x604   :  { %1574 = vmatmul.f32.gmra.mxu3 %v4254_v17  ;;  %1922 = vmatpush.msrb.mxu1 %v4769_v59  ;;  %v1449_v17 = vpop.f32.mrf.mxu0 }
 0x605   :  { %2016 = vmatpush.msra.mxu3 %v4584_v54  ;;  %v4964_v23 = vpop.f32.mrf.mxu2  ;;  %v1450_v57 = vadd.f32 %v1449_v17, %v4975_v53  ;;  %v1362_v17 = vadd.f32 %v4899_v62, %v4993_v12 }
 0x606   :  { %1923 = vmatpush.msrb.mxu1 %v4785_v51  ;;  %5828 = vst [vmem:[#allocation14_spill] sm:$0xff] %v4964_v23 }
 0x607   :  { %2017 = vmatpush.msra.mxu3 %v4597_v8 }
 0x608   :  { %1924 = vmatpush.msrb.mxu1 %v4790_v38 }
 0x609   :  { %2018 = vmatpush.msra.mxu3 %v4607_v28 }
 0x60a   :  { %1925 = vmatpush.msrb.mxu1 %v4808_v46 }
 0x60b   :  { %2019 = vmatpush.msra.mxu3 %v4616_v48 }
 0x60c   :  { %1577 = vmatmul.f32.gmra.mxu3 %v4197_v43  ;;  %1926 = vmatpush.msrb.mxu1 %v4818_v13  ;;  %v1452_v15 = vpop.f32.mrf.mxu0 }
 0x60d   :  { %v4967_v7 = vpop.f32.mrf.mxu2 }
 0x60e   :  { %5829 = vst [vmem:[#allocation17_spill] sm:$0xff] %v4967_v7  ;;  %v4989_v7 = vperm.slane %v3031_v5, 2 }
 0x610   :  { %5836 = vst [vmem:[#allocation24_spill] sm:$0xff] %v4989_v7 }
 0x614   :  { %1580 = vmatmul.f32.gmra.mxu3 %v4084_v50  ;;  %v1455_v21 = vpop.f32.mrf.mxu0 }
 0x615   :  { %v4970_v3 = vpop.f32.mrf.mxu2  ;;  %v1456_v5 = vadd.f32 %v1455_v21, %v4975_v53 }
 0x616   :  { %5830 = vst [vmem:[#allocation21_spill] sm:$0xff] %v4970_v3 }
 0x61c   :  { %1583 = vmatmul.f32.gmra.mxu3 %v4011_v60  ;;  %v1458_v43 = vpop.f32.mrf.mxu0 }
 0x624   :  { %1586 = vmatmul.f32.gmra.mxu3 %v3928_v40  ;;  %v4980_v44 = vpop.f32.mrf.mxu0 }
 0x625   :  { %5833 = vst [vmem:[#allocation10_spill] sm:$0xff] %v4980_v44 }
 0x62a   :  { %v1484_v2 = vpop.f32.mrf.mxu1 }
 0x62c   :  { %v1464_v3 = vpop.f32.mrf.mxu0 }
 0x62f   :  { %v1382_v50 = vpop.f32.mrf.mxu2  ;;  %v1402_v33 = vpop.f32.mrf.mxu3 }
 0x632   :  { %v1487_v60 = vpop.f32.mrf.mxu1 }
 0x633   :  { %v4978_v10 = vadd.f32 %v1487_v60, %v1447_v32  ;;  %v1453_v60 = vadd.f32 %v1452_v15, %v4975_v53 }
 0x635   :  { %5832 = vst [vmem:[#allocation12_spill] sm:$0xff] %v4978_v10 }
 0x637   :  { %v4982_v40 = vpop.f32.mrf.mxu3  ;;  %v4984_v47 = vpop.f32.mrf.mxu2 }
 0x638   :  { %5834 = vst [vmem:[#allocation8_spill] sm:$0xff] %v4982_v40 }
 0x63a   :  { %v1490_v14 = vpop.f32.mrf.mxu1 }
 0x63b   :  { %v4987_v58 = vadd.f32 %v1490_v14, %v1450_v57  ;;  %v1403_v57 = vadd.f32 %v1402_v33, %v1362_v17  ;;  %v1681_v14 = vpop.f32.mrf.mxu0  ;;  %v1459_v33 = vadd.f32 %v1458_v43, %v4975_v53 }
 0x63d   :  { %5835 = vst [vmem:[#allocation23_spill] sm:$0xff] %v4987_v58 }
 0x63f   :  { %v4991_v23 = vpop.f32.mrf.mxu3  ;;  %v1528_v18 = vpop.f32.mrf.mxu2 }
 0x640   :  { %5837 = vst [vmem:[#allocation15_spill] sm:$0xff] %v4991_v23  ;;  %v4996_v32 = vadd.f32 %v1528_v18, %v4989_v7  ;;  %v1727_v18 = vadd.f32 %v1681_v14, %v1403_v57 }
 0x642   :  { %5839 = vst [vmem:[#allocation26_spill] sm:$0xff] %v4996_v32  ;;  %v1493_v44 = vpop.f32.mrf.mxu1  ;;  %v3032_v15 = vmul.f32 -1.442695, %v1727_v18 }
 0x643   :  { %v4999_v6 = vadd.f32 %v1493_v44, %v1453_v60 }
 0x644   :  { %3148 = vpow2.f32 %v3032_v15  ;;  %v1465_v15 = vadd.f32 %v1464_v3, %v4975_v53 }
 0x645   :  { %5840 = vst [vmem:[#allocation16_spill] sm:$0xff] %v4999_v6 }
 0x647   :  { %v5003_v58 = vpop.f32.mrf.mxu3  ;;  %v1531_v10 = vpop.f32.mrf.mxu2 }
 0x648   :  { %5841 = vst [vmem:[#allocation27_spill] sm:$0xff] %v5003_v58  ;;  %v5006_v23 = vadd.f32 %v1531_v10, %v4989_v7 }
 0x64a   :  { %v1496_v32 = vpop.f32.mrf.mxu1  ;;  %v3149_v57 = vpop.eup %3148 }
 0x64b   :  { %v5009_v40 = vadd.f32 %v1496_v32, %v1456_v5  ;;  %v1731_v5 = vadd.f32 1.0, %v3149_v57 }
 0x64d   :  { %5842 = vst [vmem:[#allocation28_spill] sm:$0xff] %v5009_v40  ;;  %3150 = vrcp.f32 %v1731_v5  ;;  %vm1737_vm2 = vweird.f32 %v1731_v5 }
 0x64f   :  { %v5011_v44 = vpop.f32.mrf.mxu3  ;;  %v1534_v60 = vpop.f32.mrf.mxu2 }
 0x650   :  { %5843 = vst [vmem:[#allocation18_spill] sm:$0xff] %v5011_v44  ;;  %v5014_v62 = vadd.f32 %v1534_v60, %v4989_v7 }
 0x652   :  { %v1499_v17 = vpop.f32.mrf.mxu1 }
 0x653   :  { %v5017_v58 = vadd.f32 %v1499_v17, %v1459_v33 }
 0x655   :  { %5844 = vst [vmem:[#allocation29_spill] sm:$0xff] %v5017_v58  ;;  %v3151_v58 = vpop.eup %3150 }
 0x656   :  { %v1733_v40 = vmul.f32 %v3151_v58, %v1731_v5  ;;  %vm1738_vm1 = vweird.f32 %v3151_v58 }
 0x657   :  { %v5019_v10 = vpop.f32.mrf.mxu3  ;;  %v1537_v21 = vpop.f32.mrf.mxu2  ;;  %vm1739_vm3 = vmor %vm1737_vm2, %vm1738_vm1 }
 0x658   :  { %5845 = vst [vmem:[#allocation30_spill] sm:$0xff] %v5019_v10  ;;  %v5022_v32 = vadd.f32 %v1537_v21, %v4989_v7  ;;  %v1383_v10 = vadd.f32 %v1382_v50, %v4993_v12  ;;  %v1444_v21 = vadd.f32 %v4924_v31, %v4975_v53  ;;  %v1734_v16 = vsub.f32 1.0, %v1733_v40 }
 0x659   :  { %v1743_v31 = vand.u32 2147483648, %v1731_v5  ;;  %v1741_v53 = vand.u32 2147483647, %v1731_v5 }
 0x65a   :  { %v5024_v14 = vpop.f32.mrf.mxu1 }
 0x65b   :  { %5846 = vst [vmem:[#allocation31_spill] sm:$0xff] %v5024_v14  ;;  %vm1742_vm4 = vcmp.eq.f32.partialorder %v1741_v53, 8.507059e+37 }
 0x65f   :  { %v5026_v18 = vpop.f32.mrf.mxu3  ;;  %v1540_v60 = vpop.f32.mrf.mxu2 }
 0x660   :  { %5847 = vst [vmem:[#allocation20_spill] sm:$0xff] %v5026_v18  ;;  %v5029_v43 = vadd.f32 %v1540_v60, %v4989_v7  ;;  %v1485_v60 = vadd.f32 %v1484_v2, %v1444_v21  ;;  %v1721_v2 = vpop.f32.mrf.mxu0  ;;  %v1744_v21 = vor.u32 1.1754944e-38, %v1743_v31 }
 0x662   :  { %v1505_v33 = vpop.f32.mrf.mxu1 }
 0x663   :  { %v5032_v17 = vadd.f32 %v1505_v33, %v1465_v15 }
 0x665   :  { %5848 = vst [vmem:[#allocation32_spill] sm:$0xff] %v5032_v17  ;;  %v1735_v17 = vmul.f32 %v3151_v58, %v1734_v16  ;;  %v1526_v16 = vadd.f32 %v4984_v47, %v4989_v7 }
 0x667   :  { %v1423_v14 = vpop.f32.mrf.mxu3  ;;  %v1543_v57 = vpop.f32.mrf.mxu2  ;;  %v1736_v50 = vadd.f32 %v3151_v58, %v1735_v17 }
 0x668   :  { %v5037_v44 = vadd.f32 %v1423_v14, %v1383_v10  ;;  %v5040_v18 = vadd.f32 %v1543_v57, %v4989_v7  ;;  %v5045_v10 = vld [vmem:[%s5710_s5 + $0x1] ss:$0 sm:$0xff]  ;;  %v5878_v7 = vld [vmem:[#allocation27_spill] sm:$0xff] }
 0x669   :  { %v1740_v40 = vsel %vm1739_vm3, %v3151_v58, %v1736_v50  ;;  %v1768_v17 = vadd.f32 %v5045_v10, %v1721_v2 }
 0x66a   :  { %5849 = vst [vmem:[#allocation33_spill] sm:$0xff] %v5037_v44  ;;  %v1701_v6 = vpop.f32.mrf.mxu1  ;;  %v1745_v5 = vsel %vm1742_vm4, %v1744_v21, %v1740_v40 }
 0x66b   :  { %v1747_v3 = vadd.f32 %v1701_v6, %v1485_v60 }
 0x66d   :  { %v3033_v15 = vmul.f32 -1.442695, %v1747_v3  ;;  %v1769_v3 = vmul.f32 %v1768_v17, %v1745_v5 }
 0x66f   :  { %3152 = vpow2.f32 %v3033_v15  ;;  %v1566_v33 = vpop.f32.mrf.mxu3 }
 0x670   :  { %v1567_v57 = vadd.f32 %v1566_v33, %v1526_v16 }
 0x675   :  { %v3153_v12 = vpop.eup %3152 }
 0x676   :  { %v1751_v14 = vadd.f32 1.0, %v3153_v12  ;;  %v1770_v12 = vadd.f32 %v1769_v3, %v1567_v57  ;;  %v5072_v57 = vld [vmem:[#allocation5 + $0x2d0] sm:$0xff]  ;;  %v5144_v3 = vpop.f32.mrf.mxu2 }
 0x677   :  { %v5047_v6 = vpop.f32.mrf.mxu3 }
 0x678   :  { %5850 = vst [vmem:[#allocation34_spill] sm:$0xff] %v5047_v6  ;;  %3154 = vrcp.f32 %v1751_v14  ;;  %v1763_v58 = vand.u32 2147483648, %v1751_v14  ;;  %v1761_v31 = vand.u32 2147483647, %v1751_v14  ;;  %vm1757_vm6 = vweird.f32 %v1751_v14 }
 0x679   :  { %3156 = vtanh.f32 %v1770_v12 }
 0x67a   :  { %v1764_v47 = vor.u32 1.1754944e-38, %v1763_v58  ;;  %vm1762_vm8 = vcmp.eq.f32.partialorder %v1761_v31, 8.507059e+37  ;;  %v5860_v31 = vld [vmem:[#allocation12_spill] sm:$0xff] }
 0x67e   :  { %v3155_v60 = vpop.eup %3154 }
 0x67f   :  { %v1753_v15 = vmul.f32 %v3155_v60, %v1751_v14  ;;  %v1572_v44 = vpop.f32.mrf.mxu3  ;;  %vm1758_vm5 = vweird.f32 %v3155_v60 }
 0x680   :  { %v5053_v13 = vadd.f32 %v1572_v44, %v5006_v23  ;;  %vm1759_vm7 = vmor %vm1757_vm6, %vm1758_vm5  ;;  %v3157_v23 = vpop.eup %3156 }
 0x681   :  { %v1754_v6 = vsub.f32 1.0, %v1753_v15 }
 0x683   :  { %v1755_v50 = vmul.f32 %v3155_v60, %v1754_v6 }
 0x685   :  { %v1756_v53 = vadd.f32 %v3155_v60, %v1755_v50 }
 0x687   :  { %v1760_v2 = vsel %vm1759_vm7, %v3155_v60, %v1756_v53  ;;  %v1575_v33 = vpop.f32.mrf.mxu3 }
 0x688   :  { %v1765_v40 = vsel %vm1762_vm8, %v1764_v47, %v1760_v2  ;;  %v5056_v21 = vadd.f32 %v1575_v33, %v5014_v62  ;;  %v5067_v62 = vld [vmem:[#allocation5 + $0x2e8] sm:$0xff] }
 0x689   :  { %v1772_v16 = vsub.f32 1.0, %v1765_v40  ;;  %v1774_v17 = vmul.f32 0.0, %v1765_v40 }
 0x68b   :  { %v1773_v44 = vmul.f32 %v3157_v23, %v1772_v16 }
 0x68d   :  { %v5058_v5 = vadd.f32 %v1774_v17, %v1773_v44 }
 0x68f   :  { %5851 = vst [vmem:[#allocation35_spill] sm:$0xff] %v5058_v5  ;;  %1794 = vmatmul.f32.vlgmr.msra.gmra.mxu1 %v5058_v5  ;;  %1814 = vmatmul.f32.vlgmr.msra.gmra.mxu2 %v5058_v5  ;;  %v1578_v14 = vpop.f32.mrf.mxu3 }
 0x690   :  { %1834 = vmatmul.f32.vlgmr.msrb.gmra.mxu3 %v5058_v5  ;;  %v5064_v6 = vadd.f32 %v1578_v14, %v5022_v32  ;;  %2044 = vmatpush.msra.mxu1 %v4624_v29  ;;  %v5077_v32 = vld [vmem:[#allocation5 + $0x2b8] sm:$0xff] }
 0x691   :  { %2117 = vmatpush.msra.mxu2 %v5067_v62  ;;  %2137 = vmatpush.msrb.mxu3 %v4602_v41  ;;  %v5082_v41 = vld [vmem:[#allocation5 + $0x2a0] sm:$0xff] }
 0x692   :  { %5852 = vst [vmem:[#allocation36_spill] sm:$0xff] %v5064_v6  ;;  %2045 = vmatpush.msra.mxu1 %v4631_v9 }
 0x693   :  { %2118 = vmatpush.msra.mxu2 %v5072_v57  ;;  %2138 = vmatpush.msrb.mxu3 %v4619_v4  ;;  %v5090_v4 = vld [vmem:[#allocation5 + $0x288] sm:$0xff] }
 0x694   :  { %2046 = vmatpush.msra.mxu1 %v4637_v19  ;;  %v5100_v19 = vld [vmem:[#allocation5 + $0x258] sm:$0xff] }
 0x695   :  { %2119 = vmatpush.msra.mxu2 %v5077_v32  ;;  %2139 = vmatpush.msrb.mxu3 %v4635_v36  ;;  %v5095_v36 = vld [vmem:[#allocation5 + $0x270] sm:$0xff] }
 0x696   :  { %2047 = vmatpush.msra.mxu1 %v4639_v26 }
 0x697   :  { %v1581_v29 = vpop.f32.mrf.mxu3  ;;  %2120 = vmatpush.msra.mxu2 %v5082_v41  ;;  %2140 = vmatpush.msrb.mxu3 %v4644_v56  ;;  %v5105_v56 = vld [vmem:[#allocation5 + $0x240] sm:$0xff] }
 0x698   :  { %v5087_v9 = vadd.f32 %v1581_v29, %v5029_v43  ;;  %2048 = vmatpush.msra.mxu1 %v4650_v63  ;;  %v5857_v43 = vld [vmem:[#allocation13_spill] sm:$0xff] }
 0x699   :  { %2121 = vmatpush.msra.mxu2 %v5090_v4  ;;  %2141 = vmatpush.msrb.mxu3 %v4669_v27 }
 0x69a   :  { %5853 = vst [vmem:[#allocation37_spill] sm:$0xff] %v5087_v9  ;;  %2049 = vmatpush.msra.mxu1 %v4657_v34  ;;  %v5113_v34 = vld [vmem:[#allocation5 + $0x228] sm:$0xff] }
 0x69b   :  { %2122 = vmatpush.msra.mxu2 %v5095_v36  ;;  %2142 = vmatpush.msrb.mxu3 %v4683_v39 }
 0x69c   :  { %2050 = vmatpush.msra.mxu1 %v4671_v22  ;;  %v5118_v22 = vld [vmem:[#allocation5 + $0x210] sm:$0xff] }
 0x69d   :  { %2123 = vmatpush.msra.mxu2 %v5100_v19  ;;  %2143 = vmatpush.msrb.mxu3 %v4707_v52 }
 0x69e   :  { %2051 = vmatpush.msra.mxu1 %v4681_v45 }
 0x69f   :  { %v1584_v26 = vpop.f32.mrf.mxu3  ;;  %2124 = vmatpush.msra.mxu2 %v5105_v56  ;;  %2144 = vmatpush.msrb.mxu3 %v4718_v61 }
 0x6a0   :  { %v5110_v63 = vadd.f32 %v1584_v26, %v5040_v18  ;;  %2052 = vmatpush.msra.mxu1 %v4691_v55  ;;  %v5123_v18 = vld [vmem:[#allocation5 + $0x1f8] sm:$0xff] }
 0x6a1   :  { %2125 = vmatpush.msra.mxu2 %v5113_v34  ;;  %2145 = vmatpush.msrb.mxu3 %v4739_v1 }
 0x6a2   :  { %5854 = vst [vmem:[#allocation38_spill] sm:$0xff] %v5110_v63  ;;  %2053 = vmatpush.msra.mxu1 %v4702_v49 }
 0x6a3   :  { %2126 = vmatpush.msra.mxu2 %v5118_v22  ;;  %2146 = vmatpush.msrb.mxu3 %v4748_v11 }
 0x6a4   :  { %2054 = vmatpush.msra.mxu1 %v4709_v35 }
 0x6a5   :  { %2127 = vmatpush.msra.mxu2 %v5123_v18  ;;  %2147 = vmatpush.msrb.mxu3 %v4764_v25 }
 0x6a6   :  { %2055 = vmatpush.msra.mxu1 %v4716_v42 }
 0x6a7   :  { %2128 = vmatpush.msra.mxu2 %v4570_v30  ;;  %2148 = vmatpush.msrb.mxu3 %v4769_v59  ;;  %v5855_v30 = vld [vmem:[#allocation19_spill] sm:$0xff]  ;;  %v5148_v40 = vpop.f32.mrf.mxu3 }
 0x6a8   :  { %2056 = vmatpush.msra.mxu1 %v4720_v20  ;;  %5858 = vst [vmem:[#allocation19_spill] sm:$0xff] %v5144_v3 }
 0x6a9   :  { %2129 = vmatpush.msra.mxu2 %v4584_v54  ;;  %2149 = vmatpush.msrb.mxu3 %v4785_v51  ;;  %v5856_v54 = vld [vmem:[#allocation25_spill] sm:$0xff]  ;;  %5861 = vst [vmem:[#allocation13_spill] sm:$0xff] %v5148_v40 }
 0x6aa   :  { %2057 = vmatpush.msra.mxu1 %v4733_v0  ;;  %v1365_v60 = vadd.f32 %v5857_v43, %v5856_v54 }
 0x6ab   :  { %2130 = vmatpush.msra.mxu2 %v4597_v8  ;;  %2150 = vmatpush.msrb.mxu3 %v4790_v38  ;;  %v5859_v8 = vld [vmem:[#allocation8_spill] sm:$0xff] }
 0x6ac   :  { %2058 = vmatpush.msra.mxu1 %v4741_v37  ;;  %v1406_v15 = vadd.f32 %v5859_v8, %v1365_v60 }
 0x6ad   :  { %2131 = vmatpush.msra.mxu2 %v4607_v28  ;;  %2151 = vmatpush.msrb.mxu3 %v4808_v46 }
 0x6ae   :  { %2059 = vmatpush.msra.mxu1 %v4753_v24 }
 0x6af   :  { %2132 = vmatpush.msra.mxu2 %v4616_v48  ;;  %2152 = vmatpush.msrb.mxu3 %v5855_v30 }
 0x70c   :  { %v1795_v12 = vpop.f32.mrf.mxu1 }
 0x70d   :  { %v1841_v58 = vadd.f32 %v1795_v12, %v1406_v15 }
 0x70f   :  { %v3034_v50 = vmul.f32 -1.442695, %v1841_v58 }
 0x711   :  { %3158 = vpow2.f32 %v3034_v50 }
 0x712   :  { %v1815_v28 = vpop.f32.mrf.mxu2 }
 0x713   :  { %v1861_v53 = vadd.f32 %v1815_v28, %v5860_v31  ;;  %v1835_v60 = vpop.f32.mrf.mxu3  ;;  %v5862_v31 = vld [vmem:[#allocation26_spill] sm:$0xff] }
 0x714   :  { %v1881_v28 = vadd.f32 %v5045_v10, %v1835_v60 }
 0x715   :  { %v3035_v47 = vmul.f32 -1.442695, %v1861_v53  ;;  %v5863_v53 = vld [vmem:[#allocation34_spill] sm:$0xff] }
 0x717   :  { %v3159_v2 = vpop.eup %3158  ;;  %3160 = vpow2.f32 %v3035_v47  ;;  %v1570_v47 = vadd.f32 %v5863_v53, %v5862_v31  ;;  %v5184_v31 = vld [vmem:[#allocation5 + $0x2a8] sm:$0xff]  ;;  %v5187_v53 = vld [vmem:[#allocation5 + $0x298] sm:$0xff] }
 0x718   :  { %v1845_v48 = vadd.f32 1.0, %v3159_v2 }
 0x71a   :  { %3162 = vrcp.f32 %v1845_v48  ;;  %v1857_v14 = vand.u32 2147483648, %v1845_v48  ;;  %v1855_v26 = vand.u32 2147483647, %v1845_v48  ;;  %vm1851_vm10 = vweird.f32 %v1845_v48 }
 0x71c   :  { %v1858_v12 = vor.u32 1.1754944e-38, %v1857_v14  ;;  %vm1856_vm12 = vcmp.eq.f32.partialorder %v1855_v26, 8.507059e+37 }
 0x71d   :  { %v3161_v33 = vpop.eup %3160 }
 0x71e   :  { %v1865_v16 = vadd.f32 1.0, %v3161_v33 }
 0x720   :  { %v3163_v23 = vpop.eup %3162  ;;  %3164 = vrcp.f32 %v1865_v16  ;;  %v1875_v40 = vand.u32 2147483647, %v1865_v16  ;;  %vm1871_vm14 = vweird.f32 %v1865_v16 }
 0x721   :  { %v1847_v44 = vmul.f32 %v3163_v23, %v1845_v48  ;;  %vm1852_vm9 = vweird.f32 %v3163_v23 }
 0x722   :  { %vm1853_vm11 = vmor %vm1851_vm10, %vm1852_vm9  ;;  %vm1876_vm0 = vcmp.eq.f32.partialorder %v1875_v40, 8.507059e+37  ;;  %v5166_v40 = vld [vmem:[#allocation5 + $0x2e0] sm:$0xff] }
 0x723   :  { %v1848_v17 = vsub.f32 1.0, %v1847_v44  ;;  %v1877_v44 = vand.u32 2147483648, %v1865_v16 }
 0x725   :  { %v1849_v29 = vmul.f32 %v3163_v23, %v1848_v17  ;;  %v1878_v48 = vor.u32 1.1754944e-38, %v1877_v44 }
 0x726   :  { %v3165_v43 = vpop.eup %3164 }
 0x727   :  { %v1867_v8 = vmul.f32 %v3165_v43, %v1865_v16  ;;  %v1850_v15 = vadd.f32 %v3163_v23, %v1849_v29  ;;  %vm1872_vm13 = vweird.f32 %v3165_v43  ;;  %v5159_v16 = vld [vmem:[#allocation5 + $0x2f8] sm:$0xff] }
 0x728   :  { %vm1873_vm15 = vmor %vm1871_vm14, %vm1872_vm13 }
 0x729   :  { %v1868_v58 = vsub.f32 1.0, %v1867_v8  ;;  %v1854_v50 = vsel %vm1853_vm11, %v3163_v23, %v1850_v15 }
 0x72a   :  { %v1859_v2 = vsel %vm1856_vm12, %v1858_v12, %v1854_v50  ;;  %v5177_v50 = vld [vmem:[#allocation5 + $0x2c0] sm:$0xff] }
 0x72b   :  { %v1869_v33 = vmul.f32 %v3165_v43, %v1868_v58  ;;  %v1882_v17 = vmul.f32 %v1881_v28, %v1859_v2  ;;  %v5173_v58 = vld [vmem:[#allocation5 + $0x2c8] sm:$0xff]  ;;  %v5180_v28 = vld [vmem:[#allocation5 + $0x2b0] sm:$0xff] }
 0x72c   :  { %v5197_v2 = vld [vmem:[#allocation5 + $0x268] sm:$0xff] }
 0x72d   :  { %v1870_v3 = vadd.f32 %v3165_v43, %v1869_v33  ;;  %v1883_v29 = vadd.f32 %v1882_v17, %v1570_v47  ;;  %v5192_v47 = vld [vmem:[#allocation5 + $0x280] sm:$0xff] }
 0x72f   :  { %v1874_v14 = vsel %vm1873_vm15, %v3165_v43, %v1870_v3  ;;  %3166 = vtanh.f32 %v1883_v29  ;;  %v5163_v3 = vld [vmem:[#allocation5 + $0x2f0] sm:$0xff]  ;;  %v5170_v43 = vld [vmem:[#allocation5 + $0x2d8] sm:$0xff] }
 0x730   :  { %v1879_v23 = vsel %vm1876_vm0, %v1878_v48, %v1874_v14 }
 0x731   :  { %v1885_v26 = vsub.f32 1.0, %v1879_v23  ;;  %v1887_v15 = vmul.f32 %v1879_v23, %v5058_v5 }
 0x735   :  { %v3167_v60 = vpop.eup %3166 }
 0x736   :  { %v1886_v8 = vmul.f32 %v3167_v60, %v1885_v26 }
 0x738   :  { %v5154_v12 = vadd.f32 %v1887_v15, %v1886_v8 }
 0x73a   :  { %5864 = vst [vmem:[#allocation8_spill] sm:$0xff] %v5154_v12  ;;  %1907 = vmatmul.f32.vlgmr.msra.gmra.mxu0 %v5154_v12  ;;  %1927 = vmatmul.f32.vlgmr.msrb.gmra.mxu1 %v5154_v12 }
 0x73b   :  { %1947 = vmatmul.f32.vlgmr.msrb.gmra.mxu2 %v5154_v12  ;;  %2157 = vmatpush.msra.mxu0 %v5159_v16 }
 0x73c   :  { %2230 = vmatpush.msrb.mxu1 %v5067_v62  ;;  %2250 = vmatpush.msrb.mxu2 %v5163_v3 }
 0x73d   :  { %2158 = vmatpush.msra.mxu0 %v5166_v40 }
 0x73e   :  { %2231 = vmatpush.msrb.mxu1 %v5072_v57  ;;  %2251 = vmatpush.msrb.mxu2 %v5170_v43 }
 0x73f   :  { %2159 = vmatpush.msra.mxu0 %v5173_v58 }
 0x740   :  { %2232 = vmatpush.msrb.mxu1 %v5077_v32  ;;  %2252 = vmatpush.msrb.mxu2 %v5177_v50 }
 0x741   :  { %2160 = vmatpush.msra.mxu0 %v5180_v28 }
 0x742   :  { %2233 = vmatpush.msrb.mxu1 %v5082_v41  ;;  %2253 = vmatpush.msrb.mxu2 %v5184_v31 }
 0x743   :  { %2161 = vmatpush.msra.mxu0 %v5187_v53 }
 0x744   :  { %2234 = vmatpush.msrb.mxu1 %v5090_v4  ;;  %2254 = vmatpush.msrb.mxu2 %v4669_v27  ;;  %v5215_v27 = vld [vmem:[#allocation5 + $0x1e0] sm:$0xff] }
 0x745   :  { %2162 = vmatpush.msra.mxu0 %v5192_v47 }
 0x746   :  { %2235 = vmatpush.msrb.mxu1 %v5095_v36  ;;  %2255 = vmatpush.msrb.mxu2 %v4683_v39  ;;  %v5225_v39 = vld [vmem:[#allocation5 + $0x1b0] sm:$0xff] }
 0x747   :  { %2163 = vmatpush.msra.mxu0 %v5197_v2  ;;  %5865 = vst [vmem:[#allocation12_spill] sm:$0xff] %v5225_v39 }
 0x748   :  { %2236 = vmatpush.msrb.mxu1 %v5100_v19  ;;  %2256 = vmatpush.msrb.mxu2 %v4707_v52  ;;  %v5868_v52 = vld [vmem:[#allocation11_spill] sm:$0xff] }
 0x749   :  { %2164 = vmatpush.msra.mxu0 %v4681_v45  ;;  %v5220_v45 = vld [vmem:[#allocation5 + $0x1c8] sm:$0xff] }
 0x74a   :  { %2237 = vmatpush.msrb.mxu1 %v5105_v56  ;;  %2257 = vmatpush.msrb.mxu2 %v4718_v61 }
 0x74b   :  { %2165 = vmatpush.msra.mxu0 %v4691_v55  ;;  %v5230_v55 = vld [vmem:[#allocation5 + $0x198] sm:$0xff] }
 0x74c   :  { %2238 = vmatpush.msrb.mxu1 %v5113_v34  ;;  %2258 = vmatpush.msrb.mxu2 %v4739_v1  ;;  %5866 = vst [vmem:[#allocation26_spill] sm:$0xff] %v5230_v55 }
 0x74d   :  { %2166 = vmatpush.msra.mxu0 %v4702_v49  ;;  %v5235_v49 = vld [vmem:[#allocation5 + $0x180] sm:$0xff] }
 0x74e   :  { %2239 = vmatpush.msrb.mxu1 %v5118_v22  ;;  %2259 = vmatpush.msrb.mxu2 %v4748_v11  ;;  %5867 = vst [vmem:[#allocation34_spill] sm:$0xff] %v5235_v49 }
 0x74f   :  { %2167 = vmatpush.msra.mxu0 %v4709_v35  ;;  %v1368_v35 = vadd.f32 %v5868_v52, %v5856_v54 }
 0x750   :  { %2240 = vmatpush.msrb.mxu1 %v5123_v18  ;;  %2260 = vmatpush.msrb.mxu2 %v4764_v25 }
 0x751   :  { %2168 = vmatpush.msra.mxu0 %v4716_v42  ;;  %v5869_v42 = vld [vmem:[#allocation15_spill] sm:$0xff] }
 0x752   :  { %2241 = vmatpush.msrb.mxu1 %v5215_v27  ;;  %2261 = vmatpush.msrb.mxu2 %v4769_v59  ;;  %v1409_v61 = vadd.f32 %v5869_v42, %v1368_v35 }
 0x753   :  { %2169 = vmatpush.msra.mxu0 %v4720_v20 }
 0x754   :  { %2242 = vmatpush.msrb.mxu1 %v5220_v45  ;;  %2262 = vmatpush.msrb.mxu2 %v4785_v51 }
 0x755   :  { %2170 = vmatpush.msra.mxu0 %v4733_v0 }
 0x756   :  { %2243 = vmatpush.msrb.mxu1 %v5225_v39  ;;  %2263 = vmatpush.msrb.mxu2 %v4790_v38 }
 0x757   :  { %2171 = vmatpush.msra.mxu0 %v4741_v37  ;;  %v5870_v37 = vld [vmem:[#allocation23_spill] sm:$0xff] }
 0x758   :  { %2244 = vmatpush.msrb.mxu1 %v5230_v55  ;;  %2264 = vmatpush.msrb.mxu2 %v4808_v46 }
 0x759   :  { %2172 = vmatpush.msra.mxu0 %v4753_v24 }
 0x75a   :  { %2245 = vmatpush.msrb.mxu1 %v5235_v49  ;;  %2265 = vmatpush.msrb.mxu2 %v5855_v30 }
 0x7b7   :  { %v1908_v20 = vpop.f32.mrf.mxu0  ;;  %v1928_v0 = vpop.f32.mrf.mxu1 }
 0x7b8   :  { %v1954_v1 = vadd.f32 %v1908_v20, %v1409_v61  ;;  %v1974_v11 = vadd.f32 %v1928_v0, %v5870_v37 }
 0x7ba   :  { %v3036_v25 = vmul.f32 -1.442695, %v1954_v1  ;;  %v3037_v59 = vmul.f32 -1.442695, %v1974_v11 }
 0x7bc   :  { %3168 = vpow2.f32 %v3036_v25 }
 0x7bd   :  { %3170 = vpow2.f32 %v3037_v59 }
 0x7be   :  { %v1948_v8 = vpop.f32.mrf.mxu2 }
 0x7bf   :  { %v1994_v42 = vadd.f32 %v5045_v10, %v1948_v8  ;;  %v5299_v8 = vld [vmem:[#allocation5 + $0x208] sm:$0xff] }
 0x7c2   :  { %v3169_v24 = vpop.eup %3168 }
 0x7c3   :  { %v3171_v51 = vpop.eup %3170  ;;  %v1958_v38 = vadd.f32 1.0, %v3169_v24 }
 0x7c4   :  { %v1978_v46 = vadd.f32 1.0, %v3171_v51 }
 0x7c5   :  { %3172 = vrcp.f32 %v1958_v38  ;;  %v1970_v14 = vand.u32 2147483648, %v1958_v38  ;;  %v1968_v26 = vand.u32 2147483647, %v1958_v38  ;;  %vm1964_vm2 = vweird.f32 %v1958_v38 }
 0x7c6   :  { %3174 = vrcp.f32 %v1978_v46  ;;  %v1990_v0 = vand.u32 2147483648, %v1978_v46  ;;  %vm1984_vm6 = vweird.f32 %v1978_v46  ;;  %v1988_v37 = vand.u32 2147483647, %v1978_v46 }
 0x7c7   :  { %v1971_v52 = vor.u32 1.1754944e-38, %v1970_v14  ;;  %vm1969_vm4 = vcmp.eq.f32.partialorder %v1968_v26, 8.507059e+37  ;;  %v5285_v14 = vld [vmem:[#allocation5 + $0x238] sm:$0xff]  ;;  %v5292_v26 = vld [vmem:[#allocation5 + $0x220] sm:$0xff] }
 0x7c8   :  { %v1991_v59 = vor.u32 1.1754944e-38, %v1990_v0  ;;  %vm1989_vm8 = vcmp.eq.f32.partialorder %v1988_v37, 8.507059e+37  ;;  %v5324_v0 = vld [vmem:[#allocation5 + $0x1b8] sm:$0xff]  ;;  %v5331_v37 = vld [vmem:[#allocation5 + $0x1a0] sm:$0xff] }
 0x7c9   :  { %5871 = vst [vmem:[#allocation11_spill] sm:$0xff] %v5324_v0 }
 0x7ca   :  { %5873 = vst [vmem:[#allocation23_spill] sm:$0xff] %v5331_v37 }
 0x7cb   :  { %v3173_v30 = vpop.eup %3172 }
 0x7cc   :  { %v3175_v33 = vpop.eup %3174  ;;  %v1960_v44 = vmul.f32 %v3173_v30, %v1958_v38  ;;  %vm1965_vm1 = vweird.f32 %v3173_v30 }
 0x7cd   :  { %v1980_v17 = vmul.f32 %v3175_v33, %v1978_v46  ;;  %vm1966_vm3 = vmor %vm1964_vm2, %vm1965_vm1  ;;  %vm1985_vm5 = vweird.f32 %v3175_v33  ;;  %v5270_v46 = vld [vmem:[#allocation5 + $0x278] sm:$0xff] }
 0x7ce   :  { %v1961_v29 = vsub.f32 1.0, %v1960_v44  ;;  %vm1986_vm7 = vmor %vm1984_vm6, %vm1985_vm5 }
 0x7cf   :  { %v1981_v48 = vsub.f32 1.0, %v1980_v17 }
 0x7d0   :  { %v1962_v23 = vmul.f32 %v3173_v30, %v1961_v29  ;;  %v5278_v29 = vld [vmem:[#allocation5 + $0x250] sm:$0xff] }
 0x7d1   :  { %v1982_v60 = vmul.f32 %v3175_v33, %v1981_v48  ;;  %v5282_v48 = vld [vmem:[#allocation5 + $0x248] sm:$0xff] }
 0x7d2   :  { %v1963_v15 = vadd.f32 %v3173_v30, %v1962_v23  ;;  %v5289_v23 = vld [vmem:[#allocation5 + $0x230] sm:$0xff] }
 0x7d3   :  { %v1983_v61 = vadd.f32 %v3175_v33, %v1982_v60  ;;  %v5296_v60 = vld [vmem:[#allocation5 + $0x218] sm:$0xff] }
 0x7d4   :  { %v1967_v35 = vsel %vm1966_vm3, %v3173_v30, %v1963_v15  ;;  %v5303_v15 = vld [vmem:[#allocation5 + $0x200] sm:$0xff] }
 0x7d5   :  { %v1972_v20 = vsel %vm1969_vm4, %v1971_v52, %v1967_v35  ;;  %v1987_v25 = vsel %vm1986_vm7, %v3175_v33, %v1983_v61  ;;  %v5275_v33 = vld [vmem:[#allocation5 + $0x260] sm:$0xff]  ;;  %v5306_v52 = vld [vmem:[#allocation5 + $0x1f0] sm:$0xff]  ;;  %v5310_v35 = vld [vmem:[#allocation5 + $0x1e8] sm:$0xff] }
 0x7d6   :  { %v1995_v1 = vmul.f32 %v1994_v42, %v1972_v20  ;;  %v1992_v24 = vsel %vm1989_vm8, %v1991_v59, %v1987_v25  ;;  %v5313_v42 = vld [vmem:[#allocation5 + $0x1d8] sm:$0xff]  ;;  %v5317_v61 = vld [vmem:[#allocation5 + $0x1d0] sm:$0xff]  ;;  %v5320_v20 = vld [vmem:[#allocation5 + $0x1c0] sm:$0xff] }
 0x7d7   :  { %v1998_v51 = vsub.f32 1.0, %v1992_v24  ;;  %v2000_v44 = vmul.f32 %v1992_v24, %v5154_v12  ;;  %v5338_v25 = vld [vmem:[#allocation5 + $0x188] sm:$0xff]  ;;  %v5876_v24 = vld [vmem:[#allocation16_spill] sm:$0xff] }
 0x7d8   :  { %v1996_v11 = vadd.f32 %v1995_v1, %v5053_v13  ;;  %v5265_v13 = vld [vmem:[#allocation5 + $0x290] sm:$0xff]  ;;  %v5327_v1 = vld [vmem:[#allocation5 + $0x1a8] sm:$0xff]  ;;  %5875 = vst [vmem:[#allocation40_spill] sm:$0xff] %v5338_v25 }
 0x7d9   :  { %5872 = vst [vmem:[#allocation15_spill] sm:$0xff] %v5327_v1 }
 0x7da   :  { %3176 = vtanh.f32 %v1996_v11  ;;  %v5334_v11 = vld [vmem:[#allocation5 + $0x190] sm:$0xff] }
 0x7db   :  { %5874 = vst [vmem:[#allocation39_spill] sm:$0xff] %v5334_v11 }
 0x7e0   :  { %v3177_v38 = vpop.eup %3176 }
 0x7e1   :  { %v1999_v30 = vmul.f32 %v3177_v38, %v1998_v51  ;;  %v5877_v38 = vld [vmem:[#allocation9_spill] sm:$0xff] }
 0x7e3   :  { %v5246_v17 = vadd.f32 %v2000_v44, %v1999_v30  ;;  %v1371_v30 = vadd.f32 %v5877_v38, %v5856_v54 }
 0x7e5   :  { %2020 = vmatmul.f32.vlgmr.msra.gmra.mxu3 %v5246_v17  ;;  %2040 = vmatmul.f32.vlgmr.msrb.gmra.mxu0 %v5246_v17  ;;  %v1412_v63 = vadd.f32 %v5878_v7, %v1371_v30 }
 0x7e6   :  { %2060 = vmatmul.f32.vlgmr.msra.gmra.mxu1 %v5246_v17  ;;  %2270 = vmatpush.msra.mxu3 %v5159_v16 }
 0x7e7   :  { %2343 = vmatpush.msrb.mxu0 %v5067_v62  ;;  %2363 = vmatpush.msra.mxu1 %v5163_v3 }
 0x7e8   :  { %2271 = vmatpush.msra.mxu3 %v5166_v40 }
 0x7e9   :  { %2344 = vmatpush.msrb.mxu0 %v5072_v57  ;;  %2364 = vmatpush.msra.mxu1 %v5170_v43 }
 0x7ea   :  { %2272 = vmatpush.msra.mxu3 %v5173_v58 }
 0x7eb   :  { %2345 = vmatpush.msrb.mxu0 %v5077_v32  ;;  %2365 = vmatpush.msra.mxu1 %v5177_v50 }
 0x7ec   :  { %2273 = vmatpush.msra.mxu3 %v5180_v28 }
 0x7ed   :  { %2346 = vmatpush.msrb.mxu0 %v5082_v41  ;;  %2366 = vmatpush.msra.mxu1 %v5184_v31 }
 0x7ee   :  { %2274 = vmatpush.msra.mxu3 %v5187_v53 }
 0x7ef   :  { %2347 = vmatpush.msrb.mxu0 %v5090_v4  ;;  %2367 = vmatpush.msra.mxu1 %v5265_v13 }
 0x7f0   :  { %2275 = vmatpush.msra.mxu3 %v5192_v47 }
 0x7f1   :  { %2348 = vmatpush.msrb.mxu0 %v5095_v36  ;;  %2368 = vmatpush.msra.mxu1 %v5270_v46 }
 0x7f2   :  { %2276 = vmatpush.msra.mxu3 %v5197_v2 }
 0x7f3   :  { %2349 = vmatpush.msrb.mxu0 %v5100_v19  ;;  %2369 = vmatpush.msra.mxu1 %v5275_v33 }
 0x7f4   :  { %2277 = vmatpush.msra.mxu3 %v5278_v29 }
 0x7f5   :  { %2350 = vmatpush.msrb.mxu0 %v5105_v56  ;;  %2370 = vmatpush.msra.mxu1 %v5282_v48 }
 0x7f6   :  { %2278 = vmatpush.msra.mxu3 %v5285_v14 }
 0x7f7   :  { %2351 = vmatpush.msrb.mxu0 %v5113_v34  ;;  %2371 = vmatpush.msra.mxu1 %v5289_v23 }
 0x7f8   :  { %2279 = vmatpush.msra.mxu3 %v5292_v26 }
 0x7f9   :  { %2352 = vmatpush.msrb.mxu0 %v5118_v22  ;;  %2372 = vmatpush.msra.mxu1 %v5296_v60 }
 0x7fa   :  { %2280 = vmatpush.msra.mxu3 %v5299_v8 }
 0x7fb   :  { %2353 = vmatpush.msrb.mxu0 %v5123_v18  ;;  %2373 = vmatpush.msra.mxu1 %v5303_v15 }
 0x7fc   :  { %2281 = vmatpush.msra.mxu3 %v5306_v52 }
 0x7fd   :  { %2354 = vmatpush.msrb.mxu0 %v5215_v27  ;;  %2374 = vmatpush.msra.mxu1 %v5310_v35 }
 0x7fe   :  { %2282 = vmatpush.msra.mxu3 %v5313_v42 }
 0x7ff   :  { %2355 = vmatpush.msrb.mxu0 %v5220_v45  ;;  %2375 = vmatpush.msra.mxu1 %v5317_v61 }
 0x800   :  { %2283 = vmatpush.msra.mxu3 %v5320_v20 }
 0x801   :  { %2356 = vmatpush.msrb.mxu0 %v5225_v39  ;;  %2376 = vmatpush.msra.mxu1 %v5324_v0 }
 0x802   :  { %2284 = vmatpush.msra.mxu3 %v5327_v1 }
 0x803   :  { %2357 = vmatpush.msrb.mxu0 %v5230_v55  ;;  %2377 = vmatpush.msra.mxu1 %v5331_v37 }
 0x804   :  { %2285 = vmatpush.msra.mxu3 %v5334_v11 }
 0x805   :  { %2358 = vmatpush.msrb.mxu0 %v5235_v49  ;;  %2378 = vmatpush.msra.mxu1 %v5338_v25 }
 0x862   :  { %v2041_v59 = vpop.f32.mrf.mxu0 }
 0x863   :  { %v2087_v51 = vadd.f32 %v2041_v59, %v5876_v24 }
 0x865   :  { %v3039_v44 = vmul.f32 -1.442695, %v2087_v51 }
 0x867   :  { %3178 = vpow2.f32 %v3039_v44 }
 0x868   :  { %v2021_v12 = vpop.f32.mrf.mxu3 }
 0x869   :  { %v2067_v5 = vadd.f32 %v2021_v12, %v1412_v63  ;;  %v2061_v63 = vpop.f32.mrf.mxu1 }
 0x86b   :  { %v3038_v9 = vmul.f32 -1.442695, %v2067_v5 }
 0x86d   :  { %v3179_v6 = vpop.eup %3178  ;;  %3180 = vpow2.f32 %v3038_v9  ;;  %v2107_v9 = vadd.f32 %v5045_v10, %v2061_v63 }
 0x86e   :  { %v2091_v49 = vadd.f32 1.0, %v3179_v6 }
 0x870   :  { %3182 = vrcp.f32 %v2091_v49  ;;  %v2103_v0 = vand.u32 2147483648, %v2091_v49  ;;  %vm2097_vm14 = vweird.f32 %v2091_v49 }
 0x872   :  { %v2104_v39 = vor.u32 1.1754944e-38, %v2103_v0 }
 0x873   :  { %v3181_v11 = vpop.eup %3180 }
 0x874   :  { %v2071_v37 = vadd.f32 1.0, %v3181_v11 }
 0x876   :  { %3184 = vrcp.f32 %v2071_v37  ;;  %v3183_v25 = vpop.eup %3182  ;;  %v2083_v51 = vand.u32 2147483648, %v2071_v37  ;;  %v2081_v7 = vand.u32 2147483647, %v2071_v37  ;;  %vm2077_vm10 = vweird.f32 %v2071_v37 }
 0x877   :  { %v2093_v55 = vmul.f32 %v3183_v25, %v2091_v49  ;;  %vm2098_vm13 = vweird.f32 %v3183_v25 }
 0x878   :  { %v2084_v6 = vor.u32 1.1754944e-38, %v2083_v51  ;;  %vm2082_vm12 = vcmp.eq.f32.partialorder %v2081_v7, 8.507059e+37  ;;  %vm2099_vm15 = vmor %vm2097_vm14, %vm2098_vm13 }
 0x879   :  { %v2094_v1 = vsub.f32 1.0, %v2093_v55 }
 0x87b   :  { %v2095_v30 = vmul.f32 %v3183_v25, %v2094_v1 }
 0x87c   :  { %v3185_v59 = vpop.eup %3184 }
 0x87d   :  { %v2073_v24 = vmul.f32 %v3185_v59, %v2071_v37  ;;  %vm2078_vm9 = vweird.f32 %v3185_v59  ;;  %v2096_v11 = vadd.f32 %v3183_v25, %v2095_v30 }
 0x87e   :  { %vm2079_vm11 = vmor %vm2077_vm10, %vm2078_vm9 }
 0x87f   :  { %v2074_v38 = vsub.f32 1.0, %v2073_v24  ;;  %v2101_v24 = vand.u32 2147483647, %v2091_v49  ;;  %v2100_v1 = vsel %vm2099_vm15, %v3183_v25, %v2096_v11 }
 0x881   :  { %v2075_v54 = vmul.f32 %v3185_v59, %v2074_v38  ;;  %vm2102_vm0 = vcmp.eq.f32.partialorder %v2101_v24, 8.507059e+37 }
 0x883   :  { %v2076_v5 = vadd.f32 %v3185_v59, %v2075_v54  ;;  %v2105_v54 = vsel %vm2102_vm0, %v2104_v39, %v2100_v1 }
 0x884   :  { %v2111_v37 = vsub.f32 1.0, %v2105_v54 }
 0x885   :  { %v2080_v12 = vsel %vm2079_vm11, %v3185_v59, %v2076_v5  ;;  %v2113_v59 = vmul.f32 %v2105_v54, %v5246_v17 }
 0x886   :  { %v2085_v44 = vsel %vm2082_vm12, %v2084_v6, %v2080_v12 }
 0x887   :  { %v2108_v55 = vmul.f32 %v2107_v9, %v2085_v44 }
 0x889   :  { %v2109_v38 = vadd.f32 %v2108_v55, %v5056_v21  ;;  %v5879_v21 = vld [vmem:[#allocation12_spill] sm:$0xff] }
 0x88b   :  { %3186 = vtanh.f32 %v2109_v38 }
 0x891   :  { %v3187_v51 = vpop.eup %3186 }
 0x892   :  { %v2112_v7 = vmul.f32 %v3187_v51, %v2111_v37  ;;  %v5891_v51 = vld [vmem:[#allocation36_spill] sm:$0xff] }
 0x894   :  { %v5348_v30 = vadd.f32 %v2113_v59, %v2112_v7 }
 0x896   :  { %2133 = vmatmul.f32.vlgmr.msra.gmra.mxu2 %v5348_v30  ;;  %2153 = vmatmul.f32.vlgmr.msrb.gmra.mxu3 %v5348_v30 }
 0x897   :  { %2173 = vmatmul.f32.vlgmr.msra.gmra.mxu0 %v5348_v30  ;;  %2383 = vmatpush.msra.mxu2 %v5159_v16 }
 0x898   :  { %2456 = vmatpush.msrb.mxu3 %v5067_v62  ;;  %2476 = vmatpush.msra.mxu0 %v5163_v3  ;;  %v5880_v62 = vld [vmem:[#allocation11_spill] sm:$0xff] }
 0x899   :  { %2384 = vmatpush.msra.mxu2 %v5166_v40 }
 0x89a   :  { %2457 = vmatpush.msrb.mxu3 %v5072_v57  ;;  %2477 = vmatpush.msra.mxu0 %v5170_v43  ;;  %v5881_v57 = vld [vmem:[#allocation15_spill] sm:$0xff] }
 0x89b   :  { %2385 = vmatpush.msra.mxu2 %v5173_v58 }
 0x89c   :  { %2458 = vmatpush.msrb.mxu3 %v5077_v32  ;;  %2478 = vmatpush.msra.mxu0 %v5177_v50  ;;  %v5882_v32 = vld [vmem:[#allocation26_spill] sm:$0xff] }
 0x89d   :  { %2386 = vmatpush.msra.mxu2 %v5180_v28 }
 0x89e   :  { %2459 = vmatpush.msrb.mxu3 %v5082_v41  ;;  %2479 = vmatpush.msra.mxu0 %v5184_v31  ;;  %v5883_v41 = vld [vmem:[#allocation23_spill] sm:$0xff] }
 0x89f   :  { %2387 = vmatpush.msra.mxu2 %v5187_v53 }
 0x8a0   :  { %2460 = vmatpush.msrb.mxu3 %v5090_v4  ;;  %2480 = vmatpush.msra.mxu0 %v5265_v13  ;;  %v5884_v4 = vld [vmem:[#allocation39_spill] sm:$0xff] }
 0x8a1   :  { %2388 = vmatpush.msra.mxu2 %v5192_v47 }
 0x8a2   :  { %2461 = vmatpush.msrb.mxu3 %v5095_v36  ;;  %2481 = vmatpush.msra.mxu0 %v5270_v46  ;;  %v5885_v36 = vld [vmem:[#allocation34_spill] sm:$0xff] }
 0x8a3   :  { %2389 = vmatpush.msra.mxu2 %v5197_v2 }
 0x8a4   :  { %2462 = vmatpush.msrb.mxu3 %v5100_v19  ;;  %2482 = vmatpush.msra.mxu0 %v5275_v33  ;;  %v5886_v19 = vld [vmem:[#allocation40_spill] sm:$0xff] }
 0x8a5   :  { %2390 = vmatpush.msra.mxu2 %v5278_v29 }
 0x8a6   :  { %2463 = vmatpush.msrb.mxu3 %v5105_v56  ;;  %2483 = vmatpush.msra.mxu0 %v5282_v48  ;;  %v5887_v56 = vld [vmem:[#allocation25_spill] sm:$0xff] }
 0x8a7   :  { %2391 = vmatpush.msra.mxu2 %v5285_v14 }
 0x8a8   :  { %2464 = vmatpush.msrb.mxu3 %v5113_v34  ;;  %2484 = vmatpush.msra.mxu0 %v5289_v23  ;;  %v5888_v34 = vld [vmem:[#allocation14_spill] sm:$0xff] }
 0x8a9   :  { %2392 = vmatpush.msra.mxu2 %v5292_v26 }
 0x8aa   :  { %2465 = vmatpush.msrb.mxu3 %v5118_v22  ;;  %2485 = vmatpush.msra.mxu0 %v5296_v60  ;;  %v1374_v22 = vadd.f32 %v5888_v34, %v5887_v56  ;;  %v5894_v34 = vld [vmem:[#allocation29_spill] sm:$0xff] }
 0x8ab   :  { %2393 = vmatpush.msra.mxu2 %v5299_v8 }
 0x8ac   :  { %2466 = vmatpush.msrb.mxu3 %v5123_v18  ;;  %2486 = vmatpush.msra.mxu0 %v5303_v15  ;;  %v5889_v18 = vld [vmem:[#allocation18_spill] sm:$0xff] }
 0x8ad   :  { %2394 = vmatpush.msra.mxu2 %v5306_v52  ;;  %v1415_v3 = vadd.f32 %v5889_v18, %v1374_v22  ;;  %v2592_v18 = vld [vmem:[%s5711_s6 + $0x38] sm:$0xff] }
 0x8ae   :  { %2467 = vmatpush.msrb.mxu3 %v5215_v27  ;;  %2487 = vmatpush.msra.mxu0 %v5310_v35  ;;  %v5890_v27 = vld [vmem:[#allocation28_spill] sm:$0xff] }
 0x8af   :  { %2395 = vmatpush.msra.mxu2 %v5313_v42 }
 0x8b0   :  { %2468 = vmatpush.msrb.mxu3 %v5220_v45  ;;  %2488 = vmatpush.msra.mxu0 %v5317_v61 }
 0x8b1   :  { %2396 = vmatpush.msra.mxu2 %v5320_v20 }
 0x8b2   :  { %2469 = vmatpush.msrb.mxu3 %v5879_v21  ;;  %2489 = vmatpush.msra.mxu0 %v5880_v62 }
 0x8b3   :  { %2397 = vmatpush.msra.mxu2 %v5881_v57 }
 0x8b4   :  { %2470 = vmatpush.msrb.mxu3 %v5882_v32  ;;  %2490 = vmatpush.msra.mxu0 %v5883_v41 }
 0x8b5   :  { %2398 = vmatpush.msra.mxu2 %v5884_v4 }
 0x8b6   :  { %2471 = vmatpush.msrb.mxu3 %v5885_v36  ;;  %2491 = vmatpush.msra.mxu0 %v5886_v19 }
 0x914   :  { %v2174_v6 = vpop.f32.mrf.mxu0 }
 0x915   :  { %v2220_v44 = vadd.f32 %v5045_v10, %v2174_v6 }
 0x919   :  { %v2134_v43 = vpop.f32.mrf.mxu2  ;;  %v2154_v50 = vpop.f32.mrf.mxu3 }
 0x91a   :  { %v2180_v31 = vadd.f32 %v2134_v43, %v1415_v3  ;;  %v2200_v45 = vadd.f32 %v2154_v50, %v5890_v27  ;;  %v2591_v43 = vld [vmem:[%s5711_s6 + $0x30] sm:$0xff] }
 0x91c   :  { %v3040_v39 = vmul.f32 -1.442695, %v2180_v31  ;;  %v3041_v49 = vmul.f32 -1.442695, %v2200_v45  ;;  %v2590_v31 = vld [vmem:[%s5711_s6 + $0x28] sm:$0xff]  ;;  %v2589_v45 = vld [vmem:[%s5711_s6 + $0x20] sm:$0xff] }
 0x91e   :  { %3188 = vpow2.f32 %v3040_v39  ;;  %v2588_v39 = vld [vmem:[%s5711_s6 + $0x18] sm:$0xff] }
 0x91f   :  { %3190 = vpow2.f32 %v3041_v49  ;;  %v2587_v49 = vld [vmem:[%s5711_s6 + $0x10] sm:$0xff] }
 0x924   :  { %v3189_v13 = vpop.eup %3188 }
 0x925   :  { %v3191_v46 = vpop.eup %3190  ;;  %v2184_v33 = vadd.f32 1.0, %v3189_v13 }
 0x926   :  { %v2204_v48 = vadd.f32 1.0, %v3191_v46  ;;  %v2586_v46 = vld [vmem:[%s5711_s6 + $0x8] sm:$0xff] }
 0x927   :  { %3192 = vrcp.f32 %v2184_v33  ;;  %v2196_v0 = vand.u32 2147483648, %v2184_v33  ;;  %v2194_v5 = vand.u32 2147483647, %v2184_v33  ;;  %vm2190_vm2 = vweird.f32 %v2184_v33 }
 0x928   :  { %3194 = vrcp.f32 %v2204_v48  ;;  %v2216_v54 = vand.u32 2147483648, %v2204_v48  ;;  %vm2210_vm6 = vweird.f32 %v2204_v48  ;;  %v2214_v37 = vand.u32 2147483647, %v2204_v48 }
 0x929   :  { %v2197_v11 = vor.u32 1.1754944e-38, %v2196_v0  ;;  %vm2195_vm4 = vcmp.eq.f32.partialorder %v2194_v5, 8.507059e+37 }
 0x92a   :  { %v2217_v21 = vor.u32 1.1754944e-38, %v2216_v54  ;;  %vm2215_vm8 = vcmp.eq.f32.partialorder %v2214_v37, 8.507059e+37 }
 0x92d   :  { %v3193_v23 = vpop.eup %3192 }
 0x92e   :  { %v3195_v60 = vpop.eup %3194  ;;  %v2186_v15 = vmul.f32 %v3193_v23, %v2184_v33  ;;  %vm2191_vm1 = vweird.f32 %v3193_v23 }
 0x92f   :  { %v2206_v35 = vmul.f32 %v3195_v60, %v2204_v48  ;;  %vm2192_vm3 = vmor %vm2190_vm2, %vm2191_vm1  ;;  %vm2211_vm5 = vweird.f32 %v3195_v60  ;;  %v2585_v48 = vld [vmem:[%s5711_s6] sm:$0xff] }
 0x930   :  { %v2187_v61 = vsub.f32 1.0, %v2186_v15  ;;  %vm2212_vm7 = vmor %vm2210_vm6, %vm2211_vm5 }
 0x931   :  { %v2207_v25 = vsub.f32 1.0, %v2206_v35 }
 0x932   :  { %v2188_v63 = vmul.f32 %v3193_v23, %v2187_v61 }
 0x933   :  { %v2208_v9 = vmul.f32 %v3195_v60, %v2207_v25 }
 0x934   :  { %v2189_v12 = vadd.f32 %v3193_v23, %v2188_v63 }
 0x935   :  { %v2209_v38 = vadd.f32 %v3195_v60, %v2208_v9 }
 0x936   :  { %v2193_v55 = vsel %vm2192_vm3, %v3193_v23, %v2189_v12 }
 0x937   :  { %v2198_v24 = vsel %vm2195_vm4, %v2197_v11, %v2193_v55  ;;  %v2213_v7 = vsel %vm2212_vm7, %v3195_v60, %v2209_v38 }
 0x938   :  { %v2221_v1 = vmul.f32 %v2220_v44, %v2198_v24  ;;  %v2218_v62 = vsel %vm2215_vm8, %v2217_v21, %v2213_v7  ;;  %v5484_v44 = vld [vmem:[%s5710_s5 + $0x1] ss:$0 sm:$0xff] }
 0x939   :  { %v2224_v32 = vsub.f32 1.0, %v2218_v62  ;;  %v2226_v36 = vmul.f32 %v2218_v62, %v5348_v30 }
 0x93a   :  { %v2222_v59 = vadd.f32 %v2221_v1, %v5891_v51 }
 0x93c   :  { %3196 = vtanh.f32 %v2222_v59  ;;  %v5895_v59 = vld [vmem:[#allocation37_spill] sm:$0xff] }
 0x942   :  { %v3197_v41 = vpop.eup %3196 }
 0x943   :  { %v2225_v10 = vmul.f32 %v3197_v41, %v2224_v32 }
 0x945   :  { %v5408_v19 = vadd.f32 %v2226_v36, %v2225_v10 }
 0x947   :  { %2246 = vmatmul.f32.vlgmr.msrb.gmra.mxu1 %v5408_v19  ;;  %2266 = vmatmul.f32.vlgmr.msrb.gmra.mxu2 %v5408_v19 }
 0x948   :  { %2286 = vmatmul.f32.vlgmr.msra.gmra.mxu3 %v5408_v19  ;;  %2496 = vmatpush.msrb.mxu1 %v5159_v16  ;;  %v2600_v16 = vld [vmem:[%s5711_s6 + $0x78] sm:$0xff] }
 0x949   :  { %2621 = vmatpush.msrb.mxu2 %v2600_v16 }
 0x94a   :  { %2497 = vmatpush.msrb.mxu1 %v5166_v40  ;;  %v2599_v40 = vld [vmem:[%s5711_s6 + $0x70] sm:$0xff] }
 0x94b   :  { %2622 = vmatpush.msrb.mxu2 %v2599_v40 }
 0x94c   :  { %2498 = vmatpush.msrb.mxu1 %v5173_v58  ;;  %v2598_v58 = vld [vmem:[%s5711_s6 + $0x68] sm:$0xff] }
 0x94d   :  { %2623 = vmatpush.msrb.mxu2 %v2598_v58  ;;  %v5896_v58 = vld [vmem:[#allocation35_spill] sm:$0xff] }
 0x94e   :  { %2499 = vmatpush.msrb.mxu1 %v5180_v28  ;;  %v5892_v28 = vld [vmem:[#allocation17_spill] sm:$0xff] }
 0x950   :  { %2500 = vmatpush.msrb.mxu1 %v5187_v53  ;;  %v1377_v53 = vadd.f32 %v5892_v28, %v5887_v56  ;;  %v5897_v28 = vld [vmem:[#allocation8_spill] sm:$0xff] }
 0x952   :  { %2501 = vmatpush.msrb.mxu1 %v5192_v47  ;;  %v2597_v47 = vld [vmem:[%s5711_s6 + $0x60] sm:$0xff] }
 0x953   :  { %2624 = vmatpush.msrb.mxu2 %v2597_v47 }
 0x954   :  { %2502 = vmatpush.msrb.mxu1 %v5197_v2  ;;  %v5893_v2 = vld [vmem:[#allocation30_spill] sm:$0xff] }
 0x956   :  { %2503 = vmatpush.msrb.mxu1 %v5278_v29  ;;  %v1418_v29 = vadd.f32 %v5893_v2, %v1377_v53  ;;  %v5898_v53 = vld [vmem:[#allocation21_spill] sm:$0xff]  ;;  %v5899_v2 = vld [vmem:[#allocation22_spill] sm:$0xff] }
 0x957   :  { %v1380_v47 = vadd.f32 %v5898_v53, %v5887_v56 }
 0x958   :  { %2504 = vmatpush.msrb.mxu1 %v5285_v14  ;;  %v2596_v14 = vld [vmem:[%s5711_s6 + $0x58] sm:$0xff] }
 0x959   :  { %2625 = vmatpush.msrb.mxu2 %v2596_v14 }
 0x95a   :  { %2505 = vmatpush.msrb.mxu1 %v5292_v26 }
 0x95c   :  { %2506 = vmatpush.msrb.mxu1 %v5299_v8 }
 0x95e   :  { %2507 = vmatpush.msrb.mxu1 %v5306_v52  ;;  %v2595_v52 = vld [vmem:[%s5711_s6 + $0x50] sm:$0xff] }
 0x95f   :  { %2626 = vmatpush.msrb.mxu2 %v2595_v52  ;;  %v5902_v52 = vld [vmem:[#allocation20_spill] sm:$0xff] }
 0x960   :  { %2508 = vmatpush.msrb.mxu1 %v5313_v42 }
 0x962   :  { %2509 = vmatpush.msrb.mxu1 %v5320_v20  ;;  %v2594_v20 = vld [vmem:[%s5711_s6 + $0x48] sm:$0xff] }
 0x963   :  { %2627 = vmatpush.msrb.mxu2 %v2594_v20 }
 0x964   :  { %2510 = vmatpush.msrb.mxu1 %v5881_v57  ;;  %v2593_v57 = vld [vmem:[%s5711_s6 + $0x40] sm:$0xff] }
 0x965   :  { %2628 = vmatpush.msrb.mxu2 %v2593_v57 }
 0x966   :  { %2511 = vmatpush.msrb.mxu1 %v5884_v4 }
 0x967   :  { %2629 = vmatpush.msrb.mxu2 %v2592_v18 }
 0x969   :  { %2630 = vmatpush.msrb.mxu2 %v2591_v43 }
 0x96b   :  { %2631 = vmatpush.msrb.mxu2 %v2590_v31 }
 0x96d   :  { %2632 = vmatpush.msrb.mxu2 %v2589_v45 }
 0x96f   :  { %2633 = vmatpush.msrb.mxu2 %v2588_v39 }
 0x971   :  { %2634 = vmatpush.msrb.mxu2 %v2587_v49 }
 0x973   :  { %2635 = vmatpush.msrb.mxu2 %v2586_v46 }
 0x975   :  { %2636 = vmatpush.msrb.mxu2 %v2585_v48 }
 0x9c4   :  { %v2247_v26 = vpop.f32.mrf.mxu1 }
 0x9c5   :  { %v2293_v8 = vadd.f32 %v2247_v26, %v1418_v29  ;;  %v5900_v29 = vld [vmem:[#allocation10_spill] sm:$0xff]  ;;  %v5901_v26 = vld [vmem:[#allocation31_spill] sm:$0xff] }
 0x9c6   :  { %v1462_v14 = vadd.f32 %v5900_v29, %v5899_v2  ;;  %v2609_v29 = vld [vmem:[%s5711_s6 + $0xc0] sm:$0xff] }
 0x9c7   :  { %v3042_v42 = vmul.f32 -1.442695, %v2293_v8 }
 0x9c8   :  { %v1503_v8 = vadd.f32 %v5901_v26, %v1462_v14  ;;  %v2608_v14 = vld [vmem:[%s5711_s6 + $0xb8] sm:$0xff]  ;;  %v2607_v26 = vld [vmem:[%s5711_s6 + $0xb0] sm:$0xff] }
 0x9c9   :  { %3198 = vpow2.f32 %v3042_v42  ;;  %v1421_v42 = vadd.f32 %v5902_v52, %v1380_v47  ;;  %v2610_v47 = vld [vmem:[%s5711_s6 + $0xc8] sm:$0xff] }
 0x9ca   :  { %v2267_v4 = vpop.f32.mrf.mxu2  ;;  %v5905_v52 = vld [vmem:[#allocation33_spill] sm:$0xff] }
 0x9cb   :  { %v2313_v22 = vadd.f32 %v2267_v4, %v5894_v34  ;;  %v2287_v63 = vpop.f32.mrf.mxu3 }
 0x9cc   :  { %v2333_v55 = vadd.f32 %v5484_v44, %v2287_v63 }
 0x9cd   :  { %v3043_v3 = vmul.f32 -1.442695, %v2313_v22 }
 0x9cf   :  { %v3199_v50 = vpop.eup %3198  ;;  %3200 = vpow2.f32 %v3043_v3 }
 0x9d0   :  { %v2297_v27 = vadd.f32 1.0, %v3199_v50 }
 0x9d2   :  { %3202 = vrcp.f32 %v2297_v27  ;;  %v2309_v35 = vand.u32 2147483648, %v2297_v27  ;;  %v2307_v0 = vand.u32 2147483647, %v2297_v27  ;;  %vm2303_vm10 = vweird.f32 %v2297_v27 }
 0x9d4   :  { %v2310_v9 = vor.u32 1.1754944e-38, %v2309_v35  ;;  %vm2308_vm12 = vcmp.eq.f32.partialorder %v2307_v0, 8.507059e+37 }
 0x9d5   :  { %v3201_v13 = vpop.eup %3200 }
 0x9d6   :  { %v2317_v33 = vadd.f32 1.0, %v3201_v13 }
 0x9d8   :  { %v3203_v23 = vpop.eup %3202  ;;  %3204 = vrcp.f32 %v2317_v33  ;;  %v2329_v1 = vand.u32 2147483648, %v2317_v33  ;;  %v2327_v37 = vand.u32 2147483647, %v2317_v33  ;;  %vm2323_vm14 = vweird.f32 %v2317_v33 }
 0x9d9   :  { %v2299_v60 = vmul.f32 %v3203_v23, %v2297_v27  ;;  %vm2304_vm9 = vweird.f32 %v3203_v23 }
 0x9da   :  { %vm2305_vm11 = vmor %vm2303_vm10, %vm2304_vm9  ;;  %v2330_v21 = vor.u32 1.1754944e-38, %v2329_v1  ;;  %vm2328_vm0 = vcmp.eq.f32.partialorder %v2327_v37, 8.507059e+37 }
 0x9db   :  { %v2300_v15 = vsub.f32 1.0, %v2299_v60 }
 0x9dd   :  { %v2301_v61 = vmul.f32 %v3203_v23, %v2300_v15 }
 0x9de   :  { %v3205_v25 = vpop.eup %3204 }
 0x9df   :  { %v2319_v5 = vmul.f32 %v3205_v25, %v2317_v33  ;;  %v2302_v6 = vadd.f32 %v3203_v23, %v2301_v61  ;;  %vm2324_vm13 = vweird.f32 %v3205_v25 }
 0x9e0   :  { %vm2325_vm15 = vmor %vm2323_vm14, %vm2324_vm13 }
 0x9e1   :  { %v2320_v12 = vsub.f32 1.0, %v2319_v5  ;;  %v2306_v11 = vsel %vm2305_vm11, %v3203_v23, %v2302_v6 }
 0x9e2   :  { %v2311_v24 = vsel %vm2308_vm12, %v2310_v9, %v2306_v11 }
 0x9e3   :  { %v2321_v38 = vmul.f32 %v3205_v25, %v2320_v12  ;;  %v2334_v54 = vmul.f32 %v2333_v55, %v2311_v24  ;;  %v5903_v12 = vld [vmem:[#allocation38_spill] sm:$0xff] }
 0x9e5   :  { %v2322_v51 = vadd.f32 %v3205_v25, %v2321_v38  ;;  %v2335_v7 = vadd.f32 %v2334_v54, %v5895_v59 }
 0x9e7   :  { %v2326_v62 = vsel %vm2325_vm15, %v3205_v25, %v2322_v51  ;;  %3206 = vtanh.f32 %v2335_v7  ;;  %v2616_v7 = vld [vmem:[%s5711_s6 + $0xf8] sm:$0xff] }
 0x9e8   :  { %v2331_v32 = vsel %vm2328_vm0, %v2330_v21, %v2326_v62  ;;  %2662 = vmatpush.msra.mxu3 %v2616_v7  ;;  %v2615_v21 = vld [vmem:[%s5711_s6 + $0xf0] sm:$0xff]  ;;  %v2614_v62 = vld [vmem:[%s5711_s6 + $0xe8] sm:$0xff] }
 0x9e9   :  { %v2337_v41 = vsub.f32 1.0, %v2331_v32  ;;  %v2339_v16 = vmul.f32 %v2331_v32, %v5408_v19  ;;  %v2613_v32 = vld [vmem:[%s5711_s6 + $0xe0] sm:$0xff] }
 0x9ea   :  { %2663 = vmatpush.msra.mxu3 %v2615_v21 }
 0x9ec   :  { %2664 = vmatpush.msra.mxu3 %v2614_v62 }
 0x9ed   :  { %v3207_v10 = vpop.eup %3206 }
 0x9ee   :  { %v2338_v36 = vmul.f32 %v3207_v10, %v2337_v41  ;;  %2665 = vmatpush.msra.mxu3 %v2613_v32  ;;  %v2612_v41 = vld [vmem:[%s5711_s6 + $0xd8] sm:$0xff]  ;;  %v2611_v10 = vld [vmem:[%s5711_s6 + $0xd0] sm:$0xff] }
 0x9f0   :  { %v5489_v40 = vadd.f32 %v2339_v16, %v2338_v36  ;;  %2666 = vmatpush.msra.mxu3 %v2612_v41  ;;  %v5904_v16 = vld [vmem:[#allocation32_spill] sm:$0xff] }
 0x9f2   :  { %2359 = vmatmul.f32.vlgmr.msrb.gmra.mxu0 %v5489_v40  ;;  %2379 = vmatmul.f32.vlgmr.msra.gmra.mxu1 %v5489_v40 }
 0x9f3   :  { %2399 = vmatmul.f32.vlgmr.msra.gmra.mxu2 %v5489_v40  ;;  %2667 = vmatpush.msra.mxu3 %v2611_v10  ;;  %v2726_v10 = vld [vmem:[%s5713_s8 + $0x78] sm:$0xff] }
 0x9f4   :  { %2727 = vmatpush.msrb.mxu0 %v2726_v10 }
 0x9f5   :  { %2668 = vmatpush.msra.mxu3 %v2610_v47  ;;  %v2722_v47 = vld [vmem:[%s5713_s8 + $0x58] sm:$0xff] }
 0x9f7   :  { %2669 = vmatpush.msra.mxu3 %v2609_v29  ;;  %v2720_v29 = vld [vmem:[%s5713_s8 + $0x48] sm:$0xff] }
 0x9f9   :  { %2670 = vmatpush.msra.mxu3 %v2608_v14  ;;  %v2719_v14 = vld [vmem:[%s5713_s8 + $0x40] sm:$0xff] }
 0x9fb   :  { %2637 = vmatmul.f32.vlgmr.msrb.gmra.mxu2 %v5896_v58  ;;  %2671 = vmatpush.msra.mxu3 %v2607_v26  ;;  %v2718_v26 = vld [vmem:[%s5713_s8 + $0x38] sm:$0xff] }
 0xa03   :  { %2640 = vmatmul.f32.gmra.mxu2 %v5897_v28 }
 0xa0b   :  { %2643 = vmatmul.f32.gmra.mxu2 %v5246_v17 }
 0xa13   :  { %2646 = vmatmul.f32.gmra.mxu2 %v5348_v30 }
 0xa1b   :  { %2649 = vmatmul.f32.gmra.mxu2 %v5408_v19 }
 0xa23   :  { %2652 = vmatmul.f32.gmra.mxu2 %v5489_v40 }
 0xa6f   :  { %v2360_v20 = vpop.f32.mrf.mxu0  ;;  %v2380_v57 = vpop.f32.mrf.mxu1 }
 0xa70   :  { %v2406_v4 = vadd.f32 %v2360_v20, %v1421_v42  ;;  %v2426_v34 = vadd.f32 %v2380_v57, %v1503_v8  ;;  %v2606_v20 = vld [vmem:[%s5711_s6 + $0xa8] sm:$0xff] }
 0xa71   :  { %2672 = vmatpush.msra.mxu3 %v2606_v20  ;;  %v2714_v20 = vld [vmem:[%s5713_s8 + $0x18] sm:$0xff] }
 0xa72   :  { %v3044_v22 = vmul.f32 -1.442695, %v2406_v4  ;;  %v3045_v18 = vmul.f32 -1.442695, %v2426_v34  ;;  %v2605_v4 = vld [vmem:[%s5711_s6 + $0xa0] sm:$0xff] }
 0xa73   :  { %2673 = vmatpush.msra.mxu3 %v2605_v4  ;;  %v2712_v4 = vld [vmem:[%s5713_s8 + $0x8] sm:$0xff] }
 0xa74   :  { %3208 = vpow2.f32 %v3044_v22  ;;  %v2604_v22 = vld [vmem:[%s5711_s6 + $0x98] sm:$0xff] }
 0xa75   :  { %3210 = vpow2.f32 %v3045_v18  ;;  %2674 = vmatpush.msra.mxu3 %v2604_v22 }
 0xa76   :  { %v2400_v60 = vpop.f32.mrf.mxu2 }
 0xa77   :  { %v2446_v0 = vadd.f32 %v5484_v44, %v2400_v60 }
 0xa7a   :  { %v3209_v3 = vpop.eup %3208 }
 0xa7b   :  { %v3211_v43 = vpop.eup %3210  ;;  %v2410_v50 = vadd.f32 1.0, %v3209_v3  ;;  %v2603_v3 = vld [vmem:[%s5711_s6 + $0x90] sm:$0xff] }
 0xa7c   :  { %v2430_v31 = vadd.f32 1.0, %v3211_v43  ;;  %v2602_v43 = vld [vmem:[%s5711_s6 + $0x88] sm:$0xff]  ;;  %2675 = vmatpush.msra.mxu3 %v2603_v3 }
 0xa7d   :  { %3212 = vrcp.f32 %v2410_v50  ;;  %v2422_v46 = vand.u32 2147483648, %v2410_v50  ;;  %v2420_v48 = vand.u32 2147483647, %v2410_v50  ;;  %vm2416_vm2 = vweird.f32 %v2410_v50 }
 0xa7e   :  { %3214 = vrcp.f32 %v2430_v31  ;;  %v2442_v5 = vand.u32 2147483648, %v2430_v31  ;;  %vm2436_vm6 = vweird.f32 %v2430_v31  ;;  %v2440_v9 = vand.u32 2147483647, %v2430_v31  ;;  %2676 = vmatpush.msra.mxu3 %v2602_v43  ;;  %v2638_v22 = vpop.f32.mrf.mxu2 }
 0xa7f   :  { %v2423_v35 = vor.u32 1.1754944e-38, %v2422_v46  ;;  %vm2421_vm4 = vcmp.eq.f32.partialorder %v2420_v48, 8.507059e+37 }
 0xa80   :  { %v2443_v24 = vor.u32 1.1754944e-38, %v2442_v5  ;;  %vm2441_vm8 = vcmp.eq.f32.partialorder %v2440_v9, 8.507059e+37 }
 0xa83   :  { %v3213_v56 = vpop.eup %3212 }
 0xa84   :  { %v3215_v27 = vpop.eup %3214  ;;  %v2412_v45 = vmul.f32 %v3213_v56, %v2410_v50  ;;  %vm2417_vm1 = vweird.f32 %v3213_v56 }
 0xa85   :  { %v2432_v39 = vmul.f32 %v3215_v27, %v2430_v31  ;;  %vm2418_vm3 = vmor %vm2416_vm2, %vm2417_vm1  ;;  %vm2437_vm5 = vweird.f32 %v3215_v27  ;;  %v2601_v31 = vld [vmem:[%s5711_s6 + $0x80] sm:$0xff] }
 0xa86   :  { %v2413_v49 = vsub.f32 1.0, %v2412_v45  ;;  %vm2438_vm7 = vmor %vm2436_vm6, %vm2437_vm5  ;;  %2677 = vmatpush.msra.mxu3 %v2601_v31  ;;  %v2641_v3 = vpop.f32.mrf.mxu2 }
 0xa87   :  { %v2433_v13 = vsub.f32 1.0, %v2432_v39 }
 0xa88   :  { %v2414_v33 = vmul.f32 %v3213_v56, %v2413_v49 }
 0xa89   :  { %v2434_v23 = vmul.f32 %v3215_v27, %v2433_v13 }
 0xa8a   :  { %v2415_v15 = vadd.f32 %v3213_v56, %v2414_v33 }
 0xa8b   :  { %v2435_v25 = vadd.f32 %v3215_v27, %v2434_v23 }
 0xa8c   :  { %v2419_v61 = vsel %vm2418_vm3, %v3213_v56, %v2415_v15 }
 0xa8d   :  { %v2424_v63 = vsel %vm2421_vm4, %v2423_v35, %v2419_v61  ;;  %v2439_v55 = vsel %vm2438_vm7, %v3215_v27, %v2435_v25  ;;  %v5907_v25 = vld [vmem:[#allocation19_spill] sm:$0xff] }
 0xa8e   :  { %v2447_v6 = vmul.f32 %v2446_v0, %v2424_v63  ;;  %v2444_v38 = vsel %vm2441_vm8, %v2443_v24, %v2439_v55  ;;  %v5906_v0 = vld [vmem:[#allocation24_spill] sm:$0xff] }
 0xa8f   :  { %v2450_v1 = vsub.f32 1.0, %v2444_v38  ;;  %v2452_v51 = vmul.f32 %v2444_v38, %v5489_v40  ;;  %v1547_v63 = vadd.f32 %v5907_v25, %v5906_v0 }
 0xa90   :  { %v2448_v11 = vadd.f32 %v2447_v6, %v5903_v12 }
 0xa92   :  { %3216 = vtanh.f32 %v2448_v11  ;;  %v5908_v11 = vld [vmem:[#allocation13_spill] sm:$0xff] }
 0xa93   :  { %v1588_v55 = vadd.f32 %v5908_v11, %v1547_v63 }
 0xa98   :  { %v3217_v54 = vpop.eup %3216 }
 0xa99   :  { %v2451_v37 = vmul.f32 %v3217_v54, %v2450_v1 }
 0xa9b   :  { %v5509_v59 = vadd.f32 %v2452_v51, %v2451_v37 }
 0xa9d   :  { %2472 = vmatmul.f32.vlgmr.msrb.gmra.mxu3 %v5509_v59  ;;  %2492 = vmatmul.f32.vlgmr.msra.gmra.mxu0 %v5509_v59 }
 0xa9e   :  { %2512 = vmatmul.f32.vlgmr.msrb.gmra.mxu1 %v5509_v59  ;;  %2655 = vmatmul.f32.gmra.mxu2 %v5509_v59 }
 0xb1a   :  { %v2493_v36 = vpop.f32.mrf.mxu0 }
 0xb1b   :  { %v2539_v53 = vadd.f32 %v2493_v36, %v5904_v16  ;;  %v2513_v15 = vpop.f32.mrf.mxu1  ;;  %v2725_v36 = vld [vmem:[%s5713_s8 + $0x70] sm:$0xff]  ;;  %v2724_v16 = vld [vmem:[%s5713_s8 + $0x68] sm:$0xff] }
 0xb1c   :  { %v2559_v5 = vadd.f32 %v5484_v44, %v2513_v15  ;;  %2728 = vmatpush.msrb.mxu0 %v2725_v36 }
 0xb1d   :  { %v3047_v2 = vmul.f32 -1.442695, %v2539_v53  ;;  %v2723_v53 = vld [vmem:[%s5713_s8 + $0x60] sm:$0xff] }
 0xb1e   :  { %2729 = vmatpush.msrb.mxu0 %v2724_v16 }
 0xb1f   :  { %3218 = vpow2.f32 %v3047_v2  ;;  %v2721_v2 = vld [vmem:[%s5713_s8 + $0x50] sm:$0xff] }
 0xb20   :  { %v2473_v8 = vpop.f32.mrf.mxu3  ;;  %2730 = vmatpush.msrb.mxu0 %v2723_v53 }
 0xb21   :  { %v2519_v42 = vadd.f32 %v2473_v8, %v5905_v52  ;;  %v2717_v8 = vld [vmem:[%s5713_s8 + $0x30] sm:$0xff]  ;;  %v2716_v52 = vld [vmem:[%s5713_s8 + $0x28] sm:$0xff] }
 0xb22   :  { %2731 = vmatpush.msrb.mxu0 %v2722_v47 }
 0xb23   :  { %v3046_v57 = vmul.f32 -1.442695, %v2519_v42  ;;  %v2715_v42 = vld [vmem:[%s5713_s8 + $0x20] sm:$0xff] }
 0xb24   :  { %2732 = vmatpush.msrb.mxu0 %v2721_v2 }
 0xb25   :  { %v3219_v34 = vpop.eup %3218  ;;  %3220 = vpow2.f32 %v3046_v57  ;;  %v2713_v57 = vld [vmem:[%s5713_s8 + $0x10] sm:$0xff] }
 0xb26   :  { %v2543_v18 = vadd.f32 1.0, %v3219_v34  ;;  %2733 = vmatpush.msrb.mxu0 %v2720_v29  ;;  %v2711_v34 = vld [vmem:[%s5713_s8] sm:$0xff] }
 0xb28   :  { %3222 = vrcp.f32 %v2543_v18  ;;  %v2555_v24 = vand.u32 2147483648, %v2543_v18  ;;  %vm2549_vm14 = vweird.f32 %v2543_v18  ;;  %v2553_v1 = vand.u32 2147483647, %v2543_v18  ;;  %2734 = vmatpush.msrb.mxu0 %v2719_v14 }
 0xb29   :  { %v3392_v14 = vmov 0  }
 0xb2a   :  { %v2556_v51 = vor.u32 1.1754944e-38, %v2555_v24  ;;  %vm2554_vm0 = vcmp.eq.f32.partialorder %v2553_v1, 8.507059e+37  ;;  %2735 = vmatpush.msrb.mxu0 %v2718_v26  ;;  %3063 = vset.pattern.permute.xlu2 %v3392_v14 }
 0xb2b   :  { %v3221_v50 = vpop.eup %3220  ;;  %3062 = vset.pattern.permute.xlu1 %v3392_v14  ;;  %3061 = vset.pattern.permute.xlu0 %v3392_v14 }
 0xb2c   :  { %v2523_v56 = vadd.f32 1.0, %v3221_v50  ;;  %2736 = vmatpush.msrb.mxu0 %v2717_v8 }
 0xb2e   :  { %3224 = vrcp.f32 %v2523_v56  ;;  %v3223_v27 = vpop.eup %3222  ;;  %v2535_v33 = vand.u32 2147483648, %v2523_v56  ;;  %v2533_v23 = vand.u32 2147483647, %v2523_v56  ;;  %vm2529_vm10 = vweird.f32 %v2523_v56  ;;  %2737 = vmatpush.msrb.mxu0 %v2716_v52 }
 0xb2f   :  { %v2545_v45 = vmul.f32 %v3223_v27, %v2543_v18  ;;  %vm2550_vm13 = vweird.f32 %v3223_v27  ;;  %v3066_v18 = vld [vmem:[%s5712_s7] ss:$0 sm:$0xff] }
 0xb30   :  { %v2536_v61 = vor.u32 1.1754944e-38, %v2535_v33  ;;  %vm2534_vm12 = vcmp.eq.f32.partialorder %v2533_v23, 8.507059e+37  ;;  %vm2551_vm15 = vmor %vm2549_vm14, %vm2550_vm13  ;;  %2738 = vmatpush.msrb.mxu0 %v2715_v42  ;;  %v2639_v43 = vadd.f32 %v3066_v18, %v2638_v22 }
 0xb31   :  { %v2546_v13 = vsub.f32 1.0, %v2545_v45 }
 0xb32   :  { %2739 = vmatpush.msrb.mxu0 %v2714_v20 }
 0xb33   :  { %v2547_v60 = vmul.f32 %v3223_v27, %v2546_v13 }
 0xb34   :  { %v3225_v39 = vpop.eup %3224  ;;  %2740 = vmatpush.msrb.mxu0 %v2713_v57 }
 0xb35   :  { %v2525_v49 = vmul.f32 %v3225_v39, %v2523_v56  ;;  %vm2530_vm9 = vweird.f32 %v3225_v39  ;;  %v2548_v12 = vadd.f32 %v3223_v27, %v2547_v60  ;;  %v2644_v56 = vpop.f32.mrf.mxu2 }
 0xb36   :  { %vm2531_vm11 = vmor %vm2529_vm10, %vm2530_vm9  ;;  %2741 = vmatpush.msrb.mxu0 %v2712_v4  ;;  %v2645_v13 = vadd.f32 %v3066_v18, %v2644_v56  ;;  %vm2984_vm9 = vcmask 15360  }
 0xb37   :  { %v2526_v46 = vsub.f32 1.0, %v2525_v49  ;;  %v2552_v37 = vsel %vm2551_vm15, %v3223_v27, %v2548_v12  ;;  %v2642_v27 = vadd.f32 %v3066_v18, %v2641_v3 }
 0xb38   :  { %v2557_v7 = vsel %vm2554_vm0, %v2556_v51, %v2552_v37  ;;  %2742 = vmatpush.msrb.mxu0 %v2711_v34 }
 0xb39   :  { %v2527_v48 = vmul.f32 %v3225_v39, %v2526_v46  ;;  %v2563_v21 = vsub.f32 1.0, %v2557_v7  ;;  %v2565_v32 = vmul.f32 %v2557_v7, %v5509_v59 }
 0xb3b   :  { %v2528_v35 = vadd.f32 %v3225_v39, %v2527_v48 }
 0xb3d   :  { %v2532_v6 = vsel %vm2531_vm11, %v3225_v39, %v2528_v35  ;;  %v2647_v46 = vpop.f32.mrf.mxu2 }
 0xb3e   :  { %v2537_v9 = vsel %vm2534_vm12, %v2536_v61, %v2532_v6  ;;  %v2648_v60 = vadd.f32 %v3066_v18, %v2647_v46 }
 0xb3f   :  { %v2560_v38 = vmul.f32 %v2559_v5, %v2537_v9 }
 0xb41   :  { %v2561_v54 = vadd.f32 %v2560_v38, %v1588_v55 }
 0xb43   :  { %3226 = vtanh.f32 %v2561_v54 }
 0xb45   :  { %v2650_v0 = vpop.f32.mrf.mxu2 }
 0xb46   :  { %v2651_v25 = vadd.f32 %v3066_v18, %v2650_v0 }
 0xb49   :  { %v3227_v44 = vpop.eup %3226 }
 0xb4a   :  { %v2564_v62 = vmul.f32 %v3227_v44, %v2563_v21 }
 0xb4c   :  { %v5570_v41 = vadd.f32 %v2565_v32, %v2564_v62 }
 0xb4d   :  { %v2653_v9 = vpop.f32.mrf.mxu2 }
 0xb4e   :  { %2658 = vmatmul.f32.gmra.mxu2 %v5570_v41  ;;  %2678 = vmatmul.f32.vlgmr.msra.gmra.mxu3 %v5570_v41  ;;  %v2654_v12 = vadd.f32 %v3066_v18, %v2653_v9 }
 0xb55   :  { %v2656_v38 = vpop.f32.mrf.mxu2 }
 0xb56   :  { %2681 = vmatmul.f32.gmra.mxu3 %v5509_v59  ;;  %v2657_v1 = vadd.f32 %v3066_v18, %v2656_v38 }
 0xb5e   :  { %2684 = vmatmul.f32.gmra.mxu3 %v5489_v40 }
 0xb66   :  { %2687 = vmatmul.f32.gmra.mxu3 %v5408_v19 }
 0xb6e   :  { %2690 = vmatmul.f32.gmra.mxu3 %v5348_v30 }
 0xb76   :  { %2693 = vmatmul.f32.gmra.mxu3 %v5246_v17 }
 0xb7e   :  { %2696 = vmatmul.f32.gmra.mxu3 %v5897_v28 }
 0xb86   :  { %2699 = vmatmul.f32.gmra.mxu3 %v5896_v58 }
 0xbd1   :  { %v2679_v50 = vpop.f32.mrf.mxu3  ;;  %v2659_v7 = vpop.f32.mrf.mxu2 }
 0xbd2   :  { %v2680_v31 = vadd.f32 %v2679_v50, %v2639_v43  ;;  %v2660_v21 = vadd.f32 %v3066_v18, %v2659_v7 }
 0xbd4   :  { %3228 = vtanh.f32 %v2680_v31 }
 0xbd9   :  { %v2682_v45 = vpop.f32.mrf.mxu3 }
 0xbda   :  { %v3229_v39 = vpop.eup %3228  ;;  %v2683_v49 = vadd.f32 %v2682_v45, %v2642_v27 }
 0xbdb   :  { %2743 = vmatmul.f32.vlgmr.msrb.gmra.mxu0 %v3229_v39 }
 0xbdc   :  { %3230 = vtanh.f32 %v2683_v49 }
 0xbe1   :  { %v2685_v33 = vpop.f32.mrf.mxu3 }
 0xbe2   :  { %v3231_v48 = vpop.eup %3230  ;;  %v2686_v23 = vadd.f32 %v2685_v33, %v2645_v13 }
 0xbe3   :  { %2746 = vmatmul.f32.gmra.mxu0 %v3231_v48 }
 0xbe4   :  { %3232 = vtanh.f32 %v2686_v23 }
 0xbe9   :  { %v2688_v15 = vpop.f32.mrf.mxu3 }
 0xbea   :  { %v3233_v35 = vpop.eup %3232  ;;  %v2689_v61 = vadd.f32 %v2688_v15, %v2648_v60 }
 0xbeb   :  { %2749 = vmatmul.f32.gmra.mxu0 %v3233_v35 }
 0xbec   :  { %3234 = vtanh.f32 %v2689_v61 }
 0xbf1   :  { %v2691_v63 = vpop.f32.mrf.mxu3 }
 0xbf2   :  { %v3235_v5 = vpop.eup %3234  ;;  %v2692_v6 = vadd.f32 %v2691_v63, %v2651_v25 }
 0xbf3   :  { %2752 = vmatmul.f32.gmra.mxu0 %v3235_v5 }
 0xbf4   :  { %3236 = vtanh.f32 %v2692_v6 }
 0xbf9   :  { %v2694_v11 = vpop.f32.mrf.mxu3 }
 0xbfa   :  { %v3237_v55 = vpop.eup %3236  ;;  %v2695_v24 = vadd.f32 %v2694_v11, %v2654_v12 }
 0xbfb   :  { %2755 = vmatmul.f32.gmra.mxu0 %v3237_v55 }
 0xbfc   :  { %3238 = vtanh.f32 %v2695_v24 }
 0xc01   :  { %v2697_v54 = vpop.f32.mrf.mxu3 }
 0xc02   :  { %v3239_v37 = vpop.eup %3238  ;;  %v2698_v51 = vadd.f32 %v2697_v54, %v2657_v1 }
 0xc03   :  { %2758 = vmatmul.f32.gmra.mxu0 %v3239_v37 }
 0xc04   :  { %3240 = vtanh.f32 %v2698_v51 }
 0xc09   :  { %v2700_v44 = vpop.f32.mrf.mxu3 }
 0xc0a   :  { %v3241_v62 = vpop.eup %3240  ;;  %v2701_v32 = vadd.f32 %v2700_v44, %v2660_v21 }
 0xc0b   :  { %2761 = vmatmul.f32.gmra.mxu0 %v3241_v62 }
 0xc0c   :  { %3242 = vtanh.f32 %v2701_v32 }
 0xc12   :  { %v3243_v10 = vpop.eup %3242 }
 0xc13   :  { %2764 = vmatmul.f32.gmra.mxu0 %v3243_v10 }
 0xc58   :  { %v2744_v36 = vpop.f32.mrf.mxu0 }
 0xc60   :  { %v2747_v16 = vpop.f32.mrf.mxu0 }
 0xc61   :  { %v2768_v42 = vmax.f32 %v2744_v36, %v2747_v16 }
 0xc68   :  { %v2750_v53 = vpop.f32.mrf.mxu0 }
 0xc70   :  { %v2753_v47 = vpop.f32.mrf.mxu0 }
 0xc71   :  { %v2769_v8 = vmax.f32 %v2750_v53, %v2753_v47 }
 0xc73   :  { %v2772_v4 = vmax.f32 %v2768_v42, %v2769_v8 }
 0xc78   :  { %v2756_v2 = vpop.f32.mrf.mxu0 }
 0xc80   :  { %v2759_v29 = vpop.f32.mrf.mxu0 }
 0xc81   :  { %v2770_v20 = vmax.f32 %v2756_v2, %v2759_v29 }
 0xc88   :  { %v2762_v26 = vpop.f32.mrf.mxu0 }
 0xc90   :  { %v2765_v52 = vpop.f32.mrf.mxu0 }
 0xc91   :  { %v2771_v57 = vmax.f32 %v2762_v26, %v2765_v52 }
 0xc93   :  { %v2773_v34 = vmax.f32 %v2770_v20, %v2771_v57 }
 0xc95   :  { %v2774_v22 = vmax.f32 %v2772_v4, %v2773_v34 }
 0xc97   :  { %v2793_v18 = vsub.f32 %v2762_v26, %v2774_v22  ;;  %v2796_v3 = vsub.f32 %v2765_v52, %v2774_v22  ;;  %v2775_v43 = vsub.f32 %v2744_v36, %v2774_v22  ;;  %v2778_v50 = vsub.f32 %v2747_v16, %v2774_v22 }
 0xc98   :  { %v2781_v31 = vsub.f32 %v2750_v53, %v2774_v22  ;;  %v2784_v56 = vsub.f32 %v2753_v47, %v2774_v22  ;;  %v2787_v49 = vsub.f32 %v2756_v2, %v2774_v22  ;;  %v2790_v46 = vsub.f32 %v2759_v29, %v2774_v22 }
 0xc99   :  { %v2794_v27 = vmul.f32 1.442695, %v2793_v18  ;;  %v2797_v45 = vmul.f32 1.442695, %v2796_v3  ;;  %v2776_v39 = vmul.f32 1.442695, %v2775_v43 }
 0xc9a   :  { %v2779_v13 = vmul.f32 1.442695, %v2778_v50  ;;  %v2782_v33 = vmul.f32 1.442695, %v2781_v31  ;;  %v2785_v48 = vmul.f32 1.442695, %v2784_v56 }
 0xc9b   :  { %3244 = vpow2.f32 %v2794_v27  ;;  %v2788_v23 = vmul.f32 1.442695, %v2787_v49  ;;  %v2791_v60 = vmul.f32 1.442695, %v2790_v46 }
 0xc9c   :  { %3246 = vpow2.f32 %v2797_v45  ;;  %v2913_v45 = vlaneseq }
 0xc9d   :  { %3248 = vpow2.f32 %v2776_v39 }
 0xc9e   :  { %3250 = vpow2.f32 %v2779_v13 }
 0xc9f   :  { %3252 = vpow2.f32 %v2782_v33 }
 0xca0   :  { %3254 = vpow2.f32 %v2785_v48 }
 0xca1   :  { %v3245_v15 = vpop.eup %3244  ;;  %3256 = vpow2.f32 %v2788_v23 }
 0xca2   :  { %v3247_v35 = vpop.eup %3246  ;;  %3258 = vpow2.f32 %v2791_v60 }
 0xca3   :  { %v3249_v61 = vpop.eup %3248  ;;  %v2802_v9 = vadd.f32 %v3247_v35, %v3245_v15 }
 0xca4   :  { %v3251_v0 = vpop.eup %3250 }
 0xca5   :  { %v3253_v25 = vpop.eup %3252  ;;  %v2799_v63 = vadd.f32 %v3251_v0, %v3249_v61 }
 0xca6   :  { %v3255_v5 = vpop.eup %3254 }
 0xca7   :  { %v3257_v6 = vpop.eup %3256  ;;  %v2800_v12 = vadd.f32 %v3255_v5, %v3253_v25 }
 0xca8   :  { %v3259_v11 = vpop.eup %3258 }
 0xca9   :  { %v2801_v55 = vadd.f32 %v3259_v11, %v3257_v6  ;;  %v2803_v24 = vadd.f32 %v2800_v12, %v2799_v63 }
 0xcab   :  { %v2804_v38 = vadd.f32 %v2802_v9, %v2801_v55 }
 0xcad   :  { %v2805_v1 = vadd.f32 %v2804_v38, %v2803_v24  ;;  %v2957_v38 = vld [vmem:[%s5715_s10 + $0x68] sm:$0xff] }
 0xcaf   :  { %3260 = vrcp.f32 %v2805_v1  ;;  %v2817_v7 = vand.u32 2147483648, %v2805_v1  ;;  %v2815_v44 = vand.u32 2147483647, %v2805_v1  ;;  %vm2811_vm2 = vweird.f32 %v2805_v1 }
 0xcb1   :  { %v2818_v32 = vor.u32 1.1754944e-38, %v2817_v7  ;;  %vm2816_vm4 = vcmp.eq.f32.partialorder %v2815_v44, 8.507059e+37  ;;  %v2952_v7 = vld [vmem:[%s5715_s10 + $0x40] sm:$0xff]  ;;  %v2950_v44 = vld [vmem:[%s5715_s10 + $0x30] sm:$0xff] }
 0xcb5   :  { %v3261_v54 = vpop.eup %3260 }
 0xcb6   :  { %v2807_v37 = vmul.f32 %v3261_v54, %v2805_v1  ;;  %vm2812_vm1 = vweird.f32 %v3261_v54  ;;  %v2956_v1 = vld [vmem:[%s5715_s10 + $0x60] sm:$0xff] }
 0xcb7   :  { %vm2813_vm3 = vmor %vm2811_vm2, %vm2812_vm1 }
 0xcb8   :  { %v2808_v51 = vsub.f32 1.0, %v2807_v37  ;;  %v2954_v37 = vld [vmem:[%s5715_s10 + $0x50] sm:$0xff] }
 0xcba   :  { %v2809_v21 = vmul.f32 %v3261_v54, %v2808_v51  ;;  %v2953_v51 = vld [vmem:[%s5715_s10 + $0x48] sm:$0xff] }
 0xcbc   :  { %v2810_v62 = vadd.f32 %v3261_v54, %v2809_v21  ;;  %v2951_v21 = vld [vmem:[%s5715_s10 + $0x38] sm:$0xff] }
 0xcbe   :  { %v2814_v10 = vsel %vm2813_vm3, %v3261_v54, %v2810_v62  ;;  %v2955_v54 = vld [vmem:[%s5715_s10 + $0x58] sm:$0xff]  ;;  %v2949_v62 = vld [vmem:[%s5715_s10 + $0x28] sm:$0xff] }
 0xcbf   :  { %v2819_v36 = vsel %vm2816_vm4, %v2818_v32, %v2814_v10  ;;  %v2948_v32 = vld [vmem:[%s5715_s10 + $0x20] sm:$0xff]  ;;  %v2947_v10 = vld [vmem:[%s5715_s10 + $0x18] sm:$0xff] }
 0xcc0   :  { %v2825_v16 = vmul.f32 %v3257_v6, %v2819_v36  ;;  %v2823_v53 = vmul.f32 %v3253_v25, %v2819_v36  ;;  %v2821_v47 = vmul.f32 %v3249_v61, %v2819_v36  ;;  %v2826_v2 = vmul.f32 %v3259_v11, %v2819_v36 }
 0xcc1   :  { %v2824_v29 = vmul.f32 %v3255_v5, %v2819_v36  ;;  %v2822_v14 = vmul.f32 %v3251_v0, %v2819_v36  ;;  %v2828_v26 = vmul.f32 %v3247_v35, %v2819_v36  ;;  %v2827_v8 = vmul.f32 %v3245_v15, %v2819_v36  ;;  %v2946_v36 = vld [vmem:[%s5715_s10 + $0x10] sm:$0xff] }
 0xcc2   :  { %2860 = vperm.xlu2 %3063, %v2825_v16   ;;  %2846 = vperm.xlu1 %3062, %v2823_v53   ;;  %v2914_v0 = vand.u32 127, %v2913_v45  ;;  %v2945_v16 = vld [vmem:[%s5715_s10 + $0x8] sm:$0xff]  ;;  %v2944_v53 = vld [vmem:[%s5715_s10] sm:$0xff] }
 0xcc3   :  { %2832 = vperm.xlu0 %3061, %v2821_v47  }
 0xcc4   :  { %vm2915_vm5 = vcmp.lt.s32.totalorder %v2914_v0, 64 }
 0xcca   :  { %2867 = vperm.xlu2 %3063, %v2826_v2   ;;  %2853 = vperm.xlu1 %3062, %v2824_v29  }
 0xccb   :  { %2839 = vperm.xlu0 %3061, %v2822_v14  }
 0xcd2   :  { %2880 = vperm.xlu1 %3062, %v2828_v26  }
 0xcd3   :  { %2874 = vperm.xlu0 %3061, %v2827_v8  }
 0xd1c   :  { %v2861_v20 = vpop.permute.xlu2 %2860 }
 0xd1d   :  { %v2863_v3 = vmul.f32 %v2861_v20, %v5408_v19  ;;  %v2900_v31 = vmul.f32 %v2861_v20, %v5348_v30 }
 0xd24   :  { %v2868_v34 = vpop.permute.xlu2 %2867 }
 0xd25   :  { %v2870_v39 = vmul.f32 %v2868_v34, %v5489_v40  ;;  %v2902_v49 = vmul.f32 %v2868_v34, %v5246_v17  ;;  %v2939_v34 = vld [vmem:[%s5714_s9] sm:$0x3] }
 0xd27   :  { %v2908_v25 = vadd.f32 %v2902_v49, %v2900_v31 }
 0xd34   :  { %v2847_v52 = vpop.permute.xlu1 %2846 }
 0xd35   :  { %v2833_v42 = vpop.permute.xlu0 %2832  ;;  %v2849_v56 = vmul.f32 %v2847_v52, %v5246_v17  ;;  %v2896_v27 = vmul.f32 %v2847_v52, %v5489_v40  ;;  %v2886_v17 = vadd.f32 %v2870_v39, %v2863_v3  ;;  %v3067_v39 = vld [vmem:[%s5716_s11] ss:$0 sm:$0xff] }
 0xd36   :  { %v2835_v13 = vmul.f32 %v2833_v42, %v5896_v58  ;;  %v2892_v46 = vmul.f32 %v2833_v42, %v5570_v41 }
 0xd3c   :  { %v2854_v57 = vpop.permute.xlu1 %2853 }
 0xd3d   :  { %v2840_v4 = vpop.permute.xlu0 %2839  ;;  %v2856_v22 = vmul.f32 %v2854_v57, %v5348_v30  ;;  %v2898_v18 = vmul.f32 %v2854_v57, %v5408_v19 }
 0xd3e   :  { %v2842_v43 = vmul.f32 %v2840_v4, %v5897_v28  ;;  %v2894_v50 = vmul.f32 %v2840_v4, %v5509_v59 }
 0xd3f   :  { %v2885_v33 = vadd.f32 %v2856_v22, %v2849_v56  ;;  %v2907_v48 = vadd.f32 %v2898_v18, %v2896_v27  ;;  %v2942_v56 = vperm.slane %v2939_v34, 1 }
 0xd40   :  { %v2884_v15 = vadd.f32 %v2842_v43, %v2835_v13  ;;  %v2906_v35 = vadd.f32 %v2894_v50, %v2892_v46  ;;  %v2940_v43 = vperm.slane %v2939_v34, 0 }
 0xd42   :  { %v2888_v6 = vadd.f32 %v2885_v33, %v2884_v15  ;;  %v2910_v9 = vadd.f32 %v2907_v48, %v2906_v35 }
 0xd44   :  { %v2881_v19 = vpop.permute.xlu1 %2880 }
 0xd45   :  { %v2883_v23 = vmul.f32 %v2881_v19, %v5570_v41  ;;  %v2905_v30 = vmul.f32 %v2881_v19, %v5896_v58  ;;  %v2875_v60 = vpop.permute.xlu0 %2874 }
 0xd46   :  { %v2877_v61 = vmul.f32 %v2875_v60, %v5509_v59  ;;  %v2904_v40 = vmul.f32 %v2875_v60, %v5897_v28  ;;  %v2959_v28 = vld [vmem:[%s5715_s10 + $0x78] sm:$0xff]  ;;  %v2958_v59 = vld [vmem:[%s5715_s10 + $0x70] sm:$0xff] }
 0xd47   :  { %2964 = vmatpush.msra.mxu1 %v2959_v28 }
 0xd48   :  { %v2887_v63 = vadd.f32 %v2883_v23, %v2877_v61  ;;  %v2909_v5 = vadd.f32 %v2905_v30, %v2904_v40 }
 0xd49   :  { %2965 = vmatpush.msra.mxu1 %v2958_v59 }
 0xd4a   :  { %v2889_v12 = vadd.f32 %v2887_v63, %v2886_v17  ;;  %v2911_v11 = vadd.f32 %v2909_v5, %v2908_v25 }
 0xd4b   :  { %2966 = vmatpush.msra.mxu1 %v2957_v38 }
 0xd4c   :  { %v2890_v41 = vadd.f32 %v2889_v12, %v2888_v6  ;;  %v2912_v55 = vadd.f32 %v2911_v11, %v2910_v9 }
 0xd4d   :  { %2967 = vmatpush.msra.mxu1 %v2956_v1 }
 0xd4e   :  { %v2916_v58 = vsel %vm2915_vm5, %v2890_v41, %v2912_v55 }
 0xd4f   :  { %2917 = vadd.xlane.f32.xlu2 %v2916_v58  ;;  %v2920_v24 = vmul.f32 %v2916_v58, %v2916_v58  ;;  %2968 = vmatpush.msra.mxu1 %v2955_v54 }
 0xd51   :  { %2921 = vadd.xlane.f32.xlu0 %v2920_v24  ;;  %2969 = vmatpush.msra.mxu1 %v2954_v37 }
 0xd53   :  { %2970 = vmatpush.msra.mxu1 %v2953_v51 }
 0xd55   :  { %2971 = vmatpush.msra.mxu1 %v2952_v7 }
 0xd57   :  { %2972 = vmatpush.msra.mxu1 %v2951_v21 }
 0xd59   :  { %2973 = vmatpush.msra.mxu1 %v2950_v44 }
 0xd5b   :  { %2974 = vmatpush.msra.mxu1 %v2949_v62 }
 0xd5d   :  { %2975 = vmatpush.msra.mxu1 %v2948_v32 }
 0xd5f   :  { %2976 = vmatpush.msra.mxu1 %v2947_v10 }
 0xd61   :  { %2977 = vmatpush.msra.mxu1 %v2946_v36 }
 0xd63   :  { %2978 = vmatpush.msra.mxu1 %v2945_v16 }
 0xd65   :  { %2979 = vmatpush.msra.mxu1 %v2944_v53 }
 0xdc2   :  { %v2918_v47 = vpop.xlane.xlu2 %2917 }
 0xdc3   :  { %v2919_v2 = vmul.f32 0.015625, %v2918_v47 }
 0xdc4   :  { %v2922_v29 = vpop.xlane.xlu0 %2921 }
 0xdc5   :  { %v2924_v14 = vmul.f32 %v2919_v2, %v2919_v2  ;;  %v2923_v26 = vmul.f32 0.015625, %v2922_v29  ;;  %v2926_v3 = vsub.f32 %v2916_v58, %v2919_v2 }
 0xdc7   :  { %v2925_v8 = vsub.f32 %v2923_v26, %v2924_v14 }
 0xdc9   :  { %v2927_v52 = vadd.f32 1e-05, %v2925_v8 }
 0xdcb   :  { %3262 = vrsqrt.f32 %v2927_v52  ;;  %vm2934_vm7 = vweird.f32 %v2927_v52 }
 0xdd1   :  { %v3263_v42 = vpop.eup %3262 }
 0xdd2   :  { %v2929_v20 = vmul.f32 %v3263_v42, %v2927_v52  ;;  %vm2935_vm6 = vweird.f32 %v3263_v42 }
 0xdd3   :  { %vm2936_vm8 = vmor %vm2934_vm7, %vm2935_vm6 }
 0xdd4   :  { %v2930_v57 = vmul.f32 %v3263_v42, %v2929_v20 }
 0xdd6   :  { %v2931_v4 = vmul.f32 0.5, %v2930_v57 }
 0xdd8   :  { %v2932_v22 = vsub.f32 1.5, %v2931_v4 }
 0xdda   :  { %v2933_v18 = vmul.f32 %v3263_v42, %v2932_v22 }
 0xddc   :  { %v2937_v50 = vsel %vm2936_vm8, %v3263_v42, %v2933_v18 }
 0xddd   :  { %v2938_v31 = vmul.f32 %v2937_v50, %v2926_v3 }
 0xddf   :  { %v2941_v27 = vmul.f32 %v2940_v43, %v2938_v31 }
 0xde1   :  { %v2943_v45 = vadd.f32 %v2942_v56, %v2941_v27 }
 0xde3   :  { %2980 = vmatmul.f32.vlgmr.msra.gmra.mxu1 %v2943_v45 }
 0xe60   :  { %v2981_v49 = vpop.f32.mrf.mxu1 }
 0xe61   :  { %v2982_v13 = vadd.f32 %v3067_v39, %v2981_v49 }
 0xe63   :  { %2985 = vst.msk [vmem:[%s5717_s12] sm:$0xff] %vm2984_vm9, %v2982_v13 }
 0xe64   :  { %2990 = vsyncpa [#allocation6], 1 }

</bundles_post_ra>
